<compile_context>
chip_gen: v7x
topology: tpu7x:2x2x1
jax: 0.10.0
libtpu: 0.0.40
codegen_flags: <defaults>
</compile_context>

<pallas_src>
import numpy as np
import jax
import jax.numpy as jnp
from jax import lax
from jax.experimental import pallas as pl
from jax.experimental.pallas import tpu as pltpu

LANE = 128
WIDE = 2 * LANE          # lane width of the conv intermediates (<=168 used)
TB = 8                   # batch tile per grid step (multiple of 8)

_K = 5                   # conv kernel size
_H1 = _W1 = 28           # conv1 output spatial size (padding=2)
_HP1 = _WP1 = 14         # after pool1
_H2 = _W2 = 10           # conv2 output spatial size (valid conv)
_HP2 = _WP2 = 5          # after pool2

_R0 = TB * 32            # input rows per tile, (n, h0) major          = 256
_R1 = _R0 - (_K - 1)     # conv1 rows computed                          = 252
_R1M = _R1 - 1           # rows after the row-pair max                  = 251
_RP1 = TB * _HP1         # pool1 rows, (n, h1) major                    = 112
_R2 = _RP1 - (_K - 1)    # conv2 rows computed                          = 108
_R2M = _R2 - 1           #                                              = 107
_RP2 = _HP2 * TB         # pool2 rows, (ph, n) major                    = 40


def _round_up(x, m):
    return (x + m - 1) // m * m


# --------------------------------------------------------------------------
# The fused Pallas kernel (one batch tile of TB samples per grid step)
# --------------------------------------------------------------------------
def _lenet_kernel(x_ref, w1_ref, q_ref, s1_ref, b1_ref,
                  w2_ref, s2_ref, b2_ref,
                  wf1_ref, bf1_ref, wf2_ref, bf2_ref, wf3_ref, bf3_ref,
                  out_ref):
    f32 = jnp.float32
    x = x_ref[...]                                        # (256, 32)  (n,h0) x w0

    # ---- conv1: 5 banded matmuls on row-shifted input slices (tree sum) ---
    c1 = [jnp.dot(x[dh:dh + _R1], w1_ref[dh], preferred_element_type=f32)
          for dh in range(_K)]
    y1 = (c1[0] + c1[1]) + (c1[2] + c1[3]) + c1[4]        # (252, 256) lanes=(c,w)

    # ---- pool1 (2x2 max): lane+1 neighbour via constant shift matmul,
    #      row+1 neighbour via a slice pair; then compact rows, bias, relu --
    y1s = jnp.dot(y1, q_ref[...], preferred_element_type=f32)
    m = jnp.maximum(y1, y1s)
    m = jnp.maximum(m[:_R1M], m[1:_R1M + 1])              # (251, 256)
    p1 = jnp.dot(s1_ref[...], m, preferred_element_type=f32)   # (112, 256)
    p1 = jnp.maximum(p1 + b1_ref[...], 0.0)               # rows=(n,h1), lanes=(c,2*w1)

    # ---- conv2: 5 banded matmuls on row-shifted pooled slices -------------
    c2 = [jnp.dot(p1[dh:dh + _R2], w2_ref[dh], preferred_element_type=f32)
          for dh in range(_K)]
    y2 = (c2[0] + c2[1]) + (c2[2] + c2[3]) + c2[4]        # (108, 256) lanes=(cout,w2)

    # ---- pool2 + bias + relu ----------------------------------------------
    y2s = jnp.dot(y2, q_ref[...], preferred_element_type=f32)
    m2 = jnp.maximum(y2, y2s)
    m2 = jnp.maximum(m2[:_R2M], m2[1:_R2M + 1])           # (107, 256)
    p2 = jnp.dot(s2_ref[...], m2, preferred_element_type=f32)  # (40, 256) rows=(ph,n)
    p2 = jnp.maximum(p2 + b2_ref[...], 0.0)

    # ---- fc1 as 5 per-row-group matmuls (aligned, contiguous slices) ------
    f1 = [jnp.dot(p2[ph * TB:(ph + 1) * TB], wf1_ref[ph],
                  preferred_element_type=f32) for ph in range(_HP2)]
    h = (f1[0] + f1[1]) + (f1[2] + f1[3]) + f1[4]         # (TB, hp)
    h = jnp.maximum(h + bf1_ref[...], 0.0)

    # ---- fc2 + relu, fc3 ---------------------------------------------------
    h = jnp.maximum(jnp.dot(h, wf2_ref[...], preferred_element_type=f32)
                    + bf2_ref[...], 0.0)
    out = jnp.dot(h, wf3_ref[...], preferred_element_type=f32) + bf3_ref[...]
    out_ref[...] = out.astype(out_ref.dtype)


def _lenet_pallas(x_rows, prepped, n_pad):
    grid = (n_pad // TB,)
    consts = (prepped["w1"], prepped["q"], prepped["s1"], prepped["b1"],
              prepped["w2"], prepped["s2"], prepped["b2"],
              prepped["wf1"], prepped["bf1"], prepped["wf2"], prepped["bf2"],
              prepped["wf3"], prepped["bf3"])

    def const_spec(a):
        nd = a.ndim
        return pl.BlockSpec(a.shape, lambda i, _nd=nd: (0,) * _nd)

    hp = prepped["wf2"].shape[0]
    flops_tile = 2 * (_K * _R1 * 32 * WIDE
                      + _R1 * WIDE * WIDE
                      + _RP1 * _R1M * WIDE
                      + _K * _R2 * WIDE * WIDE
                      + _R2 * WIDE * WIDE
                      + _RP2 * _R2M * WIDE
                      + _HP2 * TB * WIDE * hp
                      + TB * hp * LANE
                      + TB * LANE * LANE)
    bytes_accessed = (int(x_rows.size) * 4
                      + sum(int(a.size) * 4 for a in consts)
                      + n_pad * LANE * 4)

    return pl.pallas_call(
        _lenet_kernel,
        out_shape=jax.ShapeDtypeStruct((n_pad, LANE), jnp.float32),
        grid=grid,
        in_specs=[pl.BlockSpec((TB * 32, 32), lambda i: (i, 0))]
                 + [const_spec(a) for a in consts],
        out_specs=pl.BlockSpec((TB, LANE), lambda i: (i, 0)),
        compiler_params=pltpu.CompilerParams(
            dimension_semantics=("parallel",),
            vmem_limit_bytes=32 * 1024 * 1024),
        cost_estimate=pl.CostEstimate(flops=flops_tile * grid[0],
                                      transcendentals=0,
                                      bytes_accessed=bytes_accessed),
    )(x_rows, *consts)


# --------------------------------------------------------------------------
# One-time host-side parameter preparation (all constants are batch-size
# independent: their sizes only depend on the fixed batch tile TB)
# --------------------------------------------------------------------------
def prepare_params(params):
    f32 = np.float32
    c1w = np.asarray(params["conv1_w"], f32)   # (6,1,5,5)
    c1b = np.asarray(params["conv1_b"], f32)
    c2w = np.asarray(params["conv2_w"], f32)   # (16,6,5,5)
    c2b = np.asarray(params["conv2_b"], f32)
    f1w = np.asarray(params["fc1_w"], f32)     # (hidden, 400)
    f1b = np.asarray(params["fc1_b"], f32)
    f2w = np.asarray(params["fc2_w"], f32)     # (84, hidden)
    f2b = np.asarray(params["fc2_b"], f32)
    f3w = np.asarray(params["fc3_w"], f32)     # (10, 84)
    f3b = np.asarray(params["fc3_b"], f32)
    hidden = f1w.shape[0]
    hp = _round_up(hidden, LANE)

    # conv1 -> 5 banded matrices: w1[dh, w0, c*28 + w] = conv1_w[c,0,dh,w0-w]
    w1 = np.zeros((_K, 32, WIDE), f32)
    for c in range(6):
        for dh in range(_K):
            for dw in range(_K):
                for w in range(_W1):
                    w1[dh, w + dw, c * _W1 + w] = c1w[c, 0, dh, dw]
    b1 = np.zeros((1, WIDE), f32)
    for c in range(6):
        b1[0, c * _W1:(c + 1) * _W1] = c1b[c]

    # lane-shift-by-one permutation (shared by both pools)
    q = np.zeros((WIDE, WIDE), f32)
    q[np.arange(1, WIDE), np.arange(WIDE - 1)] = 1.0

    # pool1 row compaction: output row (n, h1)  <-  m row n*32 + 2*h1
    s1 = np.zeros((_RP1, _R1M), f32)
    for n in range(TB):
        for h1 in range(_HP1):
            s1[n * _HP1 + h1, n * 32 + 2 * h1] = 1.0

    # conv2 -> 5 banded matrices on the pooled layout
    # input lane = cin*28 + 2*w1 ; output lane = cout*10 + w2
    w2 = np.zeros((_K, WIDE, WIDE), f32)
    for co in range(16):
        for ci in range(6):
            for dh in range(_K):
                for dw in range(_K):
                    for w2o in range(_W2):
                        w2[dh, ci * _W1 + 2 * (w2o + dw), co * _W2 + w2o] = \
                            c2w[co, ci, dh, dw]
    b2 = np.zeros((1, WIDE), f32)
    for co in range(16):
        b2[0, co * _W2:(co + 1) * _W2] = c2b[co]

    # pool2 row compaction: output row (ph, n)  <-  m2 row n*14 + 2*ph
    s2 = np.zeros((_RP2, _R2M), f32)
    for ph in range(_HP2):
        for n in range(TB):
            s2[ph * TB + n, n * _HP1 + 2 * ph] = 1.0

    # fc1 folded per pooled row ph (torch NCHW flatten index = c*25 + ph*5 + pw)
    wf1 = np.zeros((_HP2, WIDE, hp), f32)
    for ph in range(_HP2):
        for co in range(16):
            for pw in range(_WP2):
                wf1[ph, co * _W2 + 2 * pw, :hidden] = \
                    f1w[:, co * _HP2 * _WP2 + ph * _WP2 + pw]
    bf1 = np.zeros((1, hp), f32); bf1[0, :hidden] = f1b
    wf2 = np.zeros((hp, LANE), f32); wf2[:hidden, :84] = f2w.T
    bf2 = np.zeros((1, LANE), f32); bf2[0, :84] = f2b
    wf3 = np.zeros((LANE, LANE), f32); wf3[:84, :10] = f3w.T
    bf3 = np.zeros((1, LANE), f32); bf3[0, :10] = f3b

    jn = jnp.asarray
    return dict(w1=jn(w1), q=jn(q), s1=jn(s1), b1=jn(b1),
                w2=jn(w2), s2=jn(s2), b2=jn(b2),
                wf1=jn(wf1), bf1=jn(bf1), wf2=jn(wf2), bf2=jn(bf2),
                wf3=jn(wf3), bf3=jn(bf3))


def lenet_forward(x_nchw, prepped):
    n = x_nchw.shape[0]
    n_pad = _round_up(n, TB)
    # zero-pad the batch to a multiple of TB and the image to 32x32 (conv1's
    # padding=2); then flatten to (n, h0)-major rows for the kernel.
    x = jnp.pad(x_nchw[:, 0], ((0, n_pad - n), (2, 2), (2, 2)))
    x = x.reshape(n_pad * 32, 32)
    out = _lenet_pallas(x, prepped, n_pad)
    return out[:n, :10]


# --------------------------------------------------------------------------
# Parameter init (torch-style uniform) and pure-JAX reference
# --------------------------------------------------------------------------
def init_lenet_params(key, hidden=120):
    def uniform(k, shape, fan_in):
        bound = 1.0 / jnp.sqrt(jnp.float32(fan_in))
        return jax.random.uniform(k, shape, jnp.float32, -bound, bound)

    ks = jax.random.split(key, 10)
    return {
        "conv1_w": uniform(ks[0], (6, 1, 5, 5), 1 * 5 * 5),
        "conv1_b": uniform(ks[1], (6,), 1 * 5 * 5),
        "conv2_w": uniform(ks[2], (16, 6, 5, 5), 6 * 5 * 5),
        "conv2_b": uniform(ks[3], (16,), 6 * 5 * 5),
        "fc1_w": uniform(ks[4], (hidden, 16 * 5 * 5), 16 * 5 * 5),
        "fc1_b": uniform(ks[5], (hidden,), 16 * 5 * 5),
        "fc2_w": uniform(ks[6], (84, hidden), hidden),
        "fc2_b": uniform(ks[7], (84,), hidden),
        "fc3_w": uniform(ks[8], (10, 84), 84),
        "fc3_b": uniform(ks[9], (10,), 84),
    }


def lenet_reference(x, params):
    """Pure-JAX reference with torch semantics, for the correctness check."""
    hi = lax.Precision.HIGHEST
    dn = ("NCHW", "OIHW", "NCHW")
    y = lax.conv_general_dilated(x, params["conv1_w"], (1, 1),
                                 ((2, 2), (2, 2)), dimension_numbers=dn,
                                 precision=hi)
    y = jnp.maximum(y + params["conv1_b"][None, :, None, None], 0.0)
    y = lax.reduce_window(y, -jnp.inf, lax.max, (1, 1, 2, 2), (1, 1, 2, 2),
                          "VALID")
    y = lax.conv_general_dilated(y, params["conv2_w"], (1, 1), "VALID",
                                 dimension_numbers=dn, precision=hi)
    y = jnp.maximum(y + params["conv2_b"][None, :, None, None], 0.0)
    y = lax.reduce_window(y, -jnp.inf, lax.max, (1, 1, 2, 2), (1, 1, 2, 2),
                          "VALID")
    flat = y.reshape(y.shape[0], -1)                         # NCHW flatten
    h = jnp.maximum(flat @ params["fc1_w"].T + params["fc1_b"], 0.0)
    h = jnp.maximum(h @ params["fc2_w"].T + params["fc2_b"], 0.0)
    return h @ params["fc3_w"].T + params["fc3_b"]


if __name__ == "__main__":
    key = jax.random.PRNGKey(0)
    k_params, k_x = jax.random.split(key)
    params = init_lenet_params(k_params, hidden=120)
    prepped = prepare_params(params)            # one-time, host-side folding

    # LeNet's fc1 requires 16*5*5 features, which pins the input to 28x28.
    x = jax.random.normal(k_x, (2, 1, 28, 28), dtype=jnp.float32)

    fwd = jax.jit(lenet_forward)
    out = jax.block_until_ready(fwd(x, prepped))
    assert out.shape == (2, 10) and out.dtype == jnp.float32

    ref = jax.block_until_ready(lenet_reference(x, params))
    assert jnp.allclose(out, ref, atol=1e-2, rtol=1e-2), (
        f"max abs err {float(jnp.max(jnp.abs(out - ref)))}")

    print("KERNEL_OK")
</pallas_src>

<mosaic_0001>
module attributes {stable_mosaic.version = 11 : i64} {
  func.func @_lenet_kernel(%arg0: i32, %arg1: memref<256x32xf32, #tpu.memory_space<vmem>>, %arg2: memref<5x32x256xf32, #tpu.memory_space<vmem>>, %arg3: memref<256x256xf32, #tpu.memory_space<vmem>>, %arg4: memref<112x251xf32, #tpu.memory_space<vmem>>, %arg5: memref<1x256xf32, #tpu.memory_space<vmem>>, %arg6: memref<5x256x256xf32, #tpu.memory_space<vmem>>, %arg7: memref<40x107xf32, #tpu.memory_space<vmem>>, %arg8: memref<1x256xf32, #tpu.memory_space<vmem>>, %arg9: memref<5x256x128xf32, #tpu.memory_space<vmem>>, %arg10: memref<1x128xf32, #tpu.memory_space<vmem>>, %arg11: memref<128x128xf32, #tpu.memory_space<vmem>>, %arg12: memref<1x128xf32, #tpu.memory_space<vmem>>, %arg13: memref<128x128xf32, #tpu.memory_space<vmem>>, %arg14: memref<1x128xf32, #tpu.memory_space<vmem>>, %arg15: memref<8x128xf32, #tpu.memory_space<vmem>>) attributes {dimension_semantics = [#tpu.dimension_semantics<parallel>], iteration_bounds = array<i64: 1>, scalar_prefetch = 0 : i64, scratch_operands = 0 : i64, tpu.core_type = #tpu.core_type<tc>, window_params = [{transform_indices = @transform_0, window_bounds = array<i64: 256, 32>}, {pipeline_mode = #tpu.pipeline_mode<synchronous>, transform_indices = @transform_1, window_bounds = array<i64: 5, 32, 256>}, {pipeline_mode = #tpu.pipeline_mode<synchronous>, transform_indices = @transform_2, window_bounds = array<i64: 256, 256>}, {pipeline_mode = #tpu.pipeline_mode<synchronous>, transform_indices = @transform_3, window_bounds = array<i64: 112, 251>}, {pipeline_mode = #tpu.pipeline_mode<synchronous>, transform_indices = @transform_4, window_bounds = array<i64: 1, 256>}, {pipeline_mode = #tpu.pipeline_mode<synchronous>, transform_indices = @transform_5, window_bounds = array<i64: 5, 256, 256>}, {pipeline_mode = #tpu.pipeline_mode<synchronous>, transform_indices = @transform_6, window_bounds = array<i64: 40, 107>}, {pipeline_mode = #tpu.pipeline_mode<synchronous>, transform_indices = @transform_7, window_bounds = array<i64: 1, 256>}, {pipeline_mode = #tpu.pipeline_mode<synchronous>, transform_indices = @transform_8, window_bounds = array<i64: 5, 256, 128>}, {pipeline_mode = #tpu.pipeline_mode<synchronous>, transform_indices = @transform_9, window_bounds = array<i64: 1, 128>}, {pipeline_mode = #tpu.pipeline_mode<synchronous>, transform_indices = @transform_10, window_bounds = array<i64: 128, 128>}, {pipeline_mode = #tpu.pipeline_mode<synchronous>, transform_indices = @transform_11, window_bounds = array<i64: 1, 128>}, {pipeline_mode = #tpu.pipeline_mode<synchronous>, transform_indices = @transform_12, window_bounds = array<i64: 128, 128>}, {pipeline_mode = #tpu.pipeline_mode<synchronous>, transform_indices = @transform_13, window_bounds = array<i64: 1, 128>}, {transform_indices = @transform_14, window_bounds = array<i64: 8, 128>}]} {
    %c0 = arith.constant 0 : index
    %c0_0 = arith.constant 0 : index
    %0 = vector.load %arg1[%c0, %c0_0] : memref<256x32xf32, #tpu.memory_space<vmem>>, vector<256x32xf32>
    %1 = vector.extract_strided_slice %0 {offsets = [0, 0], sizes = [252, 32], strides = [1, 1]} : vector<256x32xf32> to vector<252x32xf32>
    %c0_1 = arith.constant 0 : index
    %c0_2 = arith.constant 0 : index
    %c0_3 = arith.constant 0 : index
    %2 = vector.load %arg2[%c0_1, %c0_2, %c0_3] : memref<5x32x256xf32, #tpu.memory_space<vmem>>, vector<1x32x256xf32>
    %3 = vector.shape_cast %2 : vector<1x32x256xf32> to vector<32x256xf32>
    %cst = arith.constant dense<0.000000e+00> : vector<252x256xf32>
    %4 = tpu.matmul %1, %3, %cst {dimension_numbers = #tpu.dot_dimension_numbers<[1], [0], [0], [1], [0, 0, 1, 1], [], []>} : vector<252x32xf32>, vector<32x256xf32>, vector<252x256xf32> -> vector<252x256xf32>
    %5 = vector.extract_strided_slice %0 {offsets = [1, 0], sizes = [252, 32], strides = [1, 1]} : vector<256x32xf32> to vector<252x32xf32>
    %c1 = arith.constant 1 : index
    %c0_4 = arith.constant 0 : index
    %c0_5 = arith.constant 0 : index
    %6 = vector.load %arg2[%c1, %c0_4, %c0_5] : memref<5x32x256xf32, #tpu.memory_space<vmem>>, vector<1x32x256xf32>
    %7 = vector.shape_cast %6 : vector<1x32x256xf32> to vector<32x256xf32>
    %cst_6 = arith.constant dense<0.000000e+00> : vector<252x256xf32>
    %8 = tpu.matmul %5, %7, %cst_6 {dimension_numbers = #tpu.dot_dimension_numbers<[1], [0], [0], [1], [0, 0, 1, 1], [], []>} : vector<252x32xf32>, vector<32x256xf32>, vector<252x256xf32> -> vector<252x256xf32>
    %9 = vector.extract_strided_slice %0 {offsets = [2, 0], sizes = [252, 32], strides = [1, 1]} : vector<256x32xf32> to vector<252x32xf32>
    %c2 = arith.constant 2 : index
    %c0_7 = arith.constant 0 : index
    %c0_8 = arith.constant 0 : index
    %10 = vector.load %arg2[%c2, %c0_7, %c0_8] : memref<5x32x256xf32, #tpu.memory_space<vmem>>, vector<1x32x256xf32>
    %11 = vector.shape_cast %10 : vector<1x32x256xf32> to vector<32x256xf32>
    %cst_9 = arith.constant dense<0.000000e+00> : vector<252x256xf32>
    %12 = tpu.matmul %9, %11, %cst_9 {dimension_numbers = #tpu.dot_dimension_numbers<[1], [0], [0], [1], [0, 0, 1, 1], [], []>} : vector<252x32xf32>, vector<32x256xf32>, vector<252x256xf32> -> vector<252x256xf32>
    %13 = vector.extract_strided_slice %0 {offsets = [3, 0], sizes = [252, 32], strides = [1, 1]} : vector<256x32xf32> to vector<252x32xf32>
    %c3 = arith.constant 3 : index
    %c0_10 = arith.constant 0 : index
    %c0_11 = arith.constant 0 : index
    %14 = vector.load %arg2[%c3, %c0_10, %c0_11] : memref<5x32x256xf32, #tpu.memory_space<vmem>>, vector<1x32x256xf32>
    %15 = vector.shape_cast %14 : vector<1x32x256xf32> to vector<32x256xf32>
    %cst_12 = arith.constant dense<0.000000e+00> : vector<252x256xf32>
    %16 = tpu.matmul %13, %15, %cst_12 {dimension_numbers = #tpu.dot_dimension_numbers<[1], [0], [0], [1], [0, 0, 1, 1], [], []>} : vector<252x32xf32>, vector<32x256xf32>, vector<252x256xf32> -> vector<252x256xf32>
    %17 = vector.extract_strided_slice %0 {offsets = [4, 0], sizes = [252, 32], strides = [1, 1]} : vector<256x32xf32> to vector<252x32xf32>
    %c4 = arith.constant 4 : index
    %c0_13 = arith.constant 0 : index
    %c0_14 = arith.constant 0 : index
    %18 = vector.load %arg2[%c4, %c0_13, %c0_14] : memref<5x32x256xf32, #tpu.memory_space<vmem>>, vector<1x32x256xf32>
    %19 = vector.shape_cast %18 : vector<1x32x256xf32> to vector<32x256xf32>
    %cst_15 = arith.constant dense<0.000000e+00> : vector<252x256xf32>
    %20 = tpu.matmul %17, %19, %cst_15 {dimension_numbers = #tpu.dot_dimension_numbers<[1], [0], [0], [1], [0, 0, 1, 1], [], []>} : vector<252x32xf32>, vector<32x256xf32>, vector<252x256xf32> -> vector<252x256xf32>
    %21 = arith.addf %4, %8 : vector<252x256xf32>
    %22 = arith.addf %12, %16 : vector<252x256xf32>
    %23 = arith.addf %21, %22 : vector<252x256xf32>
    %24 = arith.addf %23, %20 : vector<252x256xf32>
    %c0_16 = arith.constant 0 : index
    %c0_17 = arith.constant 0 : index
    %25 = vector.load %arg3[%c0_16, %c0_17] : memref<256x256xf32, #tpu.memory_space<vmem>>, vector<256x256xf32>
    %cst_18 = arith.constant dense<0.000000e+00> : vector<252x256xf32>
    %26 = tpu.matmul %24, %25, %cst_18 {dimension_numbers = #tpu.dot_dimension_numbers<[1], [0], [0], [1], [0, 0, 1, 1], [], []>} : vector<252x256xf32>, vector<256x256xf32>, vector<252x256xf32> -> vector<252x256xf32>
    %27 = arith.maximumf %24, %26 : vector<252x256xf32>
    %28 = vector.extract_strided_slice %27 {offsets = [0, 0], sizes = [251, 256], strides = [1, 1]} : vector<252x256xf32> to vector<251x256xf32>
    %29 = vector.extract_strided_slice %27 {offsets = [1, 0], sizes = [251, 256], strides = [1, 1]} : vector<252x256xf32> to vector<251x256xf32>
    %30 = arith.maximumf %28, %29 : vector<251x256xf32>
    %c0_19 = arith.constant 0 : index
    %c0_20 = arith.constant 0 : index
    %31 = vector.load %arg4[%c0_19, %c0_20] : memref<112x251xf32, #tpu.memory_space<vmem>>, vector<112x251xf32>
    %cst_21 = arith.constant dense<0.000000e+00> : vector<112x256xf32>
    %32 = tpu.matmul %31, %30, %cst_21 {dimension_numbers = #tpu.dot_dimension_numbers<[1], [0], [0], [1], [0, 0, 1, 1], [], []>} : vector<112x251xf32>, vector<251x256xf32>, vector<112x256xf32> -> vector<112x256xf32>
    %c0_22 = arith.constant 0 : index
    %c0_23 = arith.constant 0 : index
    %33 = vector.load %arg5[%c0_22, %c0_23] : memref<1x256xf32, #tpu.memory_space<vmem>>, vector<1x256xf32>
    %34 = vector.broadcast %33 : vector<1x256xf32> to vector<112x256xf32>
    %35 = arith.addf %32, %34 : vector<112x256xf32>
    %cst_24 = arith.constant 0.000000e+00 : f32
    %36 = vector.broadcast %cst_24 : f32 to vector<112x256xf32>
    %37 = arith.maximumf %35, %36 : vector<112x256xf32>
    %38 = vector.extract_strided_slice %37 {offsets = [0, 0], sizes = [108, 256], strides = [1, 1]} : vector<112x256xf32> to vector<108x256xf32>
    %c0_25 = arith.constant 0 : index
    %c0_26 = arith.constant 0 : index
    %c0_27 = arith.constant 0 : index
    %39 = vector.load %arg6[%c0_25, %c0_26, %c0_27] : memref<5x256x256xf32, #tpu.memory_space<vmem>>, vector<1x256x256xf32>
    %40 = vector.shape_cast %39 : vector<1x256x256xf32> to vector<256x256xf32>
    %cst_28 = arith.constant dense<0.000000e+00> : vector<108x256xf32>
    %41 = tpu.matmul %38, %40, %cst_28 {dimension_numbers = #tpu.dot_dimension_numbers<[1], [0], [0], [1], [0, 0, 1, 1], [], []>} : vector<108x256xf32>, vector<256x256xf32>, vector<108x256xf32> -> vector<108x256xf32>
    %42 = vector.extract_strided_slice %37 {offsets = [1, 0], sizes = [108, 256], strides = [1, 1]} : vector<112x256xf32> to vector<108x256xf32>
    %c1_29 = arith.constant 1 : index
    %c0_30 = arith.constant 0 : index
    %c0_31 = arith.constant 0 : index
    %43 = vector.load %arg6[%c1_29, %c0_30, %c0_31] : memref<5x256x256xf32, #tpu.memory_space<vmem>>, vector<1x256x256xf32>
    %44 = vector.shape_cast %43 : vector<1x256x256xf32> to vector<256x256xf32>
    %cst_32 = arith.constant dense<0.000000e+00> : vector<108x256xf32>
    %45 = tpu.matmul %42, %44, %cst_32 {dimension_numbers = #tpu.dot_dimension_numbers<[1], [0], [0], [1], [0, 0, 1, 1], [], []>} : vector<108x256xf32>, vector<256x256xf32>, vector<108x256xf32> -> vector<108x256xf32>
    %46 = vector.extract_strided_slice %37 {offsets = [2, 0], sizes = [108, 256], strides = [1, 1]} : vector<112x256xf32> to vector<108x256xf32>
    %c2_33 = arith.constant 2 : index
    %c0_34 = arith.constant 0 : index
    %c0_35 = arith.constant 0 : index
    %47 = vector.load %arg6[%c2_33, %c0_34, %c0_35] : memref<5x256x256xf32, #tpu.memory_space<vmem>>, vector<1x256x256xf32>
    %48 = vector.shape_cast %47 : vector<1x256x256xf32> to vector<256x256xf32>
    %cst_36 = arith.constant dense<0.000000e+00> : vector<108x256xf32>
    %49 = tpu.matmul %46, %48, %cst_36 {dimension_numbers = #tpu.dot_dimension_numbers<[1], [0], [0], [1], [0, 0, 1, 1], [], []>} : vector<108x256xf32>, vector<256x256xf32>, vector<108x256xf32> -> vector<108x256xf32>
    %50 = vector.extract_strided_slice %37 {offsets = [3, 0], sizes = [108, 256], strides = [1, 1]} : vector<112x256xf32> to vector<108x256xf32>
    %c3_37 = arith.constant 3 : index
    %c0_38 = arith.constant 0 : index
    %c0_39 = arith.constant 0 : index
    %51 = vector.load %arg6[%c3_37, %c0_38, %c0_39] : memref<5x256x256xf32, #tpu.memory_space<vmem>>, vector<1x256x256xf32>
    %52 = vector.shape_cast %51 : vector<1x256x256xf32> to vector<256x256xf32>
    %cst_40 = arith.constant dense<0.000000e+00> : vector<108x256xf32>
    %53 = tpu.matmul %50, %52, %cst_40 {dimension_numbers = #tpu.dot_dimension_numbers<[1], [0], [0], [1], [0, 0, 1, 1], [], []>} : vector<108x256xf32>, vector<256x256xf32>, vector<108x256xf32> -> vector<108x256xf32>
    %54 = vector.extract_strided_slice %37 {offsets = [4, 0], sizes = [108, 256], strides = [1, 1]} : vector<112x256xf32> to vector<108x256xf32>
    %c4_41 = arith.constant 4 : index
    %c0_42 = arith.constant 0 : index
    %c0_43 = arith.constant 0 : index
    %55 = vector.load %arg6[%c4_41, %c0_42, %c0_43] : memref<5x256x256xf32, #tpu.memory_space<vmem>>, vector<1x256x256xf32>
    %56 = vector.shape_cast %55 : vector<1x256x256xf32> to vector<256x256xf32>
    %cst_44 = arith.constant dense<0.000000e+00> : vector<108x256xf32>
    %57 = tpu.matmul %54, %56, %cst_44 {dimension_numbers = #tpu.dot_dimension_numbers<[1], [0], [0], [1], [0, 0, 1, 1], [], []>} : vector<108x256xf32>, vector<256x256xf32>, vector<108x256xf32> -> vector<108x256xf32>
    %58 = arith.addf %41, %45 : vector<108x256xf32>
    %59 = arith.addf %49, %53 : vector<108x256xf32>
    %60 = arith.addf %58, %59 : vector<108x256xf32>
    %61 = arith.addf %60, %57 : vector<108x256xf32>
    %c0_45 = arith.constant 0 : index
    %c0_46 = arith.constant 0 : index
    %62 = vector.load %arg3[%c0_45, %c0_46] : memref<256x256xf32, #tpu.memory_space<vmem>>, vector<256x256xf32>
    %cst_47 = arith.constant dense<0.000000e+00> : vector<108x256xf32>
    %63 = tpu.matmul %61, %62, %cst_47 {dimension_numbers = #tpu.dot_dimension_numbers<[1], [0], [0], [1], [0, 0, 1, 1], [], []>} : vector<108x256xf32>, vector<256x256xf32>, vector<108x256xf32> -> vector<108x256xf32>
    %64 = arith.maximumf %61, %63 : vector<108x256xf32>
    %65 = vector.extract_strided_slice %64 {offsets = [0, 0], sizes = [107, 256], strides = [1, 1]} : vector<108x256xf32> to vector<107x256xf32>
    %66 = vector.extract_strided_slice %64 {offsets = [1, 0], sizes = [107, 256], strides = [1, 1]} : vector<108x256xf32> to vector<107x256xf32>
    %67 = arith.maximumf %65, %66 : vector<107x256xf32>
    %c0_48 = arith.constant 0 : index
    %c0_49 = arith.constant 0 : index
    %68 = vector.load %arg7[%c0_48, %c0_49] : memref<40x107xf32, #tpu.memory_space<vmem>>, vector<40x107xf32>
    %cst_50 = arith.constant dense<0.000000e+00> : vector<40x256xf32>
    %69 = tpu.matmul %68, %67, %cst_50 {dimension_numbers = #tpu.dot_dimension_numbers<[1], [0], [0], [1], [0, 0, 1, 1], [], []>} : vector<40x107xf32>, vector<107x256xf32>, vector<40x256xf32> -> vector<40x256xf32>
    %c0_51 = arith.constant 0 : index
    %c0_52 = arith.constant 0 : index
    %70 = vector.load %arg8[%c0_51, %c0_52] : memref<1x256xf32, #tpu.memory_space<vmem>>, vector<1x256xf32>
    %71 = vector.broadcast %70 : vector<1x256xf32> to vector<40x256xf32>
    %72 = arith.addf %69, %71 : vector<40x256xf32>
    %cst_53 = arith.constant 0.000000e+00 : f32
    %73 = vector.broadcast %cst_53 : f32 to vector<40x256xf32>
    %74 = arith.maximumf %72, %73 : vector<40x256xf32>
    %75 = vector.extract_strided_slice %74 {offsets = [0, 0], sizes = [8, 256], strides = [1, 1]} : vector<40x256xf32> to vector<8x256xf32>
    %c0_54 = arith.constant 0 : index
    %c0_55 = arith.constant 0 : index
    %c0_56 = arith.constant 0 : index
    %76 = vector.load %arg9[%c0_54, %c0_55, %c0_56] : memref<5x256x128xf32, #tpu.memory_space<vmem>>, vector<1x256x128xf32>
    %77 = vector.shape_cast %76 : vector<1x256x128xf32> to vector<256x128xf32>
    %cst_57 = arith.constant dense<0.000000e+00> : vector<8x128xf32>
    %78 = tpu.matmul %75, %77, %cst_57 {dimension_numbers = #tpu.dot_dimension_numbers<[1], [0], [0], [1], [0, 0, 1, 1], [], []>} : vector<8x256xf32>, vector<256x128xf32>, vector<8x128xf32> -> vector<8x128xf32>
    %79 = vector.extract_strided_slice %74 {offsets = [8, 0], sizes = [8, 256], strides = [1, 1]} : vector<40x256xf32> to vector<8x256xf32>
    %c1_58 = arith.constant 1 : index
    %c0_59 = arith.constant 0 : index
    %c0_60 = arith.constant 0 : index
    %80 = vector.load %arg9[%c1_58, %c0_59, %c0_60] : memref<5x256x128xf32, #tpu.memory_space<vmem>>, vector<1x256x128xf32>
    %81 = vector.shape_cast %80 : vector<1x256x128xf32> to vector<256x128xf32>
    %cst_61 = arith.constant dense<0.000000e+00> : vector<8x128xf32>
    %82 = tpu.matmul %79, %81, %cst_61 {dimension_numbers = #tpu.dot_dimension_numbers<[1], [0], [0], [1], [0, 0, 1, 1], [], []>} : vector<8x256xf32>, vector<256x128xf32>, vector<8x128xf32> -> vector<8x128xf32>
    %83 = vector.extract_strided_slice %74 {offsets = [16, 0], sizes = [8, 256], strides = [1, 1]} : vector<40x256xf32> to vector<8x256xf32>
    %c2_62 = arith.constant 2 : index
    %c0_63 = arith.constant 0 : index
    %c0_64 = arith.constant 0 : index
    %84 = vector.load %arg9[%c2_62, %c0_63, %c0_64] : memref<5x256x128xf32, #tpu.memory_space<vmem>>, vector<1x256x128xf32>
    %85 = vector.shape_cast %84 : vector<1x256x128xf32> to vector<256x128xf32>
    %cst_65 = arith.constant dense<0.000000e+00> : vector<8x128xf32>
    %86 = tpu.matmul %83, %85, %cst_65 {dimension_numbers = #tpu.dot_dimension_numbers<[1], [0], [0], [1], [0, 0, 1, 1], [], []>} : vector<8x256xf32>, vector<256x128xf32>, vector<8x128xf32> -> vector<8x128xf32>
    %87 = vector.extract_strided_slice %74 {offsets = [24, 0], sizes = [8, 256], strides = [1, 1]} : vector<40x256xf32> to vector<8x256xf32>
    %c3_66 = arith.constant 3 : index
    %c0_67 = arith.constant 0 : index
    %c0_68 = arith.constant 0 : index
    %88 = vector.load %arg9[%c3_66, %c0_67, %c0_68] : memref<5x256x128xf32, #tpu.memory_space<vmem>>, vector<1x256x128xf32>
    %89 = vector.shape_cast %88 : vector<1x256x128xf32> to vector<256x128xf32>
    %cst_69 = arith.constant dense<0.000000e+00> : vector<8x128xf32>
    %90 = tpu.matmul %87, %89, %cst_69 {dimension_numbers = #tpu.dot_dimension_numbers<[1], [0], [0], [1], [0, 0, 1, 1], [], []>} : vector<8x256xf32>, vector<256x128xf32>, vector<8x128xf32> -> vector<8x128xf32>
    %91 = vector.extract_strided_slice %74 {offsets = [32, 0], sizes = [8, 256], strides = [1, 1]} : vector<40x256xf32> to vector<8x256xf32>
    %c4_70 = arith.constant 4 : index
    %c0_71 = arith.constant 0 : index
    %c0_72 = arith.constant 0 : index
    %92 = vector.load %arg9[%c4_70, %c0_71, %c0_72] : memref<5x256x128xf32, #tpu.memory_space<vmem>>, vector<1x256x128xf32>
    %93 = vector.shape_cast %92 : vector<1x256x128xf32> to vector<256x128xf32>
    %cst_73 = arith.constant dense<0.000000e+00> : vector<8x128xf32>
    %94 = tpu.matmul %91, %93, %cst_73 {dimension_numbers = #tpu.dot_dimension_numbers<[1], [0], [0], [1], [0, 0, 1, 1], [], []>} : vector<8x256xf32>, vector<256x128xf32>, vector<8x128xf32> -> vector<8x128xf32>
    %95 = arith.addf %78, %82 : vector<8x128xf32>
    %96 = arith.addf %86, %90 : vector<8x128xf32>
    %97 = arith.addf %95, %96 : vector<8x128xf32>
    %98 = arith.addf %97, %94 : vector<8x128xf32>
    %c0_74 = arith.constant 0 : index
    %c0_75 = arith.constant 0 : index
    %99 = vector.load %arg10[%c0_74, %c0_75] : memref<1x128xf32, #tpu.memory_space<vmem>>, vector<1x128xf32>
    %100 = vector.broadcast %99 : vector<1x128xf32> to vector<8x128xf32>
    %101 = arith.addf %98, %100 : vector<8x128xf32>
    %cst_76 = arith.constant 0.000000e+00 : f32
    %102 = vector.broadcast %cst_76 : f32 to vector<8x128xf32>
    %103 = arith.maximumf %101, %102 : vector<8x128xf32>
    %c0_77 = arith.constant 0 : index
    %c0_78 = arith.constant 0 : index
    %104 = vector.load %arg11[%c0_77, %c0_78] : memref<128x128xf32, #tpu.memory_space<vmem>>, vector<128x128xf32>
    %cst_79 = arith.constant dense<0.000000e+00> : vector<8x128xf32>
    %105 = tpu.matmul %103, %104, %cst_79 {dimension_numbers = #tpu.dot_dimension_numbers<[1], [0], [0], [1], [0, 0, 1, 1], [], []>} : vector<8x128xf32>, vector<128x128xf32>, vector<8x128xf32> -> vector<8x128xf32>
    %c0_80 = arith.constant 0 : index
    %c0_81 = arith.constant 0 : index
    %106 = vector.load %arg12[%c0_80, %c0_81] : memref<1x128xf32, #tpu.memory_space<vmem>>, vector<1x128xf32>
    %107 = vector.broadcast %106 : vector<1x128xf32> to vector<8x128xf32>
    %108 = arith.addf %105, %107 : vector<8x128xf32>
    %cst_82 = arith.constant 0.000000e+00 : f32
    %109 = vector.broadcast %cst_82 : f32 to vector<8x128xf32>
    %110 = arith.maximumf %108, %109 : vector<8x128xf32>
    %c0_83 = arith.constant 0 : index
    %c0_84 = arith.constant 0 : index
    %111 = vector.load %arg13[%c0_83, %c0_84] : memref<128x128xf32, #tpu.memory_space<vmem>>, vector<128x128xf32>
    %cst_85 = arith.constant dense<0.000000e+00> : vector<8x128xf32>
    %112 = tpu.matmul %110, %111, %cst_85 {dimension_numbers = #tpu.dot_dimension_numbers<[1], [0], [0], [1], [0, 0, 1, 1], [], []>} : vector<8x128xf32>, vector<128x128xf32>, vector<8x128xf32> -> vector<8x128xf32>
    %c0_86 = arith.constant 0 : index
    %c0_87 = arith.constant 0 : index
    %113 = vector.load %arg14[%c0_86, %c0_87] : memref<1x128xf32, #tpu.memory_space<vmem>>, vector<1x128xf32>
    %114 = vector.broadcast %113 : vector<1x128xf32> to vector<8x128xf32>
    %115 = arith.addf %112, %114 : vector<8x128xf32>
    %c0_88 = arith.constant 0 : index
    %c0_89 = arith.constant 0 : index
    %116 = vector.load %arg15[%c0_88, %c0_89] : memref<8x128xf32, #tpu.memory_space<vmem>>, vector<8x128xf32>
    tpu.vector_store %arg15[%c0_88, %c0_89], %115 {strides = array<i32>} : memref<8x128xf32, #tpu.memory_space<vmem>>, vector<8x128xf32>,
    return
  }
  func.func @transform_0(%arg0: i32) -> (i32, i32) {
    %c0_i32 = arith.constant 0 : i32
    %c0_i32_0 = arith.constant 0 : i32
    return %arg0, %c0_i32 : i32, i32
  }
  func.func @transform_1(%arg0: i32) -> (i32, i32, i32) {
    %c0_i32 = arith.constant 0 : i32
    %c0_i32_0 = arith.constant 0 : i32
    %c0_i32_1 = arith.constant 0 : i32
    %c0_i32_2 = arith.constant 0 : i32
    return %c0_i32, %c0_i32_0, %c0_i32_1 : i32, i32, i32
  }
  func.func @transform_2(%arg0: i32) -> (i32, i32) {
    %c0_i32 = arith.constant 0 : i32
    %c0_i32_0 = arith.constant 0 : i32
    %c0_i32_1 = arith.constant 0 : i32
    return %c0_i32, %c0_i32_0 : i32, i32
  }
  func.func @transform_3(%arg0: i32) -> (i32, i32) {
    %c0_i32 = arith.constant 0 : i32
    %c0_i32_0 = arith.constant 0 : i32
    %c0_i32_1 = arith.constant 0 : i32
    return %c0_i32, %c0_i32_0 : i32, i32
  }
  func.func @transform_4(%arg0: i32) -> (i32, i32) {
    %c0_i32 = arith.constant 0 : i32
    %c0_i32_0 = arith.constant 0 : i32
    %c0_i32_1 = arith.constant 0 : i32
    return %c0_i32, %c0_i32_0 : i32, i32
  }
  func.func @transform_5(%arg0: i32) -> (i32, i32, i32) {
    %c0_i32 = arith.constant 0 : i32
    %c0_i32_0 = arith.constant 0 : i32
    %c0_i32_1 = arith.constant 0 : i32
    %c0_i32_2 = arith.constant 0 : i32
    return %c0_i32, %c0_i32_0, %c0_i32_1 : i32, i32, i32
  }
  func.func @transform_6(%arg0: i32) -> (i32, i32) {
    %c0_i32 = arith.constant 0 : i32
    %c0_i32_0 = arith.constant 0 : i32
    %c0_i32_1 = arith.constant 0 : i32
    return %c0_i32, %c0_i32_0 : i32, i32
  }
  func.func @transform_7(%arg0: i32) -> (i32, i32) {
    %c0_i32 = arith.constant 0 : i32
    %c0_i32_0 = arith.constant 0 : i32
    %c0_i32_1 = arith.constant 0 : i32
    return %c0_i32, %c0_i32_0 : i32, i32
  }
  func.func @transform_8(%arg0: i32) -> (i32, i32, i32) {
    %c0_i32 = arith.constant 0 : i32
    %c0_i32_0 = arith.constant 0 : i32
    %c0_i32_1 = arith.constant 0 : i32
    %c0_i32_2 = arith.constant 0 : i32
    return %c0_i32, %c0_i32_0, %c0_i32_1 : i32, i32, i32
  }
  func.func @transform_9(%arg0: i32) -> (i32, i32) {
    %c0_i32 = arith.constant 0 : i32
    %c0_i32_0 = arith.constant 0 : i32
    %c0_i32_1 = arith.constant 0 : i32
    return %c0_i32, %c0_i32_0 : i32, i32
  }
  func.func @transform_10(%arg0: i32) -> (i32, i32) {
    %c0_i32 = arith.constant 0 : i32
    %c0_i32_0 = arith.constant 0 : i32
    %c0_i32_1 = arith.constant 0 : i32
    return %c0_i32, %c0_i32_0 : i32, i32
  }
  func.func @transform_11(%arg0: i32) -> (i32, i32) {
    %c0_i32 = arith.constant 0 : i32
    %c0_i32_0 = arith.constant 0 : i32
    %c0_i32_1 = arith.constant 0 : i32
    return %c0_i32, %c0_i32_0 : i32, i32
  }
  func.func @transform_12(%arg0: i32) -> (i32, i32) {
    %c0_i32 = arith.constant 0 : i32
    %c0_i32_0 = arith.constant 0 : i32
    %c0_i32_1 = arith.constant 0 : i32
    return %c0_i32, %c0_i32_0 : i32, i32
  }
  func.func @transform_13(%arg0: i32) -> (i32, i32) {
    %c0_i32 = arith.constant 0 : i32
    %c0_i32_0 = arith.constant 0 : i32
    %c0_i32_1 = arith.constant 0 : i32
    return %c0_i32, %c0_i32_0 : i32, i32
  }
  func.func @transform_14(%arg0: i32) -> (i32, i32) {
    %c0_i32 = arith.constant 0 : i32
    %c0_i32_0 = arith.constant 0 : i32
    return %arg0, %c0_i32 : i32, i32
  }
}

</mosaic_0001>

<bundles_post_ra>
// kernel: lenet_forward.1
= control target key start
LH: loop header
LB: loop body
LE: loop exit
PB: predicated region body
PF: predicated region fallthrough
CT: control target
= control target key end

     0   :  { %19 = vsyncpa [#allocation3], 0  ;;  %s10038_s0 = inlined_call_operand.vmem [shape: f32[256,32], index: 0, kind: input, shape index: {}]   ;;  %s10039_s1 = inlined_call_operand.hbm [shape: f32[5,32,256], index: 1, kind: input, shape index: {}]   ;;  %s10040_s2 = inlined_call_operand.hbm [shape: f32[256,256], index: 2, kind: input, shape index: {}]   ;;  %s10041_s3 = inlined_call_operand.hbm [shape: f32[112,251], index: 3, kind: input, shape index: {}]   ;;  %s10042_s4 = inlined_call_operand.hbm [shape: f32[1,256], index: 4, kind: input, shape index: {}]   ;;  %s10043_s5 = inlined_call_operand.hbm [shape: f32[5,256,256], index: 5, kind: input, shape index: {}]   ;;  %s10044_s6 = inlined_call_operand.hbm [shape: f32[40,107], index: 6, kind: input, shape index: {}]   ;;  %s10045_s7 = inlined_call_operand.hbm [shape: f32[1,256], index: 7, kind: input, shape index: {}]   ;;  %s10046_s8 = inlined_call_operand.hbm [shape: f32[5,256,128], index: 8, kind: input, shape index: {}]   ;;  %s10047_s9 = inlined_call_operand.hbm [shape: f32[1,128], index: 9, kind: input, shape index: {}]   ;;  %s10048_s10 = inlined_call_operand.hbm [shape: f32[128,128], index: 10, kind: input, shape index: {}]   ;;  %s10049_s11 = inlined_call_operand.hbm [shape: f32[1,128], index: 11, kind: input, shape index: {}]   ;;  %s10050_s12 = inlined_call_operand.hbm [shape: f32[128,128], index: 12, kind: input, shape index: {}]   ;;  %s10051_s13 = inlined_call_operand.hbm [shape: f32[1,128], index: 13, kind: input, shape index: {}]   ;;  %s10052_s14 = inlined_call_operand.vmem [shape: f32[8,128], index: 14, kind: output, shape index: {}]  }
   0x1   :  { %20 = vsyncpa [#allocation5], 0 }
   0x2   :  { %21 = vsyncpa [#allocation8], 0 }
   0x3   :  { %22 = vsyncpa [#allocation11], 0 }
   0x4   :  { %23 = vsyncpa [#allocation14], 0 }
   0x5   :  { %24 = vsyncpa [#allocation17], 0 }
   0x6   :  { %25 = vsyncpa [#allocation20], 0  ;;  %s7923_s29 = smov [#allocation4]   ;;  %s7924_s15 = smov [#allocation7]  }
   0x7   :  { %s45_s30 = sshll.u32 %s7923_s29, 4  ;;  %s70_s16 = sshll.u32 %s7924_s15, 4  ;;  %s46_s30 = int_to_ptr.vmem [resolvable:$true] %s45_s30  ;;  %s71_s16 = int_to_ptr.vmem [resolvable:$true] %s70_s16 }
   0x8   :  { %s7623_s19 = scalar_lea.hbm %s10040_s2, 8192 }
   0x9   :  { %p7624_p0 = scmp.ne.s32.totalorder %s10040_s2, %s7623_s19  ;;  %p7627_p1 = scmp.lt.u32.totalorder %s7623_s19, %s10040_s2 }
   0xb   :  { %p7629_p2 = pnand %p7627_p1, %p7624_p0 }
   0xd   :  { %7632 = shalt.err (!%p7629_p2)
}
   0xe   :  { %s7633_s24 = scalar_lea.vmem %s46_s30, 8192  ;;  %p7638_p4 = scmp.lt.s32.totalorder %s46_s30, %s46_s30 }
   0xf   :  { %p7634_p3 = scmp.ne.s32.totalorder %s46_s30, %s7633_s24  ;;  %p7639_p5 = scmp.lt.s32.totalorder %s7633_s24, %s7633_s24 }
  0x11   :  { %p7640_p6 = por %p7639_p5, %p7638_p4 }
  0x13   :  { %p7641_p7 = pnand %p7640_p6, %p7634_p3 }
  0x15   :  { %7644 = shalt.err (!%p7641_p7)
}
  0x16   :  { %s7925_s25 = smov 256   ;;  %s7926_s26 = smov 16  }
  0x17   :  { %51 = dma.hbm_to_vmem [thread:$0]  %s10040_s2, 8192, %s46_s30, [#allocation5], %s7925_s25, %s7925_s25, %s7926_s26  }
  0x18   :  { %s7645_s17 = scalar_lea.hbm %s10042_s4, 32 }
  0x19   :  { %p7646_p8 = scmp.ne.s32.totalorder %s10042_s4, %s7645_s17  ;;  %p7649_p9 = scmp.lt.u32.totalorder %s7645_s17, %s10042_s4 }
  0x1b   :  { %p7651_p10 = pnand %p7649_p9, %p7646_p8 }
  0x1d   :  { %7654 = shalt.err (!%p7651_p10)
}
  0x1e   :  { %s7655_s22 = scalar_lea.vmem %s71_s16, 32  ;;  %p7660_p12 = scmp.lt.s32.totalorder %s71_s16, %s71_s16 }
  0x1f   :  { %p7656_p11 = scmp.ne.s32.totalorder %s71_s16, %s7655_s22  ;;  %p7661_p13 = scmp.lt.s32.totalorder %s7655_s22, %s7655_s22 }
  0x21   :  { %p7662_p0 = por %p7661_p13, %p7660_p12 }
  0x23   :  { %p7663_p1 = pnand %p7662_p0, %p7656_p11 }
  0x25   :  { %7666 = shalt.err (!%p7663_p1)
}
  0x26   :  { %73 = dma.hbm_to_vmem [thread:$0]  %s10042_s4, 32, %s71_s16, [#allocation8]  }
  0x27   :  { %s7927_s23 = smov [#allocation10]   ;;  %s7667_s29 = scalar_lea.hbm %s10044_s6, 640 }
  0x28   :  { %s91_s24 = sshll.u32 %s7927_s23, 4  ;;  %p7668_p2 = scmp.ne.s32.totalorder %s10044_s6, %s7667_s29  ;;  %s92_s24 = int_to_ptr.vmem [resolvable:$true] %s91_s24 }
  0x29   :  { %p7671_p3 = scmp.lt.u32.totalorder %s7667_s29, %s10044_s6 }
  0x2b   :  { %p7673_p4 = pnand %p7671_p3, %p7668_p2 }
  0x2d   :  { %7676 = shalt.err (!%p7673_p4)
}
  0x2e   :  { %s7677_s20 = scalar_lea.vmem %s92_s24, 640  ;;  %p7682_p6 = scmp.lt.s32.totalorder %s92_s24, %s92_s24 }
  0x2f   :  { %p7678_p5 = scmp.ne.s32.totalorder %s92_s24, %s7677_s20  ;;  %p7683_p7 = scmp.lt.s32.totalorder %s7677_s20, %s7677_s20 }
  0x31   :  { %p7684_p8 = por %p7683_p7, %p7682_p6 }
  0x33   :  { %p7685_p9 = pnand %p7684_p8, %p7678_p5 }
  0x35   :  { %7688 = shalt.err (!%p7685_p9)
}
  0x36   :  { %s7928_s4 = smov 128   ;;  %s7929_s16 = smov 8  }
  0x37   :  { %97 = dma.hbm_to_vmem [thread:$0]  %s10044_s6, 640, %s92_s24, [#allocation11], %s7928_s4, %s7928_s4, %s7929_s16  }
  0x38   :  { %s7930_s2 = smov [#allocation13]   ;;  %s7931_s23 = smov [#allocation16]  }
  0x39   :  { %s113_s30 = sshll.u32 %s7930_s2, 4  ;;  %s135_s27 = sshll.u32 %s7931_s23, 4  ;;  %s114_s30 = int_to_ptr.vmem [resolvable:$true] %s113_s30  ;;  %s136_s27 = int_to_ptr.vmem [resolvable:$true] %s135_s27 }
  0x3a   :  { %s7689_s15 = scalar_lea.hbm %s10046_s8, 20480 }
  0x3b   :  { %p7690_p10 = scmp.ne.s32.totalorder %s10046_s8, %s7689_s15  ;;  %p7693_p11 = scmp.lt.u32.totalorder %s7689_s15, %s10046_s8 }
  0x3d   :  { %p7695_p12 = pnand %p7693_p11, %p7690_p10 }
  0x3f   :  { %7698 = shalt.err (!%p7695_p12)
}
  0x40   :  { %s7699_s6 = scalar_lea.vmem %s114_s30, 20480  ;;  %p7704_p0 = scmp.lt.s32.totalorder %s114_s30, %s114_s30 }
  0x41   :  { %p7700_p13 = scmp.ne.s32.totalorder %s114_s30, %s7699_s6  ;;  %p7705_p1 = scmp.lt.s32.totalorder %s7699_s6, %s7699_s6 }
  0x43   :  { %p7706_p2 = por %p7705_p1, %p7704_p0 }
  0x45   :  { %p7707_p3 = pnand %p7706_p2, %p7700_p13 }
  0x47   :  { %7710 = shalt.err (!%p7707_p3)
}
  0x48   :  { %119 = dma.hbm_to_vmem [thread:$0]  %s10046_s8, 20480, %s114_s30, [#allocation14], %s7928_s4, %s7928_s4, %s7929_s16  }
  0x49   :  { %s7711_s23 = scalar_lea.hbm %s10048_s10, 2048 }
  0x4a   :  { %p7712_p4 = scmp.ne.s32.totalorder %s10048_s10, %s7711_s23  ;;  %p7715_p5 = scmp.lt.u32.totalorder %s7711_s23, %s10048_s10 }
  0x4c   :  { %p7717_p6 = pnand %p7715_p5, %p7712_p4 }
  0x4e   :  { %7720 = shalt.err (!%p7717_p6)
}
  0x4f   :  { %s7721_s18 = scalar_lea.vmem %s136_s27, 2048  ;;  %p7726_p8 = scmp.lt.s32.totalorder %s136_s27, %s136_s27 }
  0x50   :  { %p7722_p7 = scmp.ne.s32.totalorder %s136_s27, %s7721_s18  ;;  %p7727_p9 = scmp.lt.s32.totalorder %s7721_s18, %s7721_s18 }
  0x52   :  { %p7728_p10 = por %p7727_p9, %p7726_p8 }
  0x54   :  { %p7729_p11 = pnand %p7728_p10, %p7722_p7 }
  0x56   :  { %7732 = shalt.err (!%p7729_p11)
}
  0x57   :  { %141 = dma.hbm_to_vmem [thread:$0]  %s10048_s10, 2048, %s136_s27, [#allocation17], %s7928_s4, %s7928_s4, %s7929_s16  }
  0x58   :  { %s7932_s19 = smov [#allocation19]   ;;  %s7933_s6 = smov [#allocation2]  }
  0x59   :  { %s157_s20 = sshll.u32 %s7932_s19, 4  ;;  %s33_s24 = sshll.u32 %s7933_s6, 4  ;;  %s158_s20 = int_to_ptr.vmem [resolvable:$true] %s157_s20  ;;  %s34_s24 = int_to_ptr.vmem [resolvable:$true] %s33_s24 }
  0x5a   :  { %s7733_s2 = scalar_lea.hbm %s10050_s12, 2048 }
  0x5b   :  { %p7734_p12 = scmp.ne.s32.totalorder %s10050_s12, %s7733_s2  ;;  %p7737_p13 = scmp.lt.u32.totalorder %s7733_s2, %s10050_s12 }
  0x5d   :  { %p7739_p0 = pnand %p7737_p13, %p7734_p12 }
  0x5f   :  { %7742 = shalt.err (!%p7739_p0)
}
  0x60   :  { %s7743_s10 = scalar_lea.vmem %s158_s20, 2048  ;;  %p7748_p2 = scmp.lt.s32.totalorder %s158_s20, %s158_s20 }
  0x61   :  { %p7744_p1 = scmp.ne.s32.totalorder %s158_s20, %s7743_s10  ;;  %p7749_p3 = scmp.lt.s32.totalorder %s7743_s10, %s7743_s10 }
  0x63   :  { %p7750_p4 = por %p7749_p3, %p7748_p2 }
  0x65   :  { %p7751_p5 = pnand %p7750_p4, %p7744_p1 }
  0x67   :  { %7754 = shalt.err (!%p7751_p5)
}
  0x68   :  { %163 = dma.hbm_to_vmem [thread:$0]  %s10050_s12, 2048, %s158_s20, [#allocation20], %s7928_s4, %s7928_s4, %s7929_s16  }
  0x69   :  { %s7755_s30 = scalar_lea.hbm %s10039_s1, 5120 }
  0x6a   :  { %p7756_p6 = scmp.ne.s32.totalorder %s10039_s1, %s7755_s30  ;;  %p7759_p7 = scmp.lt.u32.totalorder %s7755_s30, %s10039_s1 }
  0x6c   :  { %p7761_p8 = pnand %p7759_p7, %p7756_p6 }
  0x6e   :  { %7764 = shalt.err (!%p7761_p8)
}
  0x6f   :  { %s7765_s2 = scalar_lea.vmem %s34_s24, 5120  ;;  %p7770_p10 = scmp.lt.s32.totalorder %s34_s24, %s34_s24 }
  0x70   :  { %p7766_p9 = scmp.ne.s32.totalorder %s34_s24, %s7765_s2  ;;  %p7771_p11 = scmp.lt.s32.totalorder %s7765_s2, %s7765_s2 }
  0x72   :  { %p7772_p12 = por %p7771_p11, %p7770_p10 }
  0x74   :  { %p7773_p13 = pnand %p7772_p12, %p7766_p9 }
  0x76   :  { %7776 = shalt.err (!%p7773_p13)
}
  0x77   :  { %39 = dma.hbm_to_vmem [thread:$0]  %s10039_s1, 5120, %s34_s24, [#allocation3], %s7925_s25, %s7925_s25, %s7926_s26  }
  0x78   :  { %s7934_s16 = smov [#allocation6]   ;;  %s7935_s23 = smov [#allocation9]  }
  0x79   :  { %s57_s20 = sshll.u32 %s7934_s16, 4  ;;  %s79_s28 = sshll.u32 %s7935_s23, 4  ;;  %s58_s20 = int_to_ptr.vmem [resolvable:$true] %s57_s20  ;;  %s80_s28 = int_to_ptr.vmem [resolvable:$true] %s79_s28 }
  0x7a   :  { %s7777_s10 = scalar_lea.hbm %s10041_s3, 3584 }
  0x7b   :  { %p7778_p0 = scmp.ne.s32.totalorder %s10041_s3, %s7777_s10  ;;  %p7781_p1 = scmp.lt.u32.totalorder %s7777_s10, %s10041_s3 }
  0x7d   :  { %p7783_p2 = pnand %p7781_p1, %p7778_p0 }
  0x7f   :  { %7786 = shalt.err (!%p7783_p2)
}
  0x80   :  { %s7787_s1 = scalar_lea.vmem %s58_s20, 3584  ;;  %p7792_p4 = scmp.lt.s32.totalorder %s58_s20, %s58_s20 }
  0x81   :  { %p7788_p3 = scmp.ne.s32.totalorder %s58_s20, %s7787_s1  ;;  %p7793_p5 = scmp.lt.s32.totalorder %s7787_s1, %s7787_s1 }
  0x83   :  { %p7794_p6 = por %p7793_p5, %p7792_p4 }
  0x85   :  { %p7795_p7 = pnand %p7794_p6, %p7788_p3 }
  0x87   :  { %7798 = shalt.err (!%p7795_p7)
}
  0x88   :  { %63 = dma.hbm_to_vmem [thread:$0]  %s10041_s3, 3584, %s58_s20, [#allocation5], %s7925_s25, %s7925_s25, %s7926_s26  }
  0x89   :  { %s7799_s21 = scalar_lea.hbm %s10043_s5, 40960 }
  0x8a   :  { %p7800_p8 = scmp.ne.s32.totalorder %s10043_s5, %s7799_s21  ;;  %p7803_p9 = scmp.lt.u32.totalorder %s7799_s21, %s10043_s5 }
  0x8c   :  { %p7805_p10 = pnand %p7803_p9, %p7800_p8 }
  0x8e   :  { %7808 = shalt.err (!%p7805_p10)
}
  0x8f   :  { %s7809_s16 = scalar_lea.vmem %s80_s28, 40960  ;;  %p7814_p12 = scmp.lt.s32.totalorder %s80_s28, %s80_s28 }
  0x90   :  { %p7810_p11 = scmp.ne.s32.totalorder %s80_s28, %s7809_s16  ;;  %p7815_p13 = scmp.lt.s32.totalorder %s7809_s16, %s7809_s16 }
  0x92   :  { %p7816_p0 = por %p7815_p13, %p7814_p12 }
  0x94   :  { %p7817_p1 = pnand %p7816_p0, %p7810_p11 }
  0x96   :  { %7820 = shalt.err (!%p7817_p1)
}
  0x97   :  { %85 = dma.hbm_to_vmem [thread:$0]  %s10043_s5, 40960, %s80_s28, [#allocation8], %s7925_s25, %s7925_s25, %s7926_s26  }
  0x98   :  { %s7936_s23 = smov [#allocation12]   ;;  %s7937_s15 = smov [#allocation15]  }
  0x99   :  { %s104_s29 = sshll.u32 %s7936_s23, 4  ;;  %s126_s10 = sshll.u32 %s7937_s15, 4  ;;  %s105_s29 = int_to_ptr.vmem [resolvable:$true] %s104_s29  ;;  %s127_s10 = int_to_ptr.vmem [resolvable:$true] %s126_s10 }
  0x9a   :  { %s7821_s18 = scalar_lea.hbm %s10045_s7, 32 }
  0x9b   :  { %p7822_p2 = scmp.ne.s32.totalorder %s10045_s7, %s7821_s18  ;;  %p7825_p3 = scmp.lt.u32.totalorder %s7821_s18, %s10045_s7 }
  0x9d   :  { %p7827_p4 = pnand %p7825_p3, %p7822_p2 }
  0x9f   :  { %7830 = shalt.err (!%p7827_p4)
}
  0xa0   :  { %s7831_s5 = scalar_lea.vmem %s105_s29, 32  ;;  %p7836_p6 = scmp.lt.s32.totalorder %s105_s29, %s105_s29 }
  0xa1   :  { %p7832_p5 = scmp.ne.s32.totalorder %s105_s29, %s7831_s5  ;;  %p7837_p7 = scmp.lt.s32.totalorder %s7831_s5, %s7831_s5 }
  0xa3   :  { %p7838_p8 = por %p7837_p7, %p7836_p6 }
  0xa5   :  { %p7839_p9 = pnand %p7838_p8, %p7832_p5 }
  0xa7   :  { %7842 = shalt.err (!%p7839_p9)
}
  0xa8   :  { %107 = dma.hbm_to_vmem [thread:$0]  %s10045_s7, 32, %s105_s29, [#allocation11]  }
  0xa9   :  { %s7843_s6 = scalar_lea.hbm %s10047_s9, 16 }
  0xaa   :  { %p7844_p10 = scmp.ne.s32.totalorder %s10047_s9, %s7843_s6  ;;  %p7847_p11 = scmp.lt.u32.totalorder %s7843_s6, %s10047_s9 }
  0xac   :  { %p7849_p12 = pnand %p7847_p11, %p7844_p10 }
  0xae   :  { %7852 = shalt.err (!%p7849_p12)
}
  0xaf   :  { %s7853_s4 = scalar_lea.vmem %s127_s10, 16  ;;  %s7857_s16 = scalar_lea.vmem %s127_s10, 32 }
  0xb0   :  { %p7854_p13 = scmp.ne.s32.totalorder %s127_s10, %s7853_s4  ;;  %p7858_p0 = scmp.lt.s32.totalorder %s127_s10, %s127_s10 }
  0xb1   :  { %p7859_p1 = scmp.lt.s32.totalorder %s7857_s16, %s7853_s4 }
  0xb3   :  { %p7860_p2 = por %p7859_p1, %p7858_p0 }
  0xb5   :  { %p7861_p3 = pnand %p7860_p2, %p7854_p13 }
  0xb7   :  { %7864 = shalt.err (!%p7861_p3)
}
  0xb8   :  { %129 = dma.hbm_to_vmem [thread:$0]  %s10047_s9, 16, %s127_s10, [#allocation14]  }
  0xb9   :  { %s7938_s20 = smov [#allocation18]   ;;  %s7939_s29 = smov [#allocation21]  }
  0xba   :  { %s148_s23 = sshll.u32 %s7938_s20, 4  ;;  %s170_s15 = sshll.u32 %s7939_s29, 4  ;;  %s149_s23 = int_to_ptr.vmem [resolvable:$true] %s148_s23  ;;  %s171_s15 = int_to_ptr.vmem [resolvable:$true] %s170_s15 }
  0xbb   :  { %s7865_s18 = scalar_lea.hbm %s10049_s11, 16 }
  0xbc   :  { %p7866_p4 = scmp.ne.s32.totalorder %s10049_s11, %s7865_s18  ;;  %p7869_p5 = scmp.lt.u32.totalorder %s7865_s18, %s10049_s11 }
  0xbe   :  { %p7871_p6 = pnand %p7869_p5, %p7866_p4 }
  0xc0   :  { %7874 = shalt.err (!%p7871_p6)
}
  0xc1   :  { %s7875_s9 = scalar_lea.vmem %s149_s23, 16  ;;  %s7879_s10 = scalar_lea.vmem %s149_s23, 32 }
  0xc2   :  { %p7876_p7 = scmp.ne.s32.totalorder %s149_s23, %s7875_s9  ;;  %p7880_p8 = scmp.lt.s32.totalorder %s149_s23, %s149_s23 }
  0xc3   :  { %p7881_p9 = scmp.lt.s32.totalorder %s7879_s10, %s7875_s9 }
  0xc5   :  { %p7882_p10 = por %p7881_p9, %p7880_p8 }
  0xc7   :  { %p7883_p11 = pnand %p7882_p10, %p7876_p7 }
  0xc9   :  { %7886 = shalt.err (!%p7883_p11)
}
  0xca   :  { %151 = dma.hbm_to_vmem [thread:$0]  %s10049_s11, 16, %s149_s23, [#allocation17]  }
  0xcb   :  { %s7887_s19 = scalar_lea.hbm %s10051_s13, 16 }
  0xcc   :  { %p7888_p12 = scmp.ne.s32.totalorder %s10051_s13, %s7887_s19  ;;  %p7891_p13 = scmp.lt.u32.totalorder %s7887_s19, %s10051_s13 }
  0xce   :  { %p7893_p0 = pnand %p7891_p13, %p7888_p12 }
  0xd0   :  { %7896 = shalt.err (!%p7893_p0)
}
  0xd1   :  { %s7897_s12 = scalar_lea.vmem %s171_s15, 16  ;;  %s7901_s4 = scalar_lea.vmem %s171_s15, 32 }
  0xd2   :  { %p7898_p1 = scmp.ne.s32.totalorder %s171_s15, %s7897_s12  ;;  %p7902_p2 = scmp.lt.s32.totalorder %s171_s15, %s171_s15 }
  0xd3   :  { %p7903_p3 = scmp.lt.s32.totalorder %s7901_s4, %s7897_s12 }
  0xd5   :  { %p7904_p4 = por %p7903_p3, %p7902_p2 }
  0xd7   :  { %p7905_p5 = pnand %p7904_p4, %p7898_p1 }
  0xd9   :  { %7908 = shalt.err (!%p7905_p5)
}
  0xda   :  { %173 = dma.hbm_to_vmem [thread:$0]  %s10051_s13, 16, %s171_s15, [#allocation20]  }
  0xdb   :  { %7909 = dma.done.wait [#allocation3], 5120  }
  0xdc   :  { %7910 = vsyncadd [#allocation3], 4294962176 }
  0xdd   :  { %7911 = dma.done.wait [#allocation5], 11776  }
  0xde   :  { %7912 = vsyncadd [#allocation5], 4294955520 }
  0xdf   :  { %7913 = dma.done.wait [#allocation8], 40992  }
  0xe0   :  { %7914 = vsyncadd [#allocation8], 4294926304 }
  0xe1   :  { %7915 = dma.done.wait [#allocation11], 672  }
  0xe2   :  { %7916 = vsyncadd [#allocation11], 4294966624 }
  0xe3   :  { %7917 = dma.done.wait [#allocation14], 20496  }
  0xe4   :  { %7918 = vsyncadd [#allocation14], 4294946800 }
  0xe5   :  { %7919 = dma.done.wait [#allocation17], 2064  }
  0xe6   :  { %7920 = vsyncadd [#allocation17], 4294965232 }
  0xe7   :  { %7921 = dma.done.wait [#allocation20], 2064  }
  0xe8   :  { %7922 = vsyncadd [#allocation20], 4294965232  ;;  %v10053_v0 = vmov 0.0   ;;  %v255_v1 = vld [vmem:[#allocation2 + $0x48] sm:$0xff]  ;;  %v257_v2 = vld [vmem:[#allocation2 + $0x58] sm:$0xff]  ;;  %vm294_vm0 = vcmask 1046528  }
  0xe9   :  { %487 = vmatprep.mubr.f32.mxu0 %v10053_v0  ;;  %v254_v3 = vld [vmem:[#allocation2 + $0x40] sm:$0xff]  ;;  %v6410_v4 = vpack.c.bf16 %v257_v2, %v255_v1  ;;  %v256_v5 = vld [vmem:[#allocation2 + $0x50] sm:$0xff]  ;;  %v259_v6 = vld [vmem:[#allocation2 + $0x68] sm:$0xff]  ;;  %vm358_vm1 = vcmask 261120   ;;  %vm698_vm2 = vcmask 1044480   ;;  %vm1092_vm3 = vcmask 1043456  }
  0xea   :  { %v261_v7 = vld [vmem:[#allocation2 + $0x78] sm:$0xff]  ;;  %v6412_v8 = vpack.c.bf16 %v256_v5, %v254_v3  ;;  %v258_v10 = vld [vmem:[#allocation2 + $0x60] sm:$0xff]  ;;  %v260_v11 = vld [vmem:[#allocation2 + $0x70] sm:$0xff]  ;;  %vm1798_vm4 = vcmask 1045504   ;;  %vm3054_vm5 = vcmask 1006592   ;;  %vm3097_vm6 = vcmask 1042432  }
  0xeb   :  { %v6414_v9 = vpack.c.bf16 %v261_v7, %v259_v6  ;;  %v8203_v12 = vld [vmem:[%s10038_s0] sm:$0xff]  ;;  %6411 = vmatprep.subr.bf16.mxu0 %v6410_v4  ;;  %v8208_v13 = vld [vmem:[%s10038_s0 + $0x8] sm:$0xff]  ;;  %v6416_v14 = vpack.c.bf16 %v260_v11, %v258_v10  ;;  %v693_v18 = vld [vmem:[#allocation2 + $0xd8] sm:$0xff]  ;;  %vm7941_vm7 = vmmov 1   ;;  %vm5094_vm9 = vcmask 875520  }
  0xec   :  { %6413 = vmatpush1.bf16.msra.mxu0 %v6412_v8  ;;  %v295_v15 = vrot.slane %v8203_v12, 1  ;;  %v296_v16 = vrot.slane %v8208_v13, 1  ;;  %v691_v17 = vld [vmem:[#allocation2 + $0xc8] sm:$0xff]  ;;  %v8215_v19 = vld [vmem:[%s10038_s0 + $0x10] sm:$0xff]  ;;  %v690_v21 = vld [vmem:[#allocation2 + $0xc0] sm:$0xff]  ;;  %vm7943_vm10 = vmmov 0  }
  0xed   :  { %6415 = vmatprep.subr.bf16.mxu0 %v6414_v9  ;;  %v6418_v20 = vpack.c.bf16 %v693_v18, %v691_v17  ;;  %v692_v22 = vld [vmem:[#allocation2 + $0xd0] sm:$0xff]  ;;  %v298_v24 = vrot.slane %v8215_v19, 1  ;;  %v8222_v26 = vld [vmem:[%s10038_s0 + $0x18] sm:$0xff]  ;;  %v695_v27 = vld [vmem:[#allocation2 + $0xe8] sm:$0xff] }
  0xee   :  { %v297_v23 = vsel %vm294_vm0, %v295_v15, %v296_v16  ;;  %v6420_v25 = vpack.c.bf16 %v692_v22, %v690_v21  ;;  %v300_v29 = vrot.slane %v8222_v26, 1  ;;  %v697_v30 = vld [vmem:[#allocation2 + $0xf8] sm:$0xff]  ;;  %v694_v31 = vld [vmem:[#allocation2 + $0xe0] sm:$0xff]  ;;  %v696_v32 = vld [vmem:[#allocation2 + $0xf0] sm:$0xff] }
  0xef   :  { %v299_v28 = vsel %vm294_vm0, %v296_v16, %v298_v24  ;;  %v8231_v33 = vld [vmem:[%s10038_s0 + $0x20] sm:$0xff]  ;;  %v6422_v34 = vpack.c.bf16 %v697_v30, %v695_v27  ;;  %v6424_v35 = vpack.c.bf16 %v696_v32, %v694_v31  ;;  %v8240_v38 = vld [vmem:[%s10038_s0 + $0x28] sm:$0xff]  ;;  %v1087_v42 = vld [vmem:[#allocation2 + $0x118] sm:$0xff] }
  0xf0   :  { %6417 = vmatpush1.bf16.msra.mxu0 %v6416_v14  ;;  %v301_v36 = vsel %vm294_vm0, %v298_v24, %v300_v29  ;;  %v302_v37 = vrot.slane %v8231_v33, 1  ;;  %v304_v40 = vrot.slane %v8240_v38, 1  ;;  %v1085_v41 = vld [vmem:[#allocation2 + $0x108] sm:$0xff]  ;;  %v8249_v43 = vld [vmem:[%s10038_s0 + $0x30] sm:$0xff]  ;;  %v8258_v47 = vld [vmem:[%s10038_s0 + $0x38] sm:$0xff] }
  0xf1   :  { %6419 = vmatprep.subr.bf16.mxu0 %v6418_v20  ;;  %v6426_v44 = vpack.c.bf16 %v1087_v42, %v1085_v41  ;;  %v306_v46 = vrot.slane %v8249_v43, 1  ;;  %v308_v49 = vrot.slane %v8258_v47, 1  ;;  %v8267_v50 = vld [vmem:[%s10038_s0 + $0x40] sm:$0xff]  ;;  %v8276_v53 = vld [vmem:[%s10038_s0 + $0x48] sm:$0xff]  ;;  %v8285_v56 = vld [vmem:[%s10038_s0 + $0x50] sm:$0xff] }
  0xf2   :  { %v303_v39 = vsel %vm294_vm0, %v300_v29, %v302_v37  ;;  %v305_v45 = vsel %vm294_vm0, %v302_v37, %v304_v40  ;;  %v310_v52 = vrot.slane %v8267_v50, 1  ;;  %v312_v55 = vrot.slane %v8276_v53, 1  ;;  %v8294_v59 = vld [vmem:[%s10038_s0 + $0x58] sm:$0xff]  ;;  %v8303_v62 = vld [vmem:[%s10038_s0 + $0x60] sm:$0xff]  ;;  %v8312_v2 = vld [vmem:[%s10038_s0 + $0x68] sm:$0xff] }
  0xf3   :  { %5945 = vmatmul.mubr.msk.f32.vlgmr.msra.gmra.mrb[0].mxu0 %vm358_vm1, %v297_v23  ;;  %v307_v48 = vsel %vm294_vm0, %v304_v40, %v306_v46  ;;  %v309_v51 = vsel %vm294_vm0, %v306_v46, %v308_v49  ;;  %v314_v58 = vrot.slane %v8285_v56, 1  ;;  %v316_v61 = vrot.slane %v8294_v59, 1  ;;  %v8321_v5 = vld [vmem:[%s10038_s0 + $0x70] sm:$0xff]  ;;  %v8330_v8 = vld [vmem:[%s10038_s0 + $0x78] sm:$0xff]  ;;  %v8339_v11 = vld [vmem:[%s10038_s0 + $0x80] sm:$0xff] }
  0xf4   :  { %493 = vmatprep.mubr.f32.mxu0 %v10053_v0  ;;  %6421 = vmatpush1.bf16.msra.mxu0 %v6420_v25  ;;  %v311_v54 = vsel %vm294_vm0, %v308_v49, %v310_v52  ;;  %v313_v57 = vsel %vm294_vm0, %v310_v52, %v312_v55  ;;  %v318_v1 = vrot.slane %v8303_v62, 1  ;;  %v320_v4 = vrot.slane %v8312_v2, 1  ;;  %v8348_v16 = vld [vmem:[%s10038_s0 + $0x88] sm:$0xff]  ;;  %v8357_v20 = vld [vmem:[%s10038_s0 + $0x90] sm:$0xff]  ;;  %v8366_v23 = vld [vmem:[%s10038_s0 + $0x98] sm:$0xff] }
  0xf5   :  { %6423 = vmatprep.subr.bf16.mxu0 %v6422_v34  ;;  %v315_v60 = vsel %vm294_vm0, %v312_v55, %v314_v58  ;;  %v317_v63 = vsel %vm294_vm0, %v314_v58, %v316_v61  ;;  %v322_v7 = vrot.slane %v8321_v5, 1  ;;  %v324_v10 = vrot.slane %v8330_v8, 1  ;;  %v8375_v27 = vld [vmem:[%s10038_s0 + $0xa0] sm:$0xff]  ;;  %v8384_v30 = vld [vmem:[%s10038_s0 + $0xa8] sm:$0xff]  ;;  %v8393_v34 = vld [vmem:[%s10038_s0 + $0xb0] sm:$0xff] }
  0xf6   :  { %v319_v3 = vsel %vm294_vm0, %v316_v61, %v318_v1  ;;  %v321_v6 = vsel %vm294_vm0, %v318_v1, %v320_v4  ;;  %v326_v15 = vrot.slane %v8339_v11, 1  ;;  %v328_v18 = vrot.slane %v8348_v16, 1  ;;  %v8402_v37 = vld [vmem:[%s10038_s0 + $0xb8] sm:$0xff]  ;;  %v8411_v41 = vld [vmem:[%s10038_s0 + $0xc0] sm:$0xff]  ;;  %v8429_v49 = vld [vmem:[%s10038_s0 + $0xd0] sm:$0xff] }
  0xf7   :  { %5946 = vmatmul.mubr.msk.f32.gmra.mrb[2].mxu0 %vm358_vm1, %v299_v28  ;;  %v323_v9 = vsel %vm294_vm0, %v320_v4, %v322_v7  ;;  %v325_v14 = vsel %vm294_vm0, %v322_v7, %v324_v10  ;;  %v330_v22 = vrot.slane %v8357_v20, 1  ;;  %v332_v25 = vrot.slane %v8366_v23, 1  ;;  %v8447_v58 = vld [vmem:[%s10038_s0 + $0xe0] sm:$0xff]  ;;  %v8465_v4 = vld [vmem:[%s10038_s0 + $0xf0] sm:$0xff]  ;;  %vm9442_vm8 = vmpackc.low %vm3097_vm6, %vm7941_vm7 }
  0xf8   :  { %499 = vmatprep.mubr.f32.mxu0 %v10053_v0  ;;  %6425 = vmatpush1.bf16.msra.mxu0 %v6424_v35  ;;  %v327_v17 = vsel %vm294_vm0, %v324_v10, %v326_v15  ;;  %v329_v21 = vsel %vm294_vm0, %v326_v15, %v328_v18  ;;  %v334_v29 = vrot.slane %v8375_v27, 1  ;;  %v336_v32 = vrot.slane %v8384_v30, 1 }
  0xf9   :  { %6427 = vmatprep.subr.bf16.mxu0 %v6426_v44  ;;  %v331_v24 = vsel %vm294_vm0, %v328_v18, %v330_v22  ;;  %v333_v28 = vsel %vm294_vm0, %v330_v22, %v332_v25  ;;  %v340_v40 = vrot.slane %v8402_v37, 1  ;;  %v342_v44 = vrot.slane %v8411_v41, 1  ;;  %v1086_v22 = vld [vmem:[#allocation2 + $0x110] sm:$0xff] }
  0xfa   :  { %v335_v31 = vsel %vm294_vm0, %v332_v25, %v334_v29  ;;  %v337_v35 = vsel %vm294_vm0, %v334_v29, %v336_v32  ;;  %v346_v52 = vrot.slane %v8429_v49, 1  ;;  %v350_v61 = vrot.slane %v8447_v58, 1  ;;  %v1091_v25 = vld [vmem:[#allocation2 + $0x138] sm:$0xff] }
  0xfb   :  { %5947 = vmatmul.mubr.msk.f32.gmra.mrb[4].mxu0 %vm358_vm1, %v301_v36  ;;  %v338_v36 = vrot.slane %v8393_v34, 1  ;;  %v343_v46 = vsel %vm294_vm0, %v340_v40, %v342_v44  ;;  %v354_v7 = vrot.slane %v8465_v4, 1  ;;  %v700_v18 = vrot.slane %v8208_v13, 3 }
  0xfc   :  { %505 = vmatprep.mubr.f32.mxu0 %v10053_v0  ;;  %v702_v29 = vrot.slane %v8215_v19, 3 }
  0xfd   :  { %v341_v42 = vsel %vm294_vm0, %v338_v36, %v340_v40  ;;  %v704_v40 = vrot.slane %v8222_v26, 3 }
  0xff   :  { %5948 = vmatmul.mubr.msk.f32.gmra.mrb[6].mxu0 %vm358_vm1, %v303_v39  ;;  %v339_v39 = vsel %vm294_vm0, %v336_v32, %v338_v36  ;;  %v1090_v36 = vld [vmem:[#allocation2 + $0x130] sm:$0xff] }
 0x100   :  { %511 = vmatprep.mubr.f32.mxu0 %v10053_v0 }
 0x103   :  { %5949 = vmatmul.mubr.msk.f32.gmra.mrb[8].mxu0 %vm358_vm1, %v305_v45  ;;  %v8420_v45 = vld [vmem:[%s10038_s0 + $0xc8] sm:$0xff] }
 0x104   :  { %517 = vmatprep.mubr.f32.mxu0 %v10053_v0 }
 0x107   :  { %5950 = vmatmul.mubr.msk.f32.gmra.mrb[10].mxu0 %vm358_vm1, %v307_v48  ;;  %v344_v48 = vrot.slane %v8420_v45, 1 }
 0x108   :  { %523 = vmatprep.mubr.f32.mxu0 %v10053_v0 }
 0x109   :  { %v347_v55 = vsel %vm294_vm0, %v344_v48, %v346_v52 }
 0x10b   :  { %5951 = vmatmul.mubr.msk.f32.gmra.mrb[12].mxu0 %vm358_vm1, %v309_v51  ;;  %v345_v51 = vsel %vm294_vm0, %v342_v44, %v344_v48  ;;  %v705_v44 = vsel %vm698_vm2, %v702_v29, %v704_v40  ;;  %v246_v48 = vld [vmem:[#allocation2 + $0x8] sm:$0xff] }
 0x10c   :  { %529 = vmatprep.mubr.f32.mxu0 %v10053_v0 }
 0x10f   :  { %5952 = vmatmul.mubr.msk.f32.gmra.mrb[14].mxu0 %vm358_vm1, %v311_v54  ;;  %v8438_v54 = vld [vmem:[%s10038_s0 + $0xd8] sm:$0xff] }
 0x110   :  { %535 = vmatprep.mubr.f32.mxu0 %v10053_v0 }
 0x113   :  { %5953 = vmatmul.mubr.msk.f32.gmra.mrb[16].mxu0 %vm358_vm1, %v313_v57  ;;  %v348_v57 = vrot.slane %v8438_v54, 1 }
 0x114   :  { %541 = vmatprep.mubr.f32.mxu0 %v10053_v0 }
 0x115   :  { %v351_v1 = vsel %vm294_vm0, %v348_v57, %v350_v61 }
 0x117   :  { %5954 = vmatmul.mubr.msk.f32.gmra.mrb[18].mxu0 %vm358_vm1, %v315_v60  ;;  %v349_v60 = vsel %vm294_vm0, %v346_v52, %v348_v57 }
 0x118   :  { %547 = vmatprep.mubr.f32.mxu0 %v10053_v0 }
 0x11b   :  { %5955 = vmatmul.mubr.msk.f32.gmra.mrb[20].mxu0 %vm358_vm1, %v317_v63  ;;  %v8456_v63 = vld [vmem:[%s10038_s0 + $0xe8] sm:$0xff] }
 0x11c   :  { %553 = vmatprep.mubr.f32.mxu0 %v10053_v0 }
 0x11f   :  { %5956 = vmatmul.mubr.msk.f32.gmra.mrb[22].mxu0 %vm358_vm1, %v319_v3  ;;  %v352_v3 = vrot.slane %v8456_v63, 1 }
 0x120   :  { %559 = vmatprep.mubr.f32.mxu0 %v10053_v0 }
 0x121   :  { %v355_v10 = vsel %vm294_vm0, %v352_v3, %v354_v7 }
 0x123   :  { %5957 = vmatmul.mubr.msk.f32.gmra.mrb[24].mxu0 %vm358_vm1, %v321_v6  ;;  %v353_v6 = vsel %vm294_vm0, %v350_v61, %v352_v3  ;;  %v710_v61 = vrot.slane %v8249_v43, 3  ;;  %v712_v3 = vrot.slane %v8258_v47, 3 }
 0x124   :  { %565 = vmatprep.mubr.f32.mxu0 %v10053_v0 }
 0x127   :  { %5958 = vmatmul.mubr.msk.f32.gmra.mrb[26].mxu0 %vm358_vm1, %v323_v9  ;;  %v8474_v9 = vld [vmem:[%s10038_s0 + $0xf8] sm:$0xff] }
 0x128   :  { %571 = vmatprep.mubr.f32.mxu0 %v10053_v0 }
 0x12b   :  { %5959 = vmatmul.mubr.msk.f32.gmra.mrb[28].mxu0 %vm358_vm1, %v325_v14  ;;  %v356_v14 = vrot.slane %v8474_v9, 1 }
 0x12c   :  { %577 = vmatprep.mubr.f32.mxu0 %v10053_v0 }
 0x12d   :  { %v357_v15 = vsel %vm294_vm0, %v354_v7, %v356_v14  ;;  %v714_v7 = vrot.slane %v8267_v50, 3 }
 0x12f   :  { %5960 = vmatmul.mubr.msk.f32.gmra.mrb[30].mxu0 %vm358_vm1, %v327_v17  ;;  %v699_v17 = vrot.slane %v8203_v12, 3 }
 0x130   :  { %583 = vmatprep.mubr.f32.mxu0 %v10053_v0 }
 0x133   :  { %5961 = vmatmul.mubr.msk.f32.gmra.mrb[32].mxu0 %vm358_vm1, %v329_v21  ;;  %v1084_v21 = vld [vmem:[#allocation2 + $0x100] sm:$0xff] }
 0x134   :  { %589 = vmatprep.mubr.f32.mxu0 %v10053_v0 }
 0x137   :  { %5962 = vmatmul.mubr.msk.f32.gmra.mrb[34].mxu0 %vm358_vm1, %v331_v24  ;;  %v1089_v24 = vld [vmem:[#allocation2 + $0x128] sm:$0xff] }
 0x138   :  { %595 = vmatprep.mubr.f32.mxu0 %v10053_v0  ;;  %v6430_v32 = vpack.c.bf16 %v1091_v25, %v1089_v24  ;;  %v722_v24 = vrot.slane %v8303_v62, 3 }
 0x13b   :  { %5963 = vmatmul.mubr.msk.f32.gmra.mrb[36].mxu0 %vm358_vm1, %v333_v28  ;;  %v701_v28 = vsel %vm698_vm2, %v699_v17, %v700_v18  ;;  %v718_v17 = vrot.slane %v8285_v56, 3 }
 0x13c   :  { %601 = vmatprep.mubr.f32.mxu0 %v10053_v0 }
 0x13f   :  { %5964 = vmatmul.mubr.msk.f32.gmra.mrb[38].mxu0 %vm358_vm1, %v335_v31  ;;  %v6428_v31 = vpack.c.bf16 %v1086_v22, %v1084_v21  ;;  %v720_v21 = vrot.slane %v8294_v59, 3 }
 0x140   :  { %607 = vmatprep.mubr.f32.mxu0 %v10053_v0 }
 0x141   :  { %v721_v22 = vsel %vm698_vm2, %v718_v17, %v720_v21  ;;  %v723_v25 = vsel %vm698_vm2, %v720_v21, %v722_v24 }
 0x143   :  { %5965 = vmatmul.mubr.msk.f32.gmra.mrb[40].mxu0 %vm358_vm1, %v337_v35  ;;  %v1088_v35 = vld [vmem:[#allocation2 + $0x120] sm:$0xff] }
 0x144   :  { %613 = vmatprep.mubr.f32.mxu0 %v10053_v0 }
 0x147   :  { %5966 = vmatmul.mubr.msk.f32.gmra.mrb[42].mxu0 %vm358_vm1, %v339_v39  ;;  %v703_v39 = vsel %vm698_vm2, %v700_v18, %v702_v29 }
 0x148   :  { %619 = vmatprep.mubr.f32.mxu0 %v10053_v0 }
 0x14b   :  { %5967 = vmatmul.mubr.msk.f32.gmra.mrb[44].mxu0 %vm358_vm1, %v341_v42  ;;  %v6432_v42 = vpack.c.bf16 %v1090_v36, %v1088_v35  ;;  %v728_v35 = vrot.slane %v8330_v8, 3 }
 0x14c   :  { %625 = vmatprep.mubr.f32.mxu0 %v10053_v0 }
 0x14f   :  { %5968 = vmatmul.mubr.msk.f32.gmra.mrb[46].mxu0 %vm358_vm1, %v343_v46  ;;  %v706_v46 = vrot.slane %v8231_v33, 3 }
 0x150   :  { %631 = vmatprep.mubr.f32.mxu0 %v10053_v0 }
 0x151   :  { %v707_v52 = vsel %vm698_vm2, %v704_v40, %v706_v46 }
 0x153   :  { %5969 = vmatmul.mubr.msk.f32.gmra.mrb[48].mxu0 %vm358_vm1, %v345_v51  ;;  %v248_v51 = vld [vmem:[#allocation2 + $0x18] sm:$0xff] }
 0x154   :  { %637 = vmatprep.mubr.f32.mxu0 %v10053_v0  ;;  %v6434_v57 = vpack.c.bf16 %v248_v51, %v246_v48  ;;  %v736_v51 = vrot.slane %v8366_v23, 3 }
 0x157   :  { %5970 = vmatmul.mubr.msk.f32.gmra.mrb[50].mxu0 %vm358_vm1, %v347_v55  ;;  %v708_v55 = vrot.slane %v8240_v38, 3 }
 0x158   :  { %643 = vmatprep.mubr.f32.mxu0 %v10053_v0 }
 0x15b   :  { %5971 = vmatmul.mubr.msk.f32.gmra.mrb[52].mxu0 %vm358_vm1, %v349_v60  ;;  %v709_v60 = vsel %vm698_vm2, %v706_v46, %v708_v55  ;;  %v734_v46 = vrot.slane %v8357_v20, 3 }
 0x15c   :  { %649 = vmatprep.mubr.f32.mxu0 %v10053_v0 }
 0x15f   :  { %5972 = vmatmul.mubr.msk.f32.gmra.mrb[54].mxu0 %vm358_vm1, %v351_v1  ;;  %v711_v1 = vsel %vm698_vm2, %v708_v55, %v710_v61  ;;  %v738_v55 = vrot.slane %v8375_v27, 3 }
 0x160   :  { %655 = vmatprep.mubr.f32.mxu0 %v10053_v0 }
 0x163   :  { %5973 = vmatmul.mubr.msk.f32.gmra.mrb[56].mxu0 %vm358_vm1, %v353_v6  ;;  %v713_v6 = vsel %vm698_vm2, %v710_v61, %v712_v3 }
 0x164   :  { %661 = vmatprep.mubr.f32.mxu0 %v10053_v0 }
 0x167   :  { %5974 = vmatmul.mubr.msk.f32.gmra.mrb[58].mxu0 %vm358_vm1, %v355_v10  ;;  %v715_v10 = vsel %vm698_vm2, %v712_v3, %v714_v7 }
 0x168   :  { %667 = vmatprep.mubr.f32.mxu0 %v10053_v0 }
 0x16b   :  { %5975 = vmatmul.mubr.msk.f32.gmra.mrb[60].mxu0 %vm358_vm1, %v357_v15 }
 0x16c   :  { %673 = vmatprep.mubr.f32.mxu0 %v10053_v0 }
 0x16f   :  { %5976 = vmatmul.mubr.msk.f32.gmra.mrb[62].mxu0 %vm358_vm1, %v356_v14  ;;  %v716_v14 = vrot.slane %v8276_v53, 3 }
 0x170   :  { %890 = vmatprep.mubr.f32.mxu0 %v10053_v0 }
 0x171   :  { %v717_v15 = vsel %vm698_vm2, %v714_v7, %v716_v14  ;;  %v719_v18 = vsel %vm698_vm2, %v716_v14, %v718_v17 }
 0x173   :  { %5977 = vmatmul.mubr.msk.f32.vlgmr.msra.gmra.mrb[0].mxu0 %vm358_vm1, %v701_v28  ;;  %v724_v28 = vrot.slane %v8312_v2, 3 }
 0x174   :  { %896 = vmatprep.mubr.f32.mxu0 %v10053_v0  ;;  %6429 = vmatpush1.bf16.msra.mxu0 %v6428_v31  ;;  %v726_v31 = vrot.slane %v8321_v5, 3 }
 0x175   :  { %6431 = vmatprep.subr.bf16.mxu0 %v6430_v32  ;;  %v725_v29 = vsel %vm698_vm2, %v722_v24, %v724_v28 }
 0x176   :  { %v727_v32 = vsel %vm698_vm2, %v724_v28, %v726_v31  ;;  %v729_v36 = vsel %vm698_vm2, %v726_v31, %v728_v35 }
 0x177   :  { %5978 = vmatmul.mubr.msk.f32.gmra.mrb[2].mxu0 %vm358_vm1, %v703_v39  ;;  %v730_v39 = vrot.slane %v8339_v11, 3 }
 0x178   :  { %902 = vmatprep.mubr.f32.mxu0 %v10053_v0  ;;  %6433 = vmatpush1.bf16.msra.mxu0 %v6432_v42  ;;  %v732_v42 = vrot.slane %v8348_v16, 3 }
 0x179   :  { %6435 = vmatprep.subr.bf16.mxu0 %v6434_v57  ;;  %v731_v40 = vsel %vm698_vm2, %v728_v35, %v730_v39  ;;  %v739_v57 = vsel %vm698_vm2, %v736_v51, %v738_v55 }
 0x17a   :  { %v735_v48 = vsel %vm698_vm2, %v732_v42, %v734_v46 }
 0x17b   :  { %5979 = vmatmul.mubr.msk.f32.gmra.mrb[4].mxu0 %vm358_vm1, %v705_v44  ;;  %v733_v44 = vsel %vm698_vm2, %v730_v39, %v732_v42  ;;  %v1094_v42 = vrot.slane %v8208_v13, 4 }
 0x17c   :  { %908 = vmatprep.mubr.f32.mxu0 %v10053_v0 }
 0x17f   :  { %5980 = vmatmul.mubr.msk.f32.gmra.mrb[6].mxu0 %vm358_vm1, %v707_v52  ;;  %v737_v52 = vsel %vm698_vm2, %v734_v46, %v736_v51  ;;  %v247_v46 = vld [vmem:[#allocation2 + $0x10] sm:$0xff]  ;;  %v252_v51 = vld [vmem:[#allocation2 + $0x38] sm:$0xff] }
 0x180   :  { %914 = vmatprep.mubr.f32.mxu0 %v10053_v0 }
 0x183   :  { %5981 = vmatmul.mubr.msk.f32.gmra.mrb[8].mxu0 %vm358_vm1, %v709_v60  ;;  %v740_v60 = vrot.slane %v8384_v30, 3 }
 0x184   :  { %920 = vmatprep.mubr.f32.mxu0 %v10053_v0 }
 0x185   :  { %v741_v61 = vsel %vm698_vm2, %v738_v55, %v740_v60  ;;  %v1096_v55 = vrot.slane %v8215_v19, 4 }
 0x187   :  { %5982 = vmatmul.mubr.msk.f32.gmra.mrb[10].mxu0 %vm358_vm1, %v711_v1  ;;  %v742_v1 = vrot.slane %v8393_v34, 3 }
 0x188   :  { %926 = vmatprep.mubr.f32.mxu0 %v10053_v0 }
 0x189   :  { %v743_v3 = vsel %vm698_vm2, %v740_v60, %v742_v1 }
 0x18b   :  { %5983 = vmatmul.mubr.msk.f32.gmra.mrb[12].mxu0 %vm358_vm1, %v713_v6  ;;  %v744_v6 = vrot.slane %v8402_v37, 3 }
 0x18c   :  { %932 = vmatprep.mubr.f32.mxu0 %v10053_v0 }
 0x18d   :  { %v745_v7 = vsel %vm698_vm2, %v742_v1, %v744_v6  ;;  %v251_v1 = vld [vmem:[#allocation2 + $0x30] sm:$0xff] }
 0x18f   :  { %5984 = vmatmul.mubr.msk.f32.gmra.mrb[14].mxu0 %vm358_vm1, %v715_v10  ;;  %v746_v10 = vrot.slane %v8411_v41, 3 }
 0x190   :  { %938 = vmatprep.mubr.f32.mxu0 %v10053_v0 }
 0x191   :  { %v747_v14 = vsel %vm698_vm2, %v744_v6, %v746_v10  ;;  %v1098_v6 = vrot.slane %v8222_v26, 4 }
 0x193   :  { %5985 = vmatmul.mubr.msk.f32.gmra.mrb[16].mxu0 %vm358_vm1, %v717_v15  ;;  %v748_v15 = vrot.slane %v8420_v45, 3 }
 0x194   :  { %944 = vmatprep.mubr.f32.mxu0 %v10053_v0 }
 0x195   :  { %v749_v17 = vsel %vm698_vm2, %v746_v10, %v748_v15  ;;  %v1099_v10 = vsel %vm1092_vm3, %v1096_v55, %v1098_v6 }
 0x197   :  { %5986 = vmatmul.mubr.msk.f32.gmra.mrb[18].mxu0 %vm358_vm1, %v719_v18  ;;  %v750_v18 = vrot.slane %v8429_v49, 3 }
 0x198   :  { %950 = vmatprep.mubr.f32.mxu0 %v10053_v0 }
 0x199   :  { %v751_v21 = vsel %vm698_vm2, %v748_v15, %v750_v18  ;;  %v682_v15 = vld [vmem:[#allocation2 + $0x88] sm:$0xff] }
 0x19b   :  { %5987 = vmatmul.mubr.msk.f32.gmra.mrb[20].mxu0 %vm358_vm1, %v721_v22  ;;  %v752_v22 = vrot.slane %v8438_v54, 3 }
 0x19c   :  { %956 = vmatprep.mubr.f32.mxu0 %v10053_v0 }
 0x19d   :  { %v753_v24 = vsel %vm698_vm2, %v750_v18, %v752_v22 }
 0x19f   :  { %5988 = vmatmul.mubr.msk.f32.gmra.mrb[22].mxu0 %vm358_vm1, %v723_v25  ;;  %v754_v25 = vrot.slane %v8447_v58, 3 }
 0x1a0   :  { %962 = vmatprep.mubr.f32.mxu0 %v10053_v0 }
 0x1a1   :  { %v755_v28 = vsel %vm698_vm2, %v752_v22, %v754_v25 }
 0x1a3   :  { %5989 = vmatmul.mubr.msk.f32.gmra.mrb[24].mxu0 %vm358_vm1, %v725_v29  ;;  %v756_v29 = vrot.slane %v8456_v63, 3 }
 0x1a4   :  { %968 = vmatprep.mubr.f32.mxu0 %v10053_v0 }
 0x1a5   :  { %v757_v31 = vsel %vm698_vm2, %v754_v25, %v756_v29  ;;  %v1104_v25 = vrot.slane %v8249_v43, 4 }
 0x1a7   :  { %5990 = vmatmul.mubr.msk.f32.gmra.mrb[26].mxu0 %vm358_vm1, %v727_v32  ;;  %v758_v32 = vrot.slane %v8465_v4, 3 }
 0x1a8   :  { %974 = vmatprep.mubr.f32.mxu0 %v10053_v0 }
 0x1a9   :  { %v759_v35 = vsel %vm698_vm2, %v756_v29, %v758_v32  ;;  %v1106_v29 = vrot.slane %v8258_v47, 4 }
 0x1ab   :  { %5991 = vmatmul.mubr.msk.f32.gmra.mrb[28].mxu0 %vm358_vm1, %v729_v36  ;;  %v760_v36 = vrot.slane %v8474_v9, 3 }
 0x1ac   :  { %980 = vmatprep.mubr.f32.mxu0 %v10053_v0 }
 0x1ad   :  { %v761_v39 = vsel %vm698_vm2, %v758_v32, %v760_v36  ;;  %v1108_v32 = vrot.slane %v8267_v50, 4 }
 0x1af   :  { %5992 = vmatmul.mubr.msk.f32.gmra.mrb[30].mxu0 %vm358_vm1, %v731_v40  ;;  %v1093_v40 = vrot.slane %v8203_v12, 4 }
 0x1b0   :  { %986 = vmatprep.mubr.f32.mxu0 %v10053_v0 }
 0x1b3   :  { %5993 = vmatmul.mubr.msk.f32.gmra.mrb[32].mxu0 %vm358_vm1, %v733_v44  ;;  %v245_v44 = vld [vmem:[#allocation2] sm:$0xff] }
 0x1b4   :  { %992 = vmatprep.mubr.f32.mxu0 %v10053_v0 }
 0x1b7   :  { %5994 = vmatmul.mubr.msk.f32.gmra.mrb[34].mxu0 %vm358_vm1, %v735_v48  ;;  %v250_v48 = vld [vmem:[#allocation2 + $0x28] sm:$0xff] }
 0x1b8   :  { %998 = vmatprep.mubr.f32.mxu0 %v10053_v0  ;;  %v6438_v60 = vpack.c.bf16 %v252_v51, %v250_v48  ;;  %v1116_v48 = vrot.slane %v8303_v62, 4 }
 0x1bb   :  { %5995 = vmatmul.mubr.msk.f32.gmra.mrb[36].mxu0 %vm358_vm1, %v737_v52  ;;  %v1095_v52 = vsel %vm1092_vm3, %v1093_v40, %v1094_v42  ;;  %v1112_v40 = vrot.slane %v8285_v56, 4 }
 0x1bc   :  { %1004 = vmatprep.mubr.f32.mxu0 %v10053_v0 }
 0x1bf   :  { %5996 = vmatmul.mubr.msk.f32.gmra.mrb[38].mxu0 %vm358_vm1, %v739_v57  ;;  %v6436_v57 = vpack.c.bf16 %v247_v46, %v245_v44  ;;  %v1114_v44 = vrot.slane %v8294_v59, 4 }
 0x1c0   :  { %1010 = vmatprep.mubr.f32.mxu0 %v10053_v0 }
 0x1c1   :  { %v1115_v46 = vsel %vm1092_vm3, %v1112_v40, %v1114_v44  ;;  %v1117_v51 = vsel %vm1092_vm3, %v1114_v44, %v1116_v48 }
 0x1c3   :  { %5997 = vmatmul.mubr.msk.f32.gmra.mrb[40].mxu0 %vm358_vm1, %v741_v61  ;;  %v249_v61 = vld [vmem:[#allocation2 + $0x20] sm:$0xff] }
 0x1c4   :  { %1016 = vmatprep.mubr.f32.mxu0 %v10053_v0 }
 0x1c7   :  { %5998 = vmatmul.mubr.msk.f32.gmra.mrb[42].mxu0 %vm358_vm1, %v743_v3  ;;  %v1097_v3 = vsel %vm1092_vm3, %v1094_v42, %v1096_v55 }
 0x1c8   :  { %1022 = vmatprep.mubr.f32.mxu0 %v10053_v0 }
 0x1cb   :  { %5999 = vmatmul.mubr.msk.f32.gmra.mrb[44].mxu0 %vm358_vm1, %v745_v7  ;;  %v6440_v7 = vpack.c.bf16 %v251_v1, %v249_v61  ;;  %v1122_v61 = vrot.slane %v8330_v8, 4 }
 0x1cc   :  { %1028 = vmatprep.mubr.f32.mxu0 %v10053_v0 }
 0x1cf   :  { %6000 = vmatmul.mubr.msk.f32.gmra.mrb[46].mxu0 %vm358_vm1, %v747_v14  ;;  %v1100_v14 = vrot.slane %v8231_v33, 4 }
 0x1d0   :  { %1034 = vmatprep.mubr.f32.mxu0 %v10053_v0 }
 0x1d1   :  { %v1101_v18 = vsel %vm1092_vm3, %v1098_v6, %v1100_v14 }
 0x1d3   :  { %6001 = vmatmul.mubr.msk.f32.gmra.mrb[48].mxu0 %vm358_vm1, %v749_v17  ;;  %v684_v17 = vld [vmem:[#allocation2 + $0x98] sm:$0xff] }
 0x1d4   :  { %1040 = vmatprep.mubr.f32.mxu0 %v10053_v0  ;;  %v6442_v22 = vpack.c.bf16 %v684_v17, %v682_v15  ;;  %v1130_v17 = vrot.slane %v8366_v23, 4 }
 0x1d7   :  { %6002 = vmatmul.mubr.msk.f32.gmra.mrb[50].mxu0 %vm358_vm1, %v751_v21  ;;  %v1102_v21 = vrot.slane %v8240_v38, 4 }
 0x1d8   :  { %1046 = vmatprep.mubr.f32.mxu0 %v10053_v0 }
 0x1db   :  { %6003 = vmatmul.mubr.msk.f32.gmra.mrb[52].mxu0 %vm358_vm1, %v753_v24  ;;  %v1103_v24 = vsel %vm1092_vm3, %v1100_v14, %v1102_v21  ;;  %v1128_v14 = vrot.slane %v8357_v20, 4 }
 0x1dc   :  { %1052 = vmatprep.mubr.f32.mxu0 %v10053_v0 }
 0x1df   :  { %6004 = vmatmul.mubr.msk.f32.gmra.mrb[54].mxu0 %vm358_vm1, %v755_v28  ;;  %v1105_v28 = vsel %vm1092_vm3, %v1102_v21, %v1104_v25  ;;  %v1132_v21 = vrot.slane %v8375_v27, 4 }
 0x1e0   :  { %1058 = vmatprep.mubr.f32.mxu0 %v10053_v0 }
 0x1e3   :  { %6005 = vmatmul.mubr.msk.f32.gmra.mrb[56].mxu0 %vm358_vm1, %v757_v31  ;;  %v1107_v31 = vsel %vm1092_vm3, %v1104_v25, %v1106_v29 }
 0x1e4   :  { %1064 = vmatprep.mubr.f32.mxu0 %v10053_v0 }
 0x1e7   :  { %6006 = vmatmul.mubr.msk.f32.gmra.mrb[58].mxu0 %vm358_vm1, %v759_v35  ;;  %v1109_v35 = vsel %vm1092_vm3, %v1106_v29, %v1108_v32 }
 0x1e8   :  { %1070 = vmatprep.mubr.f32.mxu0 %v10053_v0 }
 0x1eb   :  { %6007 = vmatmul.mubr.msk.f32.gmra.mrb[60].mxu0 %vm358_vm1, %v761_v39 }
 0x1ec   :  { %1076 = vmatprep.mubr.f32.mxu0 %v10053_v0 }
 0x1ef   :  { %6008 = vmatmul.mubr.msk.f32.gmra.mrb[62].mxu0 %vm358_vm1, %v760_v36  ;;  %v1110_v36 = vrot.slane %v8276_v53, 4 }
 0x1f0   :  { %1284 = vmatprep.mubr.f32.mxu0 %v10053_v0 }
 0x1f1   :  { %v1111_v39 = vsel %vm1092_vm3, %v1108_v32, %v1110_v36  ;;  %v1113_v42 = vsel %vm1092_vm3, %v1110_v36, %v1112_v40 }
 0x1f3   :  { %6009 = vmatmul.mubr.msk.f32.vlgmr.msra.gmra.mrb[0].mxu0 %vm358_vm1, %v1095_v52  ;;  %v1118_v52 = vrot.slane %v8312_v2, 4 }
 0x1f4   :  { %1290 = vmatprep.mubr.f32.mxu0 %v10053_v0  ;;  %6437 = vmatpush1.bf16.msra.mxu0 %v6436_v57  ;;  %v1120_v57 = vrot.slane %v8321_v5, 4 }
 0x1f5   :  { %6439 = vmatprep.subr.bf16.mxu0 %v6438_v60  ;;  %v1119_v55 = vsel %vm1092_vm3, %v1116_v48, %v1118_v52 }
 0x1f6   :  { %v1121_v60 = vsel %vm1092_vm3, %v1118_v52, %v1120_v57  ;;  %v1123_v1 = vsel %vm1092_vm3, %v1120_v57, %v1122_v61 }
 0x1f7   :  { %6010 = vmatmul.mubr.msk.f32.gmra.mrb[2].mxu0 %vm358_vm1, %v1097_v3  ;;  %v1124_v3 = vrot.slane %v8339_v11, 4 }
 0x1f8   :  { %1296 = vmatprep.mubr.f32.mxu0 %v10053_v0  ;;  %6441 = vmatpush1.bf16.msra.mxu0 %v6440_v7  ;;  %v1126_v7 = vrot.slane %v8348_v16, 4 }
 0x1f9   :  { %6443 = vmatprep.subr.bf16.mxu0 %v6442_v22  ;;  %v1125_v6 = vsel %vm1092_vm3, %v1122_v61, %v1124_v3  ;;  %v1133_v22 = vsel %vm1092_vm3, %v1130_v17, %v1132_v21 }
 0x1fa   :  { %v1129_v15 = vsel %vm1092_vm3, %v1126_v7, %v1128_v14 }
 0x1fb   :  { %6011 = vmatmul.mubr.msk.f32.gmra.mrb[4].mxu0 %vm358_vm1, %v1099_v10  ;;  %v1127_v10 = vsel %vm1092_vm3, %v1124_v3, %v1126_v7  ;;  %v683_v7 = vld [vmem:[#allocation2 + $0x90] sm:$0xff] }
 0x1fc   :  { %1302 = vmatprep.mubr.f32.mxu0 %v10053_v0 }
 0x1ff   :  { %6012 = vmatmul.mubr.msk.f32.gmra.mrb[6].mxu0 %vm358_vm1, %v1101_v18  ;;  %v1131_v18 = vsel %vm1092_vm3, %v1128_v14, %v1130_v17  ;;  %v688_v14 = vld [vmem:[#allocation2 + $0xb8] sm:$0xff] }
 0x200   :  { %1308 = vmatprep.mubr.f32.mxu0 %v10053_v0 }
 0x203   :  { %6013 = vmatmul.mubr.msk.f32.gmra.mrb[8].mxu0 %vm358_vm1, %v1103_v24  ;;  %v1134_v24 = vrot.slane %v8384_v30, 4 }
 0x204   :  { %1314 = vmatprep.mubr.f32.mxu0 %v10053_v0 }
 0x205   :  { %v1135_v25 = vsel %vm1092_vm3, %v1132_v21, %v1134_v24  ;;  %v687_v21 = vld [vmem:[#allocation2 + $0xb0] sm:$0xff] }
 0x207   :  { %6014 = vmatmul.mubr.msk.f32.gmra.mrb[10].mxu0 %vm358_vm1, %v1105_v28  ;;  %v1136_v28 = vrot.slane %v8393_v34, 4 }
 0x208   :  { %1320 = vmatprep.mubr.f32.mxu0 %v10053_v0 }
 0x209   :  { %v1137_v29 = vsel %vm1092_vm3, %v1134_v24, %v1136_v28 }
 0x20b   :  { %6015 = vmatmul.mubr.msk.f32.gmra.mrb[12].mxu0 %vm358_vm1, %v1107_v31  ;;  %v1138_v31 = vrot.slane %v8402_v37, 4 }
 0x20c   :  { %1326 = vmatprep.mubr.f32.mxu0 %v10053_v0 }
 0x20d   :  { %v1139_v32 = vsel %vm1092_vm3, %v1136_v28, %v1138_v31  ;;  %v2323_v28 = vld [vmem:[#allocation4 + $0x60] sm:$0xff] }
 0x20f   :  { %6016 = vmatmul.mubr.msk.f32.gmra.mrb[14].mxu0 %vm358_vm1, %v1109_v35  ;;  %v1140_v35 = vrot.slane %v8411_v41, 4 }
 0x210   :  { %1332 = vmatprep.mubr.f32.mxu0 %v10053_v0 }
 0x211   :  { %v1141_v36 = vsel %vm1092_vm3, %v1138_v31, %v1140_v35  ;;  %v2328_v31 = vld [vmem:[#allocation4 + $0x88] sm:$0xff] }
 0x213   :  { %6017 = vmatmul.mubr.msk.f32.gmra.mrb[16].mxu0 %vm358_vm1, %v1111_v39  ;;  %v1142_v39 = vrot.slane %v8420_v45, 4 }
 0x214   :  { %1338 = vmatprep.mubr.f32.mxu0 %v10053_v0 }
 0x215   :  { %v1143_v40 = vsel %vm1092_vm3, %v1140_v35, %v1142_v39 }
 0x217   :  { %6018 = vmatmul.mubr.msk.f32.gmra.mrb[18].mxu0 %vm358_vm1, %v1113_v42  ;;  %v1144_v42 = vrot.slane %v8429_v49, 4 }
 0x218   :  { %1344 = vmatprep.mubr.f32.mxu0 %v10053_v0 }
 0x219   :  { %v1145_v44 = vsel %vm1092_vm3, %v1142_v39, %v1144_v42  ;;  %v7596_v39 = vld [vmem:[%s10038_s0 + $0x28] sm:$0xff] }
 0x21b   :  { %6019 = vmatmul.mubr.msk.f32.gmra.mrb[20].mxu0 %vm358_vm1, %v1115_v46  ;;  %v1146_v46 = vrot.slane %v8438_v54, 4 }
 0x21c   :  { %1350 = vmatprep.mubr.f32.mxu0 %v10053_v0 }
 0x21d   :  { %v1147_v48 = vsel %vm1092_vm3, %v1144_v42, %v1146_v46 }
 0x21f   :  { %6020 = vmatmul.mubr.msk.f32.gmra.mrb[22].mxu0 %vm358_vm1, %v1117_v51  ;;  %v1148_v51 = vrot.slane %v8447_v58, 4 }
 0x220   :  { %1356 = vmatprep.mubr.f32.mxu0 %v10053_v0 }
 0x221   :  { %v1149_v52 = vsel %vm1092_vm3, %v1146_v46, %v1148_v51  ;;  %v2329_v46 = vld [vmem:[#allocation4 + $0x90] sm:$0xff] }
 0x223   :  { %6021 = vmatmul.mubr.msk.f32.gmra.mrb[24].mxu0 %vm358_vm1, %v1119_v55  ;;  %v1150_v55 = vrot.slane %v8456_v63, 4 }
 0x224   :  { %1362 = vmatprep.mubr.f32.mxu0 %v10053_v0 }
 0x225   :  { %v1151_v57 = vsel %vm1092_vm3, %v1148_v51, %v1150_v55  ;;  %v2334_v51 = vld [vmem:[#allocation4 + $0xb8] sm:$0xff] }
 0x227   :  { %6022 = vmatmul.mubr.msk.f32.gmra.mrb[26].mxu0 %vm358_vm1, %v1121_v60  ;;  %v1152_v60 = vrot.slane %v8465_v4, 4 }
 0x228   :  { %1368 = vmatprep.mubr.f32.mxu0 %v10053_v0 }
 0x229   :  { %v1153_v61 = vsel %vm1092_vm3, %v1150_v55, %v1152_v60 }
 0x22b   :  { %6023 = vmatmul.mubr.msk.f32.gmra.mrb[28].mxu0 %vm358_vm1, %v1123_v1  ;;  %v1154_v1 = vrot.slane %v8474_v9, 4 }
 0x22c   :  { %1374 = vmatprep.mubr.f32.mxu0 %v10053_v0 }
 0x22d   :  { %v1155_v3 = vsel %vm1092_vm3, %v1152_v60, %v1154_v1 }
 0x22f   :  { %6024 = vmatmul.mubr.msk.f32.gmra.mrb[30].mxu0 %vm358_vm1, %v1125_v6  ;;  %v681_v6 = vld [vmem:[#allocation2 + $0x80] sm:$0xff] }
 0x230   :  { %1380 = vmatprep.mubr.f32.mxu0 %v10053_v0 }
 0x233   :  { %6025 = vmatmul.mubr.msk.f32.gmra.mrb[32].mxu0 %vm358_vm1, %v1127_v10  ;;  %v686_v10 = vld [vmem:[#allocation2 + $0xa8] sm:$0xff] }
 0x234   :  { %1386 = vmatprep.mubr.f32.mxu0 %v10053_v0  ;;  %v6446_v17 = vpack.c.bf16 %v688_v14, %v686_v10 }
 0x237   :  { %6026 = vmatmul.mubr.msk.f32.gmra.mrb[34].mxu0 %vm358_vm1, %v1129_v15  ;;  %v6444_v15 = vpack.c.bf16 %v683_v7, %v681_v6  ;;  %v2336_v6 = vld [vmem:[#allocation4 + $0xc8] sm:$0xff]  ;;  %v2338_v7 = vld [vmem:[#allocation4 + $0xd8] sm:$0xff] }
 0x238   :  { %1392 = vmatprep.mubr.f32.mxu0 %v10053_v0 }
 0x23b   :  { %6027 = vmatmul.mubr.msk.f32.gmra.mrb[36].mxu0 %vm358_vm1, %v1131_v18  ;;  %v685_v18 = vld [vmem:[#allocation2 + $0xa0] sm:$0xff] }
 0x23c   :  { %1398 = vmatprep.mubr.f32.mxu0 %v10053_v0 }
 0x23f   :  { %6028 = vmatmul.mubr.msk.f32.gmra.mrb[38].mxu0 %vm358_vm1, %v1133_v22  ;;  %v6448_v22 = vpack.c.bf16 %v687_v21, %v685_v18  ;;  %v8912_v18 = vpack.c.bf16 %v2338_v7, %v2336_v6  ;;  %v2335_v21 = vld [vmem:[#allocation4 + $0xc0] sm:$0xff]  ;;  %v2357_v7 = vld [vmem:[#allocation4 + $0x170] sm:$0xff] }
 0x240   :  { %1404 = vmatprep.mubr.f32.mxu0 %v10053_v0  ;;  %v2355_v6 = vld [vmem:[#allocation4 + $0x160] sm:$0xff] }
 0x241   :  { %10119 = vst [vmem:[#allocation41_spill] sm:$0xff] %v8912_v18 }
 0x243   :  { %6029 = vmatmul.mubr.msk.f32.gmra.mrb[40].mxu0 %vm358_vm1, %v1135_v25 }
 0x244   :  { %1410 = vmatprep.mubr.f32.mxu0 %v10053_v0 }
 0x247   :  { %6030 = vmatmul.mubr.msk.f32.gmra.mrb[42].mxu0 %vm358_vm1, %v1137_v29  ;;  %v2325_v29 = vld [vmem:[#allocation4 + $0x70] sm:$0xff] }
 0x248   :  { %1416 = vmatprep.mubr.f32.mxu0 %v10053_v0  ;;  %v8880_v35 = vpack.c.bf16 %v2325_v29, %v2323_v28  ;;  %v2352_v28 = vld [vmem:[#allocation4 + $0x148] sm:$0xff]  ;;  %v2354_v29 = vld [vmem:[#allocation4 + $0x158] sm:$0xff] }
 0x24a   :  { %10114 = vst [vmem:[#allocation36_spill] sm:$0xff] %v8880_v35 }
 0x24b   :  { %6031 = vmatmul.mubr.msk.f32.gmra.mrb[44].mxu0 %vm358_vm1, %v1139_v32  ;;  %v2330_v32 = vld [vmem:[#allocation4 + $0x98] sm:$0xff] }
 0x24c   :  { %1422 = vmatprep.mubr.f32.mxu0 %v10053_v0  ;;  %v8888_v42 = vpack.c.bf16 %v2330_v32, %v2328_v31 }
 0x24e   :  { %10115 = vst [vmem:[#allocation37_spill] sm:$0xff] %v8888_v42 }
 0x24f   :  { %6032 = vmatmul.mubr.msk.f32.gmra.mrb[46].mxu0 %vm358_vm1, %v1141_v36 }
 0x250   :  { %1428 = vmatprep.mubr.f32.mxu0 %v10053_v0 }
 0x253   :  { %6033 = vmatmul.mubr.msk.f32.gmra.mrb[48].mxu0 %vm358_vm1, %v1143_v40  ;;  %v1808_v40 = vrot.slane %v7596_v39, 2 }
 0x254   :  { %1434 = vmatprep.mubr.f32.mxu0 %v10053_v0 }
 0x257   :  { %6034 = vmatmul.mubr.msk.f32.gmra.mrb[50].mxu0 %vm358_vm1, %v1145_v44  ;;  %v2327_v44 = vld [vmem:[#allocation4 + $0x80] sm:$0xff] }
 0x258   :  { %1440 = vmatprep.mubr.f32.mxu0 %v10053_v0 }
 0x25b   :  { %6035 = vmatmul.mubr.msk.f32.gmra.mrb[52].mxu0 %vm358_vm1, %v1147_v48  ;;  %v2332_v48 = vld [vmem:[#allocation4 + $0xa8] sm:$0xff] }
 0x25c   :  { %1446 = vmatprep.mubr.f32.mxu0 %v10053_v0 }
 0x25f   :  { %6036 = vmatmul.mubr.msk.f32.gmra.mrb[54].mxu0 %vm358_vm1, %v1149_v52  ;;  %v8892_v52 = vpack.c.bf16 %v2329_v46, %v2327_v44  ;;  %v2351_v44 = vld [vmem:[#allocation4 + $0x140] sm:$0xff]  ;;  %v2353_v46 = vld [vmem:[#allocation4 + $0x150] sm:$0xff] }
 0x260   :  { %1452 = vmatprep.mubr.f32.mxu0 %v10053_v0 }
 0x261   :  { %10116 = vst [vmem:[#allocation38_spill] sm:$0xff] %v8892_v52 }
 0x263   :  { %6037 = vmatmul.mubr.msk.f32.gmra.mrb[56].mxu0 %vm358_vm1, %v1151_v57  ;;  %v7597_v57 = vld [vmem:[%s10038_s0 + $0x30] sm:$0xff] }
 0x264   :  { %1458 = vmatprep.mubr.f32.mxu0 %v10053_v0  ;;  %v1810_v60 = vrot.slane %v7597_v57, 2 }
 0x266   :  { %v1811_v14 = vsel %vm1798_vm4, %v1808_v40, %v1810_v60 }
 0x267   :  { %6038 = vmatmul.mubr.msk.f32.gmra.mrb[58].mxu0 %vm358_vm1, %v1153_v61  ;;  %v8900_v61 = vpack.c.bf16 %v2334_v51, %v2332_v48  ;;  %v2356_v48 = vld [vmem:[#allocation4 + $0x168] sm:$0xff]  ;;  %v2358_v51 = vld [vmem:[#allocation4 + $0x178] sm:$0xff] }
 0x268   :  { %1464 = vmatprep.mubr.f32.mxu0 %v10053_v0 }
 0x269   :  { %10117 = vst [vmem:[#allocation39_spill] sm:$0xff] %v8900_v61 }
 0x26b   :  { %6039 = vmatmul.mubr.msk.f32.gmra.mrb[60].mxu0 %vm358_vm1, %v1155_v3  ;;  %v2333_v3 = vld [vmem:[#allocation4 + $0xb0] sm:$0xff] }
 0x26c   :  { %1470 = vmatprep.mubr.f32.mxu0 %v10053_v0 }
 0x26f   :  { %6040 = vmatmul.mubr.msk.f32.gmra.mrb[62].mxu0 %vm358_vm1, %v1154_v1  ;;  %v2331_v1 = vld [vmem:[#allocation4 + $0xa0] sm:$0xff] }
 0x270   :  { %1605 = vmatprep.mubr.f32.mxu0 %v10053_v0  ;;  %v8904_v10 = vpack.c.bf16 %v2333_v3, %v2331_v1  ;;  %v8972_v3 = vpack.c.bf16 %v2358_v51, %v2356_v48 }
 0x272   :  { %10118 = vst [vmem:[#allocation40_spill] sm:$0xff] %v8904_v10  ;;  %10129 = vst [vmem:[#allocation51_spill] sm:$0xff] %v8972_v3 }
 0x273   :  { %6041 = vmatmul.mubr.msk.f32.vlgmr.msra.gmra.mrb[0].mxu0 %vm358_vm1, %v8203_v12  ;;  %v7591_v12 = vld [vmem:[%s10038_s0] sm:$0xff] }
 0x274   :  { %1611 = vmatprep.mubr.f32.mxu0 %v10053_v0  ;;  %6445 = vmatpush1.bf16.msra.mxu0 %v6444_v15  ;;  %v7598_v15 = vld [vmem:[%s10038_s0 + $0x38] sm:$0xff] }
 0x275   :  { %6447 = vmatprep.subr.bf16.mxu0 %v6446_v17  ;;  %v1812_v17 = vrot.slane %v7598_v15, 2  ;;  %v2362_v15 = vld [vmem:[#allocation4 + $0x198] sm:$0xff] }
 0x277   :  { %6042 = vmatmul.mubr.msk.f32.gmra.mrb[2].mxu0 %vm358_vm1, %v8208_v13  ;;  %v1799_v13 = vrot.slane %v7591_v12, 2  ;;  %v2340_v12 = vld [vmem:[#allocation4 + $0xe8] sm:$0xff] }
 0x278   :  { %1617 = vmatprep.mubr.f32.mxu0 %v10053_v0  ;;  %6449 = vmatpush1.bf16.msra.mxu0 %v6448_v22  ;;  %v2337_v22 = vld [vmem:[#allocation4 + $0xd0] sm:$0xff] }
 0x27b   :  { %6043 = vmatmul.mubr.msk.f32.gmra.mrb[4].mxu0 %vm358_vm1, %v8215_v19  ;;  %v7592_v19 = vld [vmem:[%s10038_s0 + $0x8] sm:$0xff] }
 0x27c   :  { %1623 = vmatprep.mubr.f32.mxu0 %v10053_v0 }
 0x27f   :  { %6044 = vmatmul.mubr.msk.f32.gmra.mrb[6].mxu0 %vm358_vm1, %v8222_v26  ;;  %v1800_v26 = vrot.slane %v7592_v19, 2  ;;  %v8916_v19 = vpack.c.bf16 %v2337_v22, %v2335_v21  ;;  %v7604_v22 = vld [vmem:[%s10038_s0 + $0x68] sm:$0xff] }
 0x280   :  { %1629 = vmatprep.mubr.f32.mxu0 %v10053_v0 }
 0x281   :  { %10120 = vst [vmem:[#allocation42_spill] sm:$0xff] %v8916_v19 }
 0x283   :  { %6045 = vmatmul.mubr.msk.f32.gmra.mrb[8].mxu0 %vm358_vm1, %v8231_v33  ;;  %v2312_v33 = vld [vmem:[#allocation4 + $0x8] sm:$0xff] }
 0x284   :  { %1635 = vmatprep.mubr.f32.mxu0 %v10053_v0 }
 0x287   :  { %6046 = vmatmul.mubr.msk.f32.gmra.mrb[10].mxu0 %vm358_vm1, %v8240_v38  ;;  %v2314_v38 = vld [vmem:[#allocation4 + $0x18] sm:$0xff] }
 0x288   :  { %1641 = vmatprep.mubr.f32.mxu0 %v10053_v0 }
 0x28b   :  { %6047 = vmatmul.mubr.msk.f32.gmra.mrb[12].mxu0 %vm358_vm1, %v8249_v43  ;;  %v2311_v43 = vld [vmem:[#allocation4] sm:$0xff] }
 0x28c   :  { %1647 = vmatprep.mubr.f32.mxu0 %v10053_v0 }
 0x28f   :  { %6048 = vmatmul.mubr.msk.f32.gmra.mrb[14].mxu0 %vm358_vm1, %v8258_v47  ;;  %v1801_v47 = vsel %vm1798_vm4, %v1799_v13, %v1800_v26  ;;  %v2342_v13 = vld [vmem:[#allocation4 + $0xf8] sm:$0xff] }
 0x290   :  { %1653 = vmatprep.mubr.f32.mxu0 %v10053_v0 }
 0x293   :  { %6049 = vmatmul.mubr.msk.f32.gmra.mrb[16].mxu0 %vm358_vm1, %v8267_v50  ;;  %v7593_v50 = vld [vmem:[%s10038_s0 + $0x10] sm:$0xff] }
 0x294   :  { %1659 = vmatprep.mubr.f32.mxu0 %v10053_v0 }
 0x297   :  { %6050 = vmatmul.mubr.msk.f32.gmra.mrb[18].mxu0 %vm358_vm1, %v8276_v53  ;;  %v1802_v53 = vrot.slane %v7593_v50, 2  ;;  %v2341_v50 = vld [vmem:[#allocation4 + $0xf0] sm:$0xff] }
 0x298   :  { %1665 = vmatprep.mubr.f32.mxu0 %v10053_v0 }
 0x29b   :  { %6051 = vmatmul.mubr.msk.f32.gmra.mrb[20].mxu0 %vm358_vm1, %v8285_v56  ;;  %v8847_v56 = vpack.c.bf16 %v2314_v38, %v2312_v33  ;;  %v7599_v33 = vld [vmem:[%s10038_s0 + $0x40] sm:$0xff] }
 0x29c   :  { %1671 = vmatprep.mubr.f32.mxu0 %v10053_v0  ;;  %v1814_v38 = vrot.slane %v7599_v33, 2  ;;  %v2361_v33 = vld [vmem:[#allocation4 + $0x190] sm:$0xff] }
 0x29d   :  { %10107 = vst [vmem:[#allocation29_spill] sm:$0xff] %v8847_v56  ;;  %6451 = vmatprep.subr.bf16.mxu1 %v8847_v56 }
 0x29f   :  { %6052 = vmatmul.mubr.msk.f32.gmra.mrb[22].mxu0 %vm358_vm1, %v8294_v59  ;;  %v2313_v59 = vld [vmem:[#allocation4 + $0x10] sm:$0xff] }
 0x2a0   :  { %1677 = vmatprep.mubr.f32.mxu0 %v10053_v0 }
 0x2a3   :  { %6053 = vmatmul.mubr.msk.f32.gmra.mrb[24].mxu0 %vm358_vm1, %v8303_v62  ;;  %v2316_v62 = vld [vmem:[#allocation4 + $0x28] sm:$0xff] }
 0x2a4   :  { %1683 = vmatprep.mubr.f32.mxu0 %v10053_v0 }
 0x2a7   :  { %6054 = vmatmul.mubr.msk.f32.gmra.mrb[26].mxu0 %vm358_vm1, %v8312_v2  ;;  %v2318_v2 = vld [vmem:[#allocation4 + $0x38] sm:$0xff] }
 0x2a8   :  { %1689 = vmatprep.mubr.f32.mxu0 %v10053_v0 }
 0x2ab   :  { %6055 = vmatmul.mubr.msk.f32.gmra.mrb[28].mxu0 %vm358_vm1, %v8321_v5  ;;  %v8849_v5 = vpack.c.bf16 %v2313_v59, %v2311_v43  ;;  %v8924_v43 = vpack.c.bf16 %v2342_v13, %v2340_v12  ;;  %v2346_v59 = vld [vmem:[#allocation4 + $0x118] sm:$0xff]  ;;  %v1824_v12 = vrot.slane %v7604_v22, 2 }
 0x2ac   :  { %1695 = vmatprep.mubr.f32.mxu0 %v10053_v0 }
 0x2ad   :  { %10108 = vst [vmem:[#allocation30_spill] sm:$0xff] %v8849_v5  ;;  %6453 = vmatpush1.bf16.msra.mxu1 %v8849_v5  ;;  %10121 = vst [vmem:[#allocation43_spill] sm:$0xff] %v8924_v43 }
 0x2af   :  { %6056 = vmatmul.mubr.msk.f32.gmra.mrb[30].mxu0 %vm358_vm1, %v8330_v8  ;;  %v8851_v8 = vpack.c.bf16 %v2318_v2, %v2316_v62  ;;  %v1815_v2 = vsel %vm1798_vm4, %v1812_v17, %v1814_v38 }
 0x2b0   :  { %1701 = vmatprep.mubr.f32.mxu0 %v10053_v0 }
 0x2b1   :  { %10109 = vst [vmem:[#allocation31_spill] sm:$0xff] %v8851_v8  ;;  %6455 = vmatprep.subr.bf16.mxu1 %v8851_v8 }
 0x2b3   :  { %6057 = vmatmul.mubr.msk.f32.gmra.mrb[32].mxu0 %vm358_vm1, %v8339_v11  ;;  %v2315_v11 = vld [vmem:[#allocation4 + $0x20] sm:$0xff] }
 0x2b4   :  { %1707 = vmatprep.mubr.f32.mxu0 %v10053_v0 }
 0x2b7   :  { %6058 = vmatmul.mubr.msk.f32.gmra.mrb[34].mxu0 %vm358_vm1, %v8348_v16  ;;  %v2317_v16 = vld [vmem:[#allocation4 + $0x30] sm:$0xff] }
 0x2b8   :  { %1713 = vmatprep.mubr.f32.mxu0 %v10053_v0 }
 0x2bb   :  { %6059 = vmatmul.mubr.msk.f32.gmra.mrb[36].mxu0 %vm358_vm1, %v8357_v20  ;;  %v2320_v20 = vld [vmem:[#allocation4 + $0x48] sm:$0xff] }
 0x2bc   :  { %1719 = vmatprep.mubr.f32.mxu0 %v10053_v0 }
 0x2bf   :  { %6060 = vmatmul.mubr.msk.f32.gmra.mrb[38].mxu0 %vm358_vm1, %v8366_v23  ;;  %v2322_v23 = vld [vmem:[#allocation4 + $0x58] sm:$0xff] }
 0x2c0   :  { %1725 = vmatprep.mubr.f32.mxu0 %v10053_v0 }
 0x2c3   :  { %6061 = vmatmul.mubr.msk.f32.gmra.mrb[40].mxu0 %vm358_vm1, %v8375_v27  ;;  %v8856_v27 = vpack.c.bf16 %v2317_v16, %v2315_v11  ;;  %v7600_v11 = vld [vmem:[%s10038_s0 + $0x48] sm:$0xff] }
 0x2c4   :  { %1731 = vmatprep.mubr.f32.mxu0 %v10053_v0  ;;  %v1816_v16 = vrot.slane %v7600_v11, 2 }
 0x2c5   :  { %10110 = vst [vmem:[#allocation32_spill] sm:$0xff] %v8856_v27  ;;  %6457 = vmatpush1.bf16.msra.mxu1 %v8856_v27 }
 0x2c7   :  { %6062 = vmatmul.mubr.msk.f32.gmra.mrb[42].mxu0 %vm358_vm1, %v8384_v30  ;;  %v1803_v30 = vsel %vm1798_vm4, %v1800_v26, %v1802_v53  ;;  %v1813_v26 = vsel %vm1798_vm4, %v1810_v60, %v1812_v17  ;;  %v7603_v60 = vld [vmem:[%s10038_s0 + $0x60] sm:$0xff]  ;;  %v8976_v17 = vpack.c.bf16 %v2357_v7, %v2355_v6  ;;  %v7609_v6 = vld [vmem:[%s10038_s0 + $0x90] sm:$0xff] }
 0x2c8   :  { %1737 = vmatprep.mubr.f32.mxu0 %v10053_v0  ;;  %v1822_v1 = vrot.slane %v7603_v60, 2  ;;  %v1834_v7 = vrot.slane %v7609_v6, 2 }
 0x2c9   :  { %10130 = vst [vmem:[#allocation52_spill] sm:$0xff] %v8976_v17 }
 0x2cb   :  { %6063 = vmatmul.mubr.msk.f32.gmra.mrb[44].mxu0 %vm358_vm1, %v8393_v34  ;;  %v7594_v34 = vld [vmem:[%s10038_s0 + $0x18] sm:$0xff] }
 0x2cc   :  { %1743 = vmatprep.mubr.f32.mxu0 %v10053_v0 }
 0x2cf   :  { %6064 = vmatmul.mubr.msk.f32.gmra.mrb[46].mxu0 %vm358_vm1, %v8402_v37  ;;  %v1804_v37 = vrot.slane %v7594_v34, 2  ;;  %v2348_v34 = vld [vmem:[#allocation4 + $0x128] sm:$0xff] }
 0x2d0   :  { %1749 = vmatprep.mubr.f32.mxu0 %v10053_v0 }
 0x2d3   :  { %6065 = vmatmul.mubr.msk.f32.gmra.mrb[48].mxu0 %vm358_vm1, %v8411_v41  ;;  %v8864_v41 = vpack.c.bf16 %v2322_v23, %v2320_v20  ;;  %v2343_v23 = vld [vmem:[#allocation4 + $0x100] sm:$0xff] }
 0x2d4   :  { %1755 = vmatprep.mubr.f32.mxu0 %v10053_v0 }
 0x2d5   :  { %10111 = vst [vmem:[#allocation33_spill] sm:$0xff] %v8864_v41  ;;  %6459 = vmatprep.subr.bf16.mxu1 %v8864_v41 }
 0x2d7   :  { %6066 = vmatmul.mubr.msk.f32.gmra.mrb[50].mxu0 %vm358_vm1, %v8420_v45  ;;  %v2319_v45 = vld [vmem:[#allocation4 + $0x40] sm:$0xff] }
 0x2d8   :  { %1761 = vmatprep.mubr.f32.mxu0 %v10053_v0 }
 0x2db   :  { %6067 = vmatmul.mubr.msk.f32.gmra.mrb[52].mxu0 %vm358_vm1, %v8429_v49  ;;  %v2321_v49 = vld [vmem:[#allocation4 + $0x50] sm:$0xff] }
 0x2dc   :  { %1767 = vmatprep.mubr.f32.mxu0 %v10053_v0 }
 0x2df   :  { %6068 = vmatmul.mubr.msk.f32.gmra.mrb[54].mxu0 %vm358_vm1, %v8438_v54  ;;  %v2324_v54 = vld [vmem:[#allocation4 + $0x68] sm:$0xff] }
 0x2e0   :  { %1773 = vmatprep.mubr.f32.mxu0 %v10053_v0 }
 0x2e3   :  { %6069 = vmatmul.mubr.msk.f32.gmra.mrb[56].mxu0 %vm358_vm1, %v8447_v58  ;;  %v2326_v58 = vld [vmem:[#allocation4 + $0x78] sm:$0xff] }
 0x2e4   :  { %1779 = vmatprep.mubr.f32.mxu0 %v10053_v0  ;;  %v8876_v25 = vpack.c.bf16 %v2326_v58, %v2324_v54  ;;  %v7601_v54 = vld [vmem:[%s10038_s0 + $0x50] sm:$0xff] }
 0x2e5   :  { %v1818_v58 = vrot.slane %v7601_v54, 2  ;;  %v7606_v54 = vld [vmem:[%s10038_s0 + $0x78] sm:$0xff] }
 0x2e6   :  { %10113 = vst [vmem:[#allocation35_spill] sm:$0xff] %v8876_v25 }
 0x2e7   :  { %6070 = vmatmul.mubr.msk.f32.gmra.mrb[58].mxu0 %vm358_vm1, %v8456_v63  ;;  %v8868_v63 = vpack.c.bf16 %v2321_v49, %v2319_v45  ;;  %v1817_v49 = vsel %vm1798_vm4, %v1814_v38, %v1816_v16  ;;  %v1819_v32 = vsel %vm1798_vm4, %v1816_v16, %v1818_v58  ;;  %v2364_v38 = vld [vmem:[#allocation4 + $0x1a8] sm:$0xff]  ;;  %v2363_v16 = vld [vmem:[#allocation4 + $0x1a0] sm:$0xff] }
 0x2e8   :  { %1785 = vmatprep.mubr.f32.mxu0 %v10053_v0 }
 0x2e9   :  { %10112 = vst [vmem:[#allocation34_spill] sm:$0xff] %v8868_v63  ;;  %6461 = vmatpush1.bf16.msra.mxu1 %v8868_v63 }
 0x2ea   :  { %6463 = vmatprep.subr.bf16.mxu1 %v8876_v25 }
 0x2eb   :  { %6071 = vmatmul.mubr.msk.f32.gmra.mrb[60].mxu0 %vm358_vm1, %v8465_v4  ;;  %v1805_v4 = vsel %vm1798_vm4, %v1802_v53, %v1804_v37  ;;  %v2344_v53 = vld [vmem:[#allocation4 + $0x108] sm:$0xff] }
 0x2ec   :  { %1791 = vmatprep.mubr.f32.mxu0 %v10053_v0  ;;  %v8936_v20 = vpack.c.bf16 %v2346_v59, %v2344_v53  ;;  %v1825_v53 = vsel %vm1798_vm4, %v1822_v1, %v1824_v12  ;;  %v7605_v59 = vld [vmem:[%s10038_s0 + $0x70] sm:$0xff] }
 0x2ed   :  { %6465 = vmatpush1.bf16.msra.mxu1 %v8880_v35 }
 0x2ee   :  { %6467 = vmatprep.subr.bf16.mxu1 %v8888_v42  ;;  %10123 = vst [vmem:[#allocation45_spill] sm:$0xff] %v8936_v20 }
 0x2ef   :  { %6072 = vmatmul.mubr.msk.f32.gmra.mrb[62].mxu0 %vm358_vm1, %v8474_v9  ;;  %v7595_v9 = vld [vmem:[%s10038_s0 + $0x20] sm:$0xff] }
 0x2f0   :  { %1990 = vmatprep.mubr.f32.mxu0 %v10053_v0  ;;  %v1806_v24 = vrot.slane %v7595_v9, 2  ;;  %v2347_v9 = vld [vmem:[#allocation4 + $0x120] sm:$0xff] }
 0x2f1   :  { %6469 = vmatpush1.bf16.msra.mxu1 %v8892_v52 }
 0x2f2   :  { %v1807_v36 = vsel %vm1798_vm4, %v1804_v37, %v1806_v24  ;;  %v1809_v55 = vsel %vm1798_vm4, %v1806_v24, %v1808_v40  ;;  %6471 = vmatprep.subr.bf16.mxu1 %v8900_v61  ;;  %v2350_v37 = vld [vmem:[#allocation4 + $0x138] sm:$0xff]  ;;  %v2349_v24 = vld [vmem:[#allocation4 + $0x130] sm:$0xff]  ;;  %v8960_v40 = vpack.c.bf16 %v2354_v29, %v2352_v28  ;;  %v2372_v29 = vld [vmem:[#allocation4 + $0x1e8] sm:$0xff] }
 0x2f3   :  { %6073 = vmatmul.mubr.msk.f32.vlgmr.msra.gmra.mrb[0].mxu0 %vm358_vm1, %v1801_v47  ;;  %v2339_v47 = vld [vmem:[#allocation4 + $0xe0] sm:$0xff]  ;;  %v8952_v31 = vpack.c.bf16 %v2349_v24, %v2347_v9  ;;  %v2369_v28 = vld [vmem:[#allocation4 + $0x1d0] sm:$0xff] }
 0x2f4   :  { %1996 = vmatprep.mubr.f32.mxu0 %v10053_v0  ;;  %v8928_v62 = vpack.c.bf16 %v2341_v50, %v2339_v47  ;;  %10127 = vst [vmem:[#allocation49_spill] sm:$0xff] %v8960_v40  ;;  %v2366_v47 = vld [vmem:[#allocation4 + $0x1b8] sm:$0xff]  ;;  %v2367_v24 = vld [vmem:[#allocation4 + $0x1c0] sm:$0xff] }
 0x2f5   :  { %6473 = vmatpush1.bf16.msra.mxu1 %v8904_v10  ;;  %10126 = vst [vmem:[#allocation48_spill] sm:$0xff] %v8952_v31  ;;  %v8996_v11 = vpack.c.bf16 %v2366_v47, %v2364_v38  ;;  %v7612_v38 = vld [vmem:[%s10038_s0 + $0xa8] sm:$0xff] }
 0x2f6   :  { %6475 = vmatprep.subr.bf16.mxu1 %v8912_v18  ;;  %10122 = vst [vmem:[#allocation44_spill] sm:$0xff] %v8928_v62  ;;  %v1840_v47 = vrot.slane %v7612_v38, 2 }
 0x2f7   :  { %6074 = vmatmul.mubr.msk.f32.gmra.mrb[2].mxu0 %vm358_vm1, %v1803_v30  ;;  %v2345_v30 = vld [vmem:[#allocation4 + $0x110] sm:$0xff]  ;;  %10133 = vst [vmem:[#allocation55_spill] sm:$0xff] %v8996_v11 }
 0x2f8   :  { %2002 = vmatprep.mubr.f32.mxu0 %v10053_v0  ;;  %v8940_v45 = vpack.c.bf16 %v2345_v30, %v2343_v23  ;;  %v2365_v23 = vld [vmem:[#allocation4 + $0x1b0] sm:$0xff]  ;;  %v2368_v30 = vld [vmem:[#allocation4 + $0x1c8] sm:$0xff] }
 0x2f9   :  { %6477 = vmatpush1.bf16.msra.mxu1 %v8916_v19 }
 0x2fa   :  { %6479 = vmatprep.subr.bf16.mxu1 %v8924_v43  ;;  %10124 = vst [vmem:[#allocation46_spill] sm:$0xff] %v8940_v45 }
 0x2fb   :  { %6075 = vmatmul.mubr.msk.f32.gmra.mrb[4].mxu0 %vm358_vm1, %v1805_v4  ;;  %v8948_v4 = vpack.c.bf16 %v2350_v37, %v2348_v34  ;;  %v2370_v34 = vld [vmem:[#allocation4 + $0x1d8] sm:$0xff]  ;;  %v9000_v37 = vpack.c.bf16 %v2365_v23, %v2363_v16  ;;  %v2371_v16 = vld [vmem:[#allocation4 + $0x1e0] sm:$0xff]  ;;  %v2373_v23 = vld [vmem:[#allocation4 + $0x1f0] sm:$0xff] }
 0x2fc   :  { %2008 = vmatprep.mubr.f32.mxu0 %v10053_v0  ;;  %v9008_v9 = vpack.c.bf16 %v2370_v34, %v2368_v30  ;;  %v7614_v34 = vld [vmem:[%s10038_s0 + $0xb8] sm:$0xff] }
 0x2fd   :  { %6481 = vmatpush1.bf16.msra.mxu1 %v8928_v62  ;;  %10125 = vst [vmem:[#allocation47_spill] sm:$0xff] %v8948_v4  ;;  %10134 = vst [vmem:[#allocation56_spill] sm:$0xff] %v9000_v37 }
 0x2fe   :  { %6483 = vmatprep.subr.bf16.mxu1 %v8936_v20  ;;  %10135 = vst [vmem:[#allocation57_spill] sm:$0xff] %v9008_v9 }
 0x2ff   :  { %6076 = vmatmul.mubr.msk.f32.gmra.mrb[6].mxu0 %vm358_vm1, %v1807_v36  ;;  %v7602_v36 = vld [vmem:[%s10038_s0 + $0x58] sm:$0xff] }
 0x300   :  { %2014 = vmatprep.mubr.f32.mxu0 %v10053_v0  ;;  %v1820_v39 = vrot.slane %v7602_v36, 2  ;;  %v9012_v36 = vpack.c.bf16 %v2369_v28, %v2367_v24  ;;  %v7615_v24 = vld [vmem:[%s10038_s0 + $0xc0] sm:$0xff] }
 0x301   :  { %6485 = vmatpush1.bf16.msra.mxu1 %v8940_v45  ;;  %v1846_v28 = vrot.slane %v7615_v24, 2 }
 0x302   :  { %6487 = vmatprep.subr.bf16.mxu1 %v8948_v4  ;;  %v1821_v57 = vsel %vm1798_vm4, %v1818_v58, %v1820_v39  ;;  %v1823_v21 = vsel %vm1798_vm4, %v1820_v39, %v1822_v1  ;;  %v1828_v58 = vrot.slane %v7606_v54, 2  ;;  %10136 = vst [vmem:[#allocation58_spill] sm:$0xff] %v9012_v36  ;;  %v9066_v54 = vpack.c.bf16 %v2373_v23, %v2371_v16 }
 0x303   :  { %6077 = vmatmul.mubr.msk.f32.gmra.mrb[8].mxu0 %vm358_vm1, %v1809_v55  ;;  %v8964_v55 = vpack.c.bf16 %v2353_v46, %v2351_v44  ;;  %v7607_v44 = vld [vmem:[%s10038_s0 + $0x80] sm:$0xff] }
 0x304   :  { %2020 = vmatprep.mubr.f32.mxu0 %v10053_v0  ;;  %v1830_v46 = vrot.slane %v7607_v44, 2  ;;  %10138 = vst [vmem:[#allocation60_spill] sm:$0xff] %v9066_v54 }
 0x305   :  { %6489 = vmatpush1.bf16.msra.mxu1 %v8952_v31  ;;  %10128 = vst [vmem:[#allocation50_spill] sm:$0xff] %v8964_v55 }
 0x306   :  { %6491 = vmatprep.subr.bf16.mxu1 %v8960_v40  ;;  %v1831_v51 = vsel %vm1798_vm4, %v1828_v58, %v1830_v46 }
 0x307   :  { %6078 = vmatmul.mubr.msk.f32.gmra.mrb[10].mxu0 %vm358_vm1, %v1811_v14  ;;  %v2360_v14 = vld [vmem:[#allocation4 + $0x188] sm:$0xff] }
 0x308   :  { %2026 = vmatprep.mubr.f32.mxu0 %v10053_v0  ;;  %v8984_v13 = vpack.c.bf16 %v2362_v15, %v2360_v14  ;;  %v7610_v15 = vld [vmem:[%s10038_s0 + $0x98] sm:$0xff] }
 0x309   :  { %6493 = vmatpush1.bf16.msra.mxu1 %v8964_v55 }
 0x30a   :  { %6495 = vmatprep.subr.bf16.mxu1 %v8972_v3  ;;  %10131 = vst [vmem:[#allocation53_spill] sm:$0xff] %v8984_v13 }
 0x30b   :  { %6079 = vmatmul.mubr.msk.f32.gmra.mrb[12].mxu0 %vm358_vm1, %v1813_v26  ;;  %v2359_v26 = vld [vmem:[#allocation4 + $0x180] sm:$0xff] }
 0x30c   :  { %2032 = vmatprep.mubr.f32.mxu0 %v10053_v0  ;;  %v8988_v50 = vpack.c.bf16 %v2361_v33, %v2359_v26 }
 0x30d   :  { %6497 = vmatpush1.bf16.msra.mxu1 %v8976_v17 }
 0x30e   :  { %10132 = vst [vmem:[#allocation54_spill] sm:$0xff] %v8988_v50  ;;  %6499 = vmatprep.subr.bf16.mxu1 %v8984_v13 }
 0x30f   :  { %6080 = vmatmul.mubr.msk.f32.gmra.mrb[14].mxu0 %vm358_vm1, %v1815_v2  ;;  %v1826_v2 = vrot.slane %v7605_v59, 2  ;;  %v7613_v59 = vld [vmem:[%s10038_s0 + $0xb0] sm:$0xff] }
 0x310   :  { %2038 = vmatprep.mubr.f32.mxu0 %v10053_v0 }
 0x311   :  { %6501 = vmatpush1.bf16.msra.mxu1 %v8988_v50  ;;  %v1829_v39 = vsel %vm1798_vm4, %v1826_v2, %v1828_v58 }
 0x312   :  { %6503 = vmatprep.subr.bf16.mxu1 %v8996_v11 }
 0x313   :  { %6081 = vmatmul.mubr.msk.f32.gmra.mrb[16].mxu0 %vm358_vm1, %v1817_v49  ;;  %v1827_v49 = vsel %vm1798_vm4, %v1824_v12, %v1826_v2  ;;  %v7611_v12 = vld [vmem:[%s10038_s0 + $0xa0] sm:$0xff]  ;;  %v1842_v2 = vrot.slane %v7613_v59, 2 }
 0x314   :  { %2044 = vmatprep.mubr.f32.mxu0 %v10053_v0  ;;  %v1838_v26 = vrot.slane %v7611_v12, 2 }
 0x315   :  { %6505 = vmatpush1.bf16.msra.mxu1 %v9000_v37  ;;  %v1843_v30 = vsel %vm1798_vm4, %v1840_v47, %v1842_v2 }
 0x316   :  { %6507 = vmatprep.subr.bf16.mxu1 %v9008_v9 }
 0x317   :  { %6082 = vmatmul.mubr.msk.f32.gmra.mrb[18].mxu0 %vm358_vm1, %v1819_v32  ;;  %v2374_v32 = vld [vmem:[#allocation4 + $0x1f8] sm:$0xff] }
 0x318   :  { %2050 = vmatprep.mubr.f32.mxu0 %v10053_v0  ;;  %v9020_v48 = vpack.c.bf16 %v2374_v32, %v2372_v29  ;;  %v7616_v32 = vld [vmem:[%s10038_s0 + $0xc8] sm:$0xff] }
 0x319   :  { %6509 = vmatpush1.bf16.msra.mxu1 %v9012_v36 }
 0x31a   :  { %10137 = vst [vmem:[#allocation59_spill] sm:$0xff] %v9020_v48  ;;  %6511 = vmatprep.subr.bf16.mxu1 %v9020_v48 }
 0x31b   :  { %6083 = vmatmul.mubr.msk.f32.gmra.mrb[20].mxu0 %vm358_vm1, %v1821_v57  ;;  %v7608_v57 = vld [vmem:[%s10038_s0 + $0x88] sm:$0xff] }
 0x31c   :  { %2056 = vmatprep.mubr.f32.mxu0 %v10053_v0  ;;  %v1832_v60 = vrot.slane %v7608_v57, 2 }
 0x31d   :  { %6513 = vmatpush1.bf16.msra.mxu1 %v9066_v54 }
 0x31e   :  { %v1833_v1 = vsel %vm1798_vm4, %v1830_v46, %v1832_v60  ;;  %v1835_v14 = vsel %vm1798_vm4, %v1832_v60, %v1834_v7  ;;  %v7617_v46 = vld [vmem:[%s10038_s0 + $0xd0] sm:$0xff]  ;;  %v7618_v60 = vld [vmem:[%s10038_s0 + $0xd8] sm:$0xff] }
 0x31f   :  { %6084 = vmatmul.mubr.msk.f32.gmra.mrb[22].mxu0 %vm358_vm1, %v1823_v21  ;;  %v1836_v21 = vrot.slane %v7610_v15, 2 }
 0x320   :  { %2062 = vmatprep.mubr.f32.mxu0 %v10053_v0 }
 0x321   :  { %v1837_v22 = vsel %vm1798_vm4, %v1834_v7, %v1836_v21  ;;  %v1839_v33 = vsel %vm1798_vm4, %v1836_v21, %v1838_v26  ;;  %v7619_v7 = vld [vmem:[%s10038_s0 + $0xe0] sm:$0xff]  ;;  %v7620_v21 = vld [vmem:[%s10038_s0 + $0xe8] sm:$0xff] }
 0x323   :  { %6085 = vmatmul.mubr.msk.f32.gmra.mrb[24].mxu0 %vm358_vm1, %v1825_v53  ;;  %v1841_v53 = vsel %vm1798_vm4, %v1838_v26, %v1840_v47  ;;  %v7621_v26 = vld [vmem:[%s10038_s0 + $0xf0] sm:$0xff]  ;;  %v7622_v47 = vld [vmem:[%s10038_s0 + $0xf8] sm:$0xff] }
 0x324   :  { %2068 = vmatprep.mubr.f32.mxu0 %v10053_v0 }
 0x327   :  { %6086 = vmatmul.mubr.msk.f32.gmra.mrb[26].mxu0 %vm358_vm1, %v1827_v49  ;;  %v1844_v49 = vrot.slane %v7614_v34, 2 }
 0x328   :  { %2074 = vmatprep.mubr.f32.mxu0 %v10053_v0 }
 0x329   :  { %v1845_v58 = vsel %vm1798_vm4, %v1842_v2, %v1844_v49  ;;  %v1847_v29 = vsel %vm1798_vm4, %v1844_v49, %v1846_v28 }
 0x32b   :  { %6087 = vmatmul.mubr.msk.f32.gmra.mrb[28].mxu0 %vm358_vm1, %v1829_v39  ;;  %v1848_v39 = vrot.slane %v7616_v32, 2 }
 0x32c   :  { %2080 = vmatprep.mubr.f32.mxu0 %v10053_v0 }
 0x32d   :  { %v1849_v44 = vsel %vm1798_vm4, %v1846_v28, %v1848_v39 }
 0x32f   :  { %6088 = vmatmul.mubr.msk.f32.gmra.mrb[30].mxu0 %vm358_vm1, %v1831_v51  ;;  %v1850_v51 = vrot.slane %v7617_v46, 2 }
 0x330   :  { %2086 = vmatprep.mubr.f32.mxu0 %v10053_v0 }
 0x331   :  { %v1851_v57 = vsel %vm1798_vm4, %v1848_v39, %v1850_v51 }
 0x333   :  { %6089 = vmatmul.mubr.msk.f32.gmra.mrb[32].mxu0 %vm358_vm1, %v1833_v1  ;;  %v1852_v1 = vrot.slane %v7618_v60, 2 }
 0x334   :  { %2092 = vmatprep.mubr.f32.mxu0 %v10053_v0 }
 0x335   :  { %v1853_v6 = vsel %vm1798_vm4, %v1850_v51, %v1852_v1 }
 0x337   :  { %6090 = vmatmul.mubr.msk.f32.gmra.mrb[34].mxu0 %vm358_vm1, %v1835_v14  ;;  %v1854_v14 = vrot.slane %v7619_v7, 2 }
 0x338   :  { %2098 = vmatprep.mubr.f32.mxu0 %v10053_v0 }
 0x339   :  { %v1855_v15 = vsel %vm1798_vm4, %v1852_v1, %v1854_v14 }
 0x33b   :  { %6091 = vmatmul.mubr.msk.f32.gmra.mrb[36].mxu0 %vm358_vm1, %v1837_v22  ;;  %v1856_v22 = vrot.slane %v7620_v21, 2 }
 0x33c   :  { %2104 = vmatprep.mubr.f32.mxu0 %v10053_v0 }
 0x33d   :  { %v1857_v12 = vsel %vm1798_vm4, %v1854_v14, %v1856_v22 }
 0x33f   :  { %6092 = vmatmul.mubr.msk.f32.gmra.mrb[38].mxu0 %vm358_vm1, %v1839_v33  ;;  %v1858_v33 = vrot.slane %v7621_v26, 2 }
 0x340   :  { %2110 = vmatprep.mubr.f32.mxu0 %v10053_v0 }
 0x341   :  { %v1859_v38 = vsel %vm1798_vm4, %v1856_v22, %v1858_v33 }
 0x343   :  { %6093 = vmatmul.mubr.msk.f32.gmra.mrb[40].mxu0 %vm358_vm1, %v1841_v53  ;;  %v1860_v53 = vrot.slane %v7622_v47, 2 }
 0x344   :  { %2116 = vmatprep.mubr.f32.mxu0 %v10053_v0 }
 0x345   :  { %v1861_v59 = vsel %vm1798_vm4, %v1858_v33, %v1860_v53 }
 0x347   :  { %6094 = vmatmul.mubr.msk.f32.gmra.mrb[42].mxu0 %vm358_vm1, %v1843_v30 }
 0x348   :  { %2122 = vmatprep.mubr.f32.mxu0 %v10053_v0 }
 0x34b   :  { %6095 = vmatmul.mubr.msk.f32.gmra.mrb[44].mxu0 %vm358_vm1, %v1845_v58 }
 0x34c   :  { %2128 = vmatprep.mubr.f32.mxu0 %v10053_v0 }
 0x34f   :  { %6096 = vmatmul.mubr.msk.f32.gmra.mrb[46].mxu0 %vm358_vm1, %v1847_v29 }
 0x350   :  { %2134 = vmatprep.mubr.f32.mxu0 %v10053_v0 }
 0x353   :  { %6097 = vmatmul.mubr.msk.f32.gmra.mrb[48].mxu0 %vm358_vm1, %v1849_v44 }
 0x354   :  { %2140 = vmatprep.mubr.f32.mxu0 %v10053_v0 }
 0x357   :  { %6098 = vmatmul.mubr.msk.f32.gmra.mrb[50].mxu0 %vm358_vm1, %v1851_v57 }
 0x358   :  { %2146 = vmatprep.mubr.f32.mxu0 %v10053_v0 }
 0x35b   :  { %6099 = vmatmul.mubr.msk.f32.gmra.mrb[52].mxu0 %vm358_vm1, %v1853_v6 }
 0x35c   :  { %2152 = vmatprep.mubr.f32.mxu0 %v10053_v0 }
 0x35f   :  { %6100 = vmatmul.mubr.msk.f32.gmra.mrb[54].mxu0 %vm358_vm1, %v1855_v15 }
 0x360   :  { %2158 = vmatprep.mubr.f32.mxu0 %v10053_v0 }
 0x363   :  { %6101 = vmatmul.mubr.msk.f32.gmra.mrb[56].mxu0 %vm358_vm1, %v1857_v12 }
 0x364   :  { %2164 = vmatprep.mubr.f32.mxu0 %v10053_v0 }
 0x367   :  { %6102 = vmatmul.mubr.msk.f32.gmra.mrb[58].mxu0 %vm358_vm1, %v1859_v38 }
 0x368   :  { %2170 = vmatprep.mubr.f32.mxu0 %v10053_v0 }
 0x36b   :  { %6103 = vmatmul.mubr.msk.f32.gmra.mrb[60].mxu0 %vm358_vm1, %v1861_v59 }
 0x36c   :  { %2176 = vmatprep.mubr.f32.mxu0 %v10053_v0 }
 0x36f   :  { %6104 = vmatmul.mubr.msk.f32.gmra.mrb[62].mxu0 %vm358_vm1, %v1860_v53 }
 0x3c6   :  { %v9123_v2 = vpop.f32.mrb[0].mxu0 }
 0x3c7   :  { %v9125_v16 = vpop.f32.mrb[1].mxu0 }
 0x3c8   :  { %2439 = vmatprep.mubr.f32.mxu1 %v9125_v16 }
 0x3c9   :  { %2440 = vmatmul.mubr.f32.vlgmr.msra.gmra.mrb[0].mxu1 %v9123_v2 }
 0x3ca   :  { %v9129_v23 = vpop.f32.mrb[2].mxu0 }
 0x3cb   :  { %v9131_v30 = vpop.f32.mrb[3].mxu0 }
 0x3cc   :  { %2445 = vmatprep.mubr.f32.mxu1 %v9131_v30 }
 0x3cd   :  { %2446 = vmatmul.mubr.f32.gmra.mrb[2].mxu1 %v9129_v23 }
 0x3ce   :  { %v9135_v34 = vpop.f32.mrb[4].mxu0 }
 0x3cf   :  { %v9137_v49 = vpop.f32.mrb[5].mxu0 }
 0x3d0   :  { %2451 = vmatprep.mubr.f32.mxu1 %v9137_v49 }
 0x3d1   :  { %2452 = vmatmul.mubr.f32.gmra.mrb[4].mxu1 %v9135_v34 }
 0x3d2   :  { %v9141_v58 = vpop.f32.mrb[6].mxu0 }
 0x3d3   :  { %v9143_v24 = vpop.f32.mrb[7].mxu0 }
 0x3d4   :  { %2457 = vmatprep.mubr.f32.mxu1 %v9143_v24 }
 0x3d5   :  { %2458 = vmatmul.mubr.f32.gmra.mrb[6].mxu1 %v9141_v58 }
 0x3d6   :  { %v9147_v28 = vpop.f32.mrb[8].mxu0 }
 0x3d7   :  { %v9149_v29 = vpop.f32.mrb[9].mxu0 }
 0x3d8   :  { %2463 = vmatprep.mubr.f32.mxu1 %v9149_v29 }
 0x3d9   :  { %2464 = vmatmul.mubr.f32.gmra.mrb[8].mxu1 %v9147_v28 }
 0x3da   :  { %v9153_v32 = vpop.f32.mrb[10].mxu0 }
 0x3db   :  { %v9155_v39 = vpop.f32.mrb[11].mxu0 }
 0x3dc   :  { %2469 = vmatprep.mubr.f32.mxu1 %v9155_v39 }
 0x3dd   :  { %2470 = vmatmul.mubr.f32.gmra.mrb[10].mxu1 %v9153_v32 }
 0x3de   :  { %v9159_v44 = vpop.f32.mrb[12].mxu0 }
 0x3df   :  { %v9161_v46 = vpop.f32.mrb[13].mxu0 }
 0x3e0   :  { %2475 = vmatprep.mubr.f32.mxu1 %v9161_v46 }
 0x3e1   :  { %2476 = vmatmul.mubr.f32.gmra.mrb[12].mxu1 %v9159_v44 }
 0x3e2   :  { %v9165_v51 = vpop.f32.mrb[14].mxu0 }
 0x3e3   :  { %v9167_v57 = vpop.f32.mrb[15].mxu0 }
 0x3e4   :  { %2481 = vmatprep.mubr.f32.mxu1 %v9167_v57 }
 0x3e5   :  { %2482 = vmatmul.mubr.f32.gmra.mrb[14].mxu1 %v9165_v51 }
 0x3e6   :  { %v9171_v60 = vpop.f32.mrb[16].mxu0 }
 0x3e7   :  { %v9173_v1 = vpop.f32.mrb[17].mxu0 }
 0x3e8   :  { %2487 = vmatprep.mubr.f32.mxu1 %v9173_v1 }
 0x3e9   :  { %2488 = vmatmul.mubr.f32.gmra.mrb[16].mxu1 %v9171_v60 }
 0x3ea   :  { %v9177_v6 = vpop.f32.mrb[18].mxu0 }
 0x3eb   :  { %v9179_v7 = vpop.f32.mrb[19].mxu0 }
 0x3ec   :  { %2493 = vmatprep.mubr.f32.mxu1 %v9179_v7 }
 0x3ed   :  { %2494 = vmatmul.mubr.f32.gmra.mrb[18].mxu1 %v9177_v6 }
 0x3ee   :  { %v9183_v14 = vpop.f32.mrb[20].mxu0 }
 0x3ef   :  { %v9185_v15 = vpop.f32.mrb[21].mxu0 }
 0x3f0   :  { %2499 = vmatprep.mubr.f32.mxu1 %v9185_v15 }
 0x3f1   :  { %2500 = vmatmul.mubr.f32.gmra.mrb[20].mxu1 %v9183_v14 }
 0x3f2   :  { %v9189_v21 = vpop.f32.mrb[22].mxu0 }
 0x3f3   :  { %v9191_v22 = vpop.f32.mrb[23].mxu0 }
 0x3f4   :  { %2505 = vmatprep.mubr.f32.mxu1 %v9191_v22 }
 0x3f5   :  { %2506 = vmatmul.mubr.f32.gmra.mrb[22].mxu1 %v9189_v21 }
 0x3f6   :  { %v9195_v12 = vpop.f32.mrb[24].mxu0 }
 0x3f7   :  { %v9197_v26 = vpop.f32.mrb[25].mxu0 }
 0x3f8   :  { %2511 = vmatprep.mubr.f32.mxu1 %v9197_v26 }
 0x3f9   :  { %2512 = vmatmul.mubr.f32.gmra.mrb[24].mxu1 %v9195_v12 }
 0x3fa   :  { %v9201_v33 = vpop.f32.mrb[26].mxu0 }
 0x3fb   :  { %v9203_v38 = vpop.f32.mrb[27].mxu0 }
 0x3fc   :  { %2517 = vmatprep.mubr.f32.mxu1 %v9203_v38 }
 0x3fd   :  { %2518 = vmatmul.mubr.f32.gmra.mrb[26].mxu1 %v9201_v33 }
 0x3fe   :  { %v9207_v47 = vpop.f32.mrb[28].mxu0 }
 0x3ff   :  { %v9209_v53 = vpop.f32.mrb[29].mxu0 }
 0x400   :  { %2523 = vmatprep.mubr.f32.mxu1 %v9209_v53 }
 0x401   :  { %2524 = vmatmul.mubr.f32.gmra.mrb[28].mxu1 %v9207_v47 }
 0x402   :  { %v9213_v59 = vpop.f32.mrb[30].mxu0 }
 0x403   :  { %v9215_v0 = vpop.f32.mrb[31].mxu0 }
 0x404   :  { %2529 = vmatprep.mubr.f32.mxu1 %v9215_v0 }
 0x405   :  { %2530 = vmatmul.mubr.f32.gmra.mrb[30].mxu1 %v9213_v59 }
 0x406   :  { %v9219_v54 = vpop.f32.mrb[32].mxu0 }
 0x407   :  { %v9221_v48 = vpop.f32.mrb[33].mxu0 }
 0x408   :  { %2535 = vmatprep.mubr.f32.mxu1 %v9221_v48 }
 0x409   :  { %2536 = vmatmul.mubr.f32.gmra.mrb[32].mxu1 %v9219_v54 }
 0x40a   :  { %v9225_v36 = vpop.f32.mrb[34].mxu0 }
 0x40b   :  { %v9227_v9 = vpop.f32.mrb[35].mxu0 }
 0x40c   :  { %2541 = vmatprep.mubr.f32.mxu1 %v9227_v9 }
 0x40d   :  { %2542 = vmatmul.mubr.f32.gmra.mrb[34].mxu1 %v9225_v36 }
 0x40e   :  { %v9231_v37 = vpop.f32.mrb[36].mxu0 }
 0x40f   :  { %v9233_v11 = vpop.f32.mrb[37].mxu0 }
 0x410   :  { %2547 = vmatprep.mubr.f32.mxu1 %v9233_v11 }
 0x411   :  { %2548 = vmatmul.mubr.f32.gmra.mrb[36].mxu1 %v9231_v37 }
 0x412   :  { %v9237_v50 = vpop.f32.mrb[38].mxu0 }
 0x413   :  { %v9239_v13 = vpop.f32.mrb[39].mxu0 }
 0x414   :  { %2553 = vmatprep.mubr.f32.mxu1 %v9239_v13 }
 0x415   :  { %2554 = vmatmul.mubr.f32.gmra.mrb[38].mxu1 %v9237_v50 }
 0x416   :  { %v9243_v17 = vpop.f32.mrb[40].mxu0 }
 0x417   :  { %v9245_v3 = vpop.f32.mrb[41].mxu0 }
 0x418   :  { %2559 = vmatprep.mubr.f32.mxu1 %v9245_v3 }
 0x419   :  { %2560 = vmatmul.mubr.f32.gmra.mrb[40].mxu1 %v9243_v17 }
 0x41a   :  { %v9249_v55 = vpop.f32.mrb[42].mxu0 }
 0x41b   :  { %v9251_v40 = vpop.f32.mrb[43].mxu0 }
 0x41c   :  { %2565 = vmatprep.mubr.f32.mxu1 %v9251_v40 }
 0x41d   :  { %2566 = vmatmul.mubr.f32.gmra.mrb[42].mxu1 %v9249_v55 }
 0x41e   :  { %v9255_v31 = vpop.f32.mrb[44].mxu0 }
 0x41f   :  { %10139 = vst [vmem:[#allocation61_spill] sm:$0xff] %v9255_v31  ;;  %v9257_v4 = vpop.f32.mrb[45].mxu0 }
 0x420   :  { %10140 = vst [vmem:[#allocation62_spill] sm:$0xff] %v9257_v4  ;;  %2571 = vmatprep.mubr.f32.mxu1 %v9257_v4 }
 0x421   :  { %2572 = vmatmul.mubr.f32.gmra.mrb[44].mxu1 %v9255_v31 }
 0x422   :  { %v9261_v45 = vpop.f32.mrb[46].mxu0 }
 0x423   :  { %10141 = vst [vmem:[#allocation63_spill] sm:$0xff] %v9261_v45  ;;  %v9263_v20 = vpop.f32.mrb[47].mxu0 }
 0x424   :  { %10142 = vst [vmem:[#allocation64_spill] sm:$0xff] %v9263_v20  ;;  %2577 = vmatprep.mubr.f32.mxu1 %v9263_v20 }
 0x425   :  { %2578 = vmatmul.mubr.f32.gmra.mrb[46].mxu1 %v9261_v45 }
 0x426   :  { %v9267_v62 = vpop.f32.mrb[48].mxu0 }
 0x427   :  { %10143 = vst [vmem:[#allocation65_spill] sm:$0xff] %v9267_v62  ;;  %v9269_v43 = vpop.f32.mrb[49].mxu0 }
 0x428   :  { %10144 = vst [vmem:[#allocation66_spill] sm:$0xff] %v9269_v43  ;;  %2583 = vmatprep.mubr.f32.mxu1 %v9269_v43 }
 0x429   :  { %2584 = vmatmul.mubr.f32.gmra.mrb[48].mxu1 %v9267_v62 }
 0x42a   :  { %v9273_v19 = vpop.f32.mrb[50].mxu0 }
 0x42b   :  { %10145 = vst [vmem:[#allocation67_spill] sm:$0xff] %v9273_v19  ;;  %v9275_v18 = vpop.f32.mrb[51].mxu0 }
 0x42c   :  { %10146 = vst [vmem:[#allocation68_spill] sm:$0xff] %v9275_v18  ;;  %2589 = vmatprep.mubr.f32.mxu1 %v9275_v18 }
 0x42d   :  { %2590 = vmatmul.mubr.f32.gmra.mrb[50].mxu1 %v9273_v19 }
 0x42e   :  { %v9279_v10 = vpop.f32.mrb[52].mxu0 }
 0x42f   :  { %10147 = vst [vmem:[#allocation69_spill] sm:$0xff] %v9279_v10  ;;  %v9281_v61 = vpop.f32.mrb[53].mxu0 }
 0x430   :  { %10148 = vst [vmem:[#allocation70_spill] sm:$0xff] %v9281_v61  ;;  %2595 = vmatprep.mubr.f32.mxu1 %v9281_v61 }
 0x431   :  { %2596 = vmatmul.mubr.f32.gmra.mrb[52].mxu1 %v9279_v10 }
 0x432   :  { %v9285_v52 = vpop.f32.mrb[54].mxu0 }
 0x433   :  { %10149 = vst [vmem:[#allocation71_spill] sm:$0xff] %v9285_v52  ;;  %v9287_v42 = vpop.f32.mrb[55].mxu0 }
 0x434   :  { %10150 = vst [vmem:[#allocation72_spill] sm:$0xff] %v9287_v42  ;;  %2601 = vmatprep.mubr.f32.mxu1 %v9287_v42 }
 0x435   :  { %2602 = vmatmul.mubr.f32.gmra.mrb[54].mxu1 %v9285_v52 }
 0x436   :  { %v9291_v35 = vpop.f32.mrb[56].mxu0 }
 0x437   :  { %10151 = vst [vmem:[#allocation73_spill] sm:$0xff] %v9291_v35  ;;  %v9293_v25 = vpop.f32.mrb[57].mxu0 }
 0x438   :  { %10152 = vst [vmem:[#allocation74_spill] sm:$0xff] %v9293_v25  ;;  %2607 = vmatprep.mubr.f32.mxu1 %v9293_v25 }
 0x439   :  { %2608 = vmatmul.mubr.f32.gmra.mrb[56].mxu1 %v9291_v35 }
 0x43a   :  { %v9297_v63 = vpop.f32.mrb[58].mxu0 }
 0x43b   :  { %10153 = vst [vmem:[#allocation75_spill] sm:$0xff] %v9297_v63  ;;  %v9299_v41 = vpop.f32.mrb[59].mxu0 }
 0x43c   :  { %10154 = vst [vmem:[#allocation76_spill] sm:$0xff] %v9299_v41  ;;  %2613 = vmatprep.mubr.f32.mxu1 %v9299_v41 }
 0x43d   :  { %2614 = vmatmul.mubr.f32.gmra.mrb[58].mxu1 %v9297_v63 }
 0x43e   :  { %v9303_v27 = vpop.f32.mrb[60].mxu0 }
 0x43f   :  { %10155 = vst [vmem:[#allocation77_spill] sm:$0xff] %v9303_v27  ;;  %v9305_v8 = vpop.f32.mrb[61].mxu0 }
 0x440   :  { %10156 = vst [vmem:[#allocation78_spill] sm:$0xff] %v9305_v8  ;;  %2619 = vmatprep.mubr.f32.mxu1 %v9305_v8 }
 0x441   :  { %2620 = vmatmul.mubr.f32.gmra.mrb[60].mxu1 %v9303_v27 }
 0x442   :  { %v9309_v5 = vpop.f32.mrb[62].mxu0 }
 0x443   :  { %10157 = vst [vmem:[#allocation79_spill] sm:$0xff] %v9309_v5  ;;  %v9311_v56 = vpop.f32.mrb[63].mxu0 }
 0x444   :  { %10158 = vst [vmem:[#allocation80_spill] sm:$0xff] %v9311_v56  ;;  %2625 = vmatprep.mubr.f32.mxu1 %v9311_v56  ;;  %v3015_v56 = vld [vmem:[#allocation6 + $0x8] sm:$0xff] }
 0x445   :  { %2626 = vmatmul.mubr.f32.gmra.mrb[62].mxu1 %v9309_v5 }
 0x446   :  { %6107 = vmatprep.mubr.msk.f32.mxu1 %vm3054_vm5, %v3015_v56 }
 0x49c   :  { %v2441_v25 = vpop.f32.mrb[0].mxu1 }
 0x49d   :  { %v2632_v41 = vmax.f32 %v9123_v2, %v2441_v25  ;;  %v2443_v63 = vpop.f32.mrb[1].mxu1 }
 0x49e   :  { %v2633_v35 = vmax.f32 %v9125_v16, %v2443_v63 }
 0x49f   :  { %v2760_v61 = vrot.slane %v2632_v41, 1 }
 0x4a0   :  { %v2447_v42 = vpop.f32.mrb[2].mxu1  ;;  %v2763_v18 = vrot.slane %v2633_v35, 1 }
 0x4a1   :  { %v2634_v52 = vmax.f32 %v9129_v23, %v2447_v42  ;;  %v2449_v8 = vpop.f32.mrb[3].mxu1 }
 0x4a2   :  { %v2635_v27 = vmax.f32 %v9131_v30, %v2449_v8 }
 0x4a3   :  { %v2761_v10 = vrot.slane %v2634_v52, 1 }
 0x4a4   :  { %v2764_v19 = vrot.slane %v2635_v27, 1  ;;  %v2453_v43 = vpop.f32.mrb[4].mxu1 }
 0x4a5   :  { %v2762_v5 = vsel %vm294_vm0, %v2760_v61, %v2761_v10  ;;  %v2636_v25 = vmax.f32 %v9135_v34, %v2453_v43  ;;  %v2455_v2 = vpop.f32.mrb[5].mxu1 }
 0x4a6   :  { %v2950_v63 = vmax.f32 %v2632_v41, %v2762_v5  ;;  %v2637_v42 = vmax.f32 %v9137_v49, %v2455_v2  ;;  %v2765_v16 = vsel %vm294_vm0, %v2763_v18, %v2764_v19 }
 0x4a7   :  { %v2766_v8 = vrot.slane %v2636_v25, 1  ;;  %v2951_v23 = vmax.f32 %v2633_v35, %v2765_v16 }
 0x4a8   :  { %v2768_v30 = vrot.slane %v2637_v42, 1  ;;  %v2459_v62 = vpop.f32.mrb[6].mxu1 }
 0x4a9   :  { %v2767_v20 = vsel %vm294_vm0, %v2761_v10, %v2766_v8  ;;  %v2638_v45 = vmax.f32 %v9141_v58, %v2459_v62  ;;  %v2461_v4 = vpop.f32.mrb[7].mxu1 }
 0x4aa   :  { %v2952_v61 = vmax.f32 %v2634_v52, %v2767_v20  ;;  %v2639_v43 = vmax.f32 %v9143_v24, %v2461_v4  ;;  %v2769_v34 = vsel %vm294_vm0, %v2764_v19, %v2768_v30 }
 0x4ab   :  { %v2770_v56 = vrot.slane %v2638_v45, 1  ;;  %v2953_v5 = vmax.f32 %v2635_v27, %v2769_v34 }
 0x4ac   :  { %v2772_v41 = vrot.slane %v2639_v43, 1  ;;  %v2465_v49 = vpop.f32.mrb[8].mxu1  ;;  %v6516_v2 = vpack.c.bf16 %v2952_v61, %v2950_v63 }
 0x4ad   :  { %v2771_v18 = vsel %vm294_vm0, %v2766_v8, %v2770_v56  ;;  %v2640_v35 = vmax.f32 %v9147_v28, %v2465_v49  ;;  %v2467_v16 = vpop.f32.mrb[9].mxu1  ;;  %v6514_v31 = vpack.c.bf16 %v2953_v5, %v2951_v23 }
 0x4ae   :  { %v2954_v10 = vmax.f32 %v2636_v25, %v2771_v18  ;;  %v2641_v62 = vmax.f32 %v9149_v29, %v2467_v16  ;;  %v2773_v52 = vsel %vm294_vm0, %v2768_v30, %v2772_v41 }
 0x4af   :  { %v2774_v20 = vrot.slane %v2640_v35, 1  ;;  %6515 = vmatprep.subr.bf16.mxu1 %v6514_v31  ;;  %v2955_v4 = vmax.f32 %v2637_v42, %v2773_v52 }
 0x4b0   :  { %v2776_v19 = vrot.slane %v2641_v62, 1  ;;  %v2471_v58 = vpop.f32.mrb[10].mxu1  ;;  %6517 = vmatpush1.bf16.msra.mxu1 %v6516_v2 }
 0x4b1   :  { %v2775_v27 = vsel %vm294_vm0, %v2770_v56, %v2774_v20  ;;  %v2642_v24 = vmax.f32 %v9153_v32, %v2471_v58  ;;  %v2473_v63 = vpop.f32.mrb[11].mxu1 }
 0x4b2   :  { %v2956_v8 = vmax.f32 %v2638_v45, %v2775_v27  ;;  %v2643_v28 = vmax.f32 %v9155_v39, %v2473_v63  ;;  %v2777_v25 = vsel %vm294_vm0, %v2772_v41, %v2776_v19 }
 0x4b3   :  { %v2778_v23 = vrot.slane %v2642_v24, 1  ;;  %v2957_v29 = vmax.f32 %v2639_v43, %v2777_v25 }
 0x4b4   :  { %v2780_v61 = vrot.slane %v2643_v28, 1  ;;  %v2477_v30 = vpop.f32.mrb[12].mxu1  ;;  %v6520_v34 = vpack.c.bf16 %v2956_v8, %v2954_v10 }
 0x4b5   :  { %v2779_v31 = vsel %vm294_vm0, %v2774_v20, %v2778_v23  ;;  %v2644_v42 = vmax.f32 %v9159_v44, %v2477_v30  ;;  %v2479_v5 = vpop.f32.mrb[13].mxu1  ;;  %v6518_v49 = vpack.c.bf16 %v2957_v29, %v2955_v4 }
 0x4b6   :  { %v2958_v56 = vmax.f32 %v2640_v35, %v2779_v31  ;;  %v2645_v32 = vmax.f32 %v9161_v46, %v2479_v5  ;;  %v2781_v45 = vsel %vm294_vm0, %v2776_v19, %v2780_v61 }
 0x4b7   :  { %v2782_v2 = vrot.slane %v2644_v42, 1  ;;  %6519 = vmatprep.subr.bf16.mxu1 %v6518_v49  ;;  %v2959_v39 = vmax.f32 %v2641_v62, %v2781_v45 }
 0x4b8   :  { %v2784_v41 = vrot.slane %v2645_v32, 1  ;;  %v2483_v18 = vpop.f32.mrb[14].mxu1  ;;  %6521 = vmatpush1.bf16.msra.mxu1 %v6520_v34 }
 0x4b9   :  { %v2783_v43 = vsel %vm294_vm0, %v2778_v23, %v2782_v2  ;;  %v2646_v16 = vmax.f32 %v9165_v51, %v2483_v18  ;;  %v2485_v10 = vpop.f32.mrb[15].mxu1 }
 0x4ba   :  { %v2960_v52 = vmax.f32 %v2642_v24, %v2783_v43  ;;  %v2647_v44 = vmax.f32 %v9167_v57, %v2485_v10  ;;  %v2785_v35 = vsel %vm294_vm0, %v2780_v61, %v2784_v41 }
 0x4bb   :  { %v2786_v20 = vrot.slane %v2646_v16, 1  ;;  %v2961_v46 = vmax.f32 %v2643_v28, %v2785_v35 }
 0x4bc   :  { %v2788_v4 = vrot.slane %v2647_v44, 1  ;;  %v2489_v19 = vpop.f32.mrb[16].mxu1  ;;  %v6524_v58 = vpack.c.bf16 %v2960_v52, %v2958_v56 }
 0x4bd   :  { %v2787_v62 = vsel %vm294_vm0, %v2782_v2, %v2786_v20  ;;  %v2648_v27 = vmax.f32 %v9171_v60, %v2489_v19  ;;  %v2491_v63 = vpop.f32.mrb[17].mxu1  ;;  %v6522_v8 = vpack.c.bf16 %v2961_v46, %v2959_v39 }
 0x4be   :  { %v2962_v25 = vmax.f32 %v2644_v42, %v2787_v62  ;;  %v2649_v51 = vmax.f32 %v9173_v1, %v2491_v63  ;;  %v2789_v24 = vsel %vm294_vm0, %v2784_v41, %v2788_v4 }
 0x4bf   :  { %v2790_v23 = vrot.slane %v2648_v27, 1  ;;  %6523 = vmatprep.subr.bf16.mxu1 %v6522_v8  ;;  %v2963_v57 = vmax.f32 %v2645_v32, %v2789_v24 }
 0x4c0   :  { %v2792_v29 = vrot.slane %v2649_v51, 1  ;;  %v2495_v61 = vpop.f32.mrb[18].mxu1  ;;  %6525 = vmatpush1.bf16.msra.mxu1 %v6524_v58 }
 0x4c1   :  { %v2791_v28 = vsel %vm294_vm0, %v2786_v20, %v2790_v23  ;;  %v2650_v30 = vmax.f32 %v9177_v6, %v2495_v61  ;;  %v2497_v34 = vpop.f32.mrb[19].mxu1 }
 0x4c2   :  { %v2964_v31 = vmax.f32 %v2646_v16, %v2791_v28  ;;  %v2651_v60 = vmax.f32 %v9179_v7, %v2497_v34  ;;  %v2793_v42 = vsel %vm294_vm0, %v2788_v4, %v2792_v29 }
 0x4c3   :  { %v2794_v5 = vrot.slane %v2650_v30, 1  ;;  %v2965_v1 = vmax.f32 %v2647_v44, %v2793_v42 }
 0x4c4   :  { %v2796_v49 = vrot.slane %v2651_v60, 1  ;;  %v2501_v56 = vpop.f32.mrb[20].mxu1  ;;  %v6528_v45 = vpack.c.bf16 %v2964_v31, %v2962_v25 }
 0x4c5   :  { %v2795_v32 = vsel %vm294_vm0, %v2790_v23, %v2794_v5  ;;  %v2652_v2 = vmax.f32 %v9183_v14, %v2501_v56  ;;  %v2503_v39 = vpop.f32.mrb[21].mxu1  ;;  %v6526_v41 = vpack.c.bf16 %v2965_v1, %v2963_v57 }
 0x4c6   :  { %v2966_v18 = vmax.f32 %v2648_v27, %v2795_v32  ;;  %v2653_v6 = vmax.f32 %v9185_v15, %v2503_v39  ;;  %v2797_v43 = vsel %vm294_vm0, %v2792_v29, %v2796_v49 }
 0x4c7   :  { %v2798_v16 = vrot.slane %v2652_v2, 1  ;;  %6527 = vmatprep.subr.bf16.mxu1 %v6526_v41  ;;  %v2967_v7 = vmax.f32 %v2649_v51, %v2797_v43 }
 0x4c8   :  { %v2800_v10 = vrot.slane %v2653_v6, 1  ;;  %v2507_v52 = vpop.f32.mrb[22].mxu1  ;;  %6529 = vmatpush1.bf16.msra.mxu1 %v6528_v45 }
 0x4c9   :  { %v2799_v44 = vsel %vm294_vm0, %v2794_v5, %v2798_v16  ;;  %v2654_v35 = vmax.f32 %v9189_v21, %v2507_v52  ;;  %v2509_v20 = vpop.f32.mrb[23].mxu1 }
 0x4ca   :  { %v2968_v46 = vmax.f32 %v2650_v30, %v2799_v44  ;;  %v2655_v14 = vmax.f32 %v9191_v22, %v2509_v20  ;;  %v2801_v4 = vsel %vm294_vm0, %v2796_v49, %v2800_v10 }
 0x4cb   :  { %v2802_v19 = vrot.slane %v2654_v35, 1  ;;  %v2969_v15 = vmax.f32 %v2651_v60, %v2801_v4 }
 0x4cc   :  { %v2804_v58 = vrot.slane %v2655_v14, 1  ;;  %v2513_v62 = vpop.f32.mrb[24].mxu1  ;;  %v6532_v27 = vpack.c.bf16 %v2968_v46, %v2966_v18 }
 0x4cd   :  { %v2803_v63 = vsel %vm294_vm0, %v2798_v16, %v2802_v19  ;;  %v2656_v8 = vmax.f32 %v9195_v12, %v2513_v62  ;;  %v2515_v25 = vpop.f32.mrb[25].mxu1  ;;  %v6530_v51 = vpack.c.bf16 %v2969_v15, %v2967_v7 }
 0x4ce   :  { %v2970_v24 = vmax.f32 %v2652_v2, %v2803_v63  ;;  %v2657_v21 = vmax.f32 %v9197_v26, %v2515_v25  ;;  %v2805_v23 = vsel %vm294_vm0, %v2800_v10, %v2804_v58 }
 0x4cf   :  { %v2806_v57 = vrot.slane %v2656_v8, 1  ;;  %6531 = vmatprep.subr.bf16.mxu1 %v6530_v51  ;;  %v2971_v22 = vmax.f32 %v2653_v6, %v2805_v23 }
 0x4d0   :  { %v2808_v29 = vrot.slane %v2657_v21, 1  ;;  %v2519_v61 = vpop.f32.mrb[26].mxu1  ;;  %6533 = vmatpush1.bf16.msra.mxu1 %v6532_v27 }
 0x4d1   :  { %v2807_v28 = vsel %vm294_vm0, %v2802_v19, %v2806_v57  ;;  %v2658_v30 = vmax.f32 %v9201_v33, %v2519_v61  ;;  %v2521_v34 = vpop.f32.mrb[27].mxu1 }
 0x4d2   :  { %v2972_v31 = vmax.f32 %v2654_v35, %v2807_v28  ;;  %v2659_v12 = vmax.f32 %v9203_v38, %v2521_v34  ;;  %v2809_v60 = vsel %vm294_vm0, %v2804_v58, %v2808_v29 }
 0x4d3   :  { %v2810_v42 = vrot.slane %v2658_v30, 1  ;;  %v2973_v26 = vmax.f32 %v2655_v14, %v2809_v60 }
 0x4d4   :  { %v2812_v5 = vrot.slane %v2659_v12, 1  ;;  %v2525_v1 = vpop.f32.mrb[28].mxu1  ;;  %v6536_v49 = vpack.c.bf16 %v2972_v31, %v2970_v24 }
 0x4d5   :  { %v2811_v56 = vsel %vm294_vm0, %v2806_v57, %v2810_v42  ;;  %v2660_v45 = vmax.f32 %v9207_v47, %v2525_v1  ;;  %v2527_v32 = vpop.f32.mrb[29].mxu1  ;;  %v6534_v2 = vpack.c.bf16 %v2973_v26, %v2971_v22 }
 0x4d6   :  { %v2974_v39 = vmax.f32 %v2656_v8, %v2811_v56  ;;  %v2661_v33 = vmax.f32 %v9209_v53, %v2527_v32  ;;  %v2813_v41 = vsel %vm294_vm0, %v2808_v29, %v2812_v5 }
 0x4d7   :  { %v2814_v18 = vrot.slane %v2660_v45, 1  ;;  %6535 = vmatprep.subr.bf16.mxu1 %v6534_v2  ;;  %v2975_v38 = vmax.f32 %v2657_v21, %v2813_v41 }
 0x4d8   :  { %v2816_v6 = vrot.slane %v2661_v33, 1  ;;  %v2531_v43 = vpop.f32.mrb[30].mxu1  ;;  %6537 = vmatpush1.bf16.msra.mxu1 %v6536_v49 }
 0x4d9   :  { %v2815_v16 = vsel %vm294_vm0, %v2810_v42, %v2814_v18  ;;  %v2662_v7 = vmax.f32 %v9213_v59, %v2531_v43  ;;  %v2533_v10 = vpop.f32.mrb[31].mxu1 }
 0x4da   :  { %v2976_v52 = vmax.f32 %v2658_v30, %v2815_v16  ;;  %v2663_v47 = vmax.f32 %v9215_v0, %v2533_v10  ;;  %v2817_v44 = vsel %vm294_vm0, %v2812_v5, %v2816_v6 }
 0x4db   :  { %v2818_v35 = vrot.slane %v2662_v7, 1  ;;  %v2977_v53 = vmax.f32 %v2659_v12, %v2817_v44 }
 0x4dc   :  { %v2820_v20 = vrot.slane %v2663_v47, 1  ;;  %v2537_v46 = vpop.f32.mrb[32].mxu1  ;;  %v6540_v14 = vpack.c.bf16 %v2976_v52, %v2974_v39 }
 0x4dd   :  { %v2819_v4 = vsel %vm294_vm0, %v2814_v18, %v2818_v35  ;;  %v2664_v19 = vmax.f32 %v9219_v54, %v2537_v46  ;;  %v2539_v15 = vpop.f32.mrb[33].mxu1  ;;  %v6538_v58 = vpack.c.bf16 %v2977_v53, %v2975_v38 }
 0x4de   :  { %v2978_v62 = vmax.f32 %v2660_v45, %v2819_v4  ;;  %v2665_v59 = vmax.f32 %v9221_v48, %v2539_v15  ;;  %v2821_v27 = vsel %vm294_vm0, %v2816_v6, %v2820_v20 }
 0x4df   :  { %v2822_v63 = vrot.slane %v2664_v19, 1  ;;  %6539 = vmatprep.subr.bf16.mxu1 %v6538_v58  ;;  %v2979_v0 = vmax.f32 %v2661_v33, %v2821_v27 }
 0x4e0   :  { %v2824_v8 = vrot.slane %v2665_v59, 1  ;;  %v2543_v25 = vpop.f32.mrb[34].mxu1  ;;  %6541 = vmatpush1.bf16.msra.mxu1 %v6540_v14 }
 0x4e1   :  { %v2823_v51 = vsel %vm294_vm0, %v2818_v35, %v2822_v63  ;;  %v2666_v24 = vmax.f32 %v9225_v36, %v2543_v25  ;;  %v2545_v21 = vpop.f32.mrb[35].mxu1  ;;  %v10160_v25 = vld [vmem:[#allocation62_spill] sm:$0xff] }
 0x4e2   :  { %v2980_v23 = vmax.f32 %v2662_v7, %v2823_v51  ;;  %v2667_v54 = vmax.f32 %v9227_v9, %v2545_v21  ;;  %v2825_v57 = vsel %vm294_vm0, %v2820_v20, %v2824_v8 }
 0x4e3   :  { %v2826_v22 = vrot.slane %v2666_v24, 1  ;;  %v2981_v48 = vmax.f32 %v2663_v47, %v2825_v57  ;;  %v10161_v57 = vld [vmem:[#allocation63_spill] sm:$0xff] }
 0x4e4   :  { %v2828_v29 = vrot.slane %v2667_v54, 1  ;;  %v2549_v61 = vpop.f32.mrb[36].mxu1  ;;  %v6544_v28 = vpack.c.bf16 %v2980_v23, %v2978_v62 }
 0x4e5   :  { %v2827_v30 = vsel %vm294_vm0, %v2822_v63, %v2826_v22  ;;  %v2668_v34 = vmax.f32 %v9231_v37, %v2549_v61  ;;  %v2551_v31 = vpop.f32.mrb[37].mxu1  ;;  %v6542_v12 = vpack.c.bf16 %v2981_v48, %v2979_v0  ;;  %v10162_v61 = vld [vmem:[#allocation64_spill] sm:$0xff] }
 0x4e6   :  { %v2982_v60 = vmax.f32 %v2664_v19, %v2827_v30  ;;  %v2669_v36 = vmax.f32 %v9233_v11, %v2551_v31  ;;  %v2829_v42 = vsel %vm294_vm0, %v2824_v8, %v2828_v29 }
 0x4e7   :  { %v2830_v26 = vrot.slane %v2668_v34, 1  ;;  %6543 = vmatprep.subr.bf16.mxu1 %v6542_v12  ;;  %v2983_v9 = vmax.f32 %v2665_v59, %v2829_v42  ;;  %v10159_v59 = vld [vmem:[#allocation61_spill] sm:$0xff] }
 0x4e8   :  { %v2832_v5 = vrot.slane %v2669_v36, 1  ;;  %v2555_v1 = vpop.f32.mrb[38].mxu1  ;;  %6545 = vmatpush1.bf16.msra.mxu1 %v6544_v28 }
 0x4e9   :  { %v2831_v49 = vsel %vm294_vm0, %v2826_v22, %v2830_v26  ;;  %v2670_v56 = vmax.f32 %v9237_v50, %v2555_v1  ;;  %v2557_v45 = vpop.f32.mrb[39].mxu1 }
 0x4ea   :  { %v2984_v32 = vmax.f32 %v2666_v24, %v2831_v49  ;;  %v2671_v37 = vmax.f32 %v9239_v13, %v2557_v45  ;;  %v2833_v2 = vsel %vm294_vm0, %v2828_v29, %v2832_v5 }
 0x4eb   :  { %v2834_v39 = vrot.slane %v2670_v56, 1  ;;  %v2985_v11 = vmax.f32 %v2667_v54, %v2833_v2 }
 0x4ec   :  { %v2836_v33 = vrot.slane %v2671_v37, 1  ;;  %v2561_v41 = vpop.f32.mrb[40].mxu1  ;;  %v6548_v18 = vpack.c.bf16 %v2984_v32, %v2982_v60 }
 0x4ed   :  { %v2835_v38 = vsel %vm294_vm0, %v2830_v26, %v2834_v39  ;;  %v2672_v6 = vmax.f32 %v9243_v17, %v2561_v41  ;;  %v2563_v43 = vpop.f32.mrb[41].mxu1  ;;  %v6546_v16 = vpack.c.bf16 %v2985_v11, %v2983_v9  ;;  %v10163_v26 = vld [vmem:[#allocation65_spill] sm:$0xff]  ;;  %v10165_v41 = vld [vmem:[#allocation67_spill] sm:$0xff] }
 0x4ee   :  { %v2986_v7 = vmax.f32 %v2668_v34, %v2835_v38  ;;  %v2673_v50 = vmax.f32 %v9245_v3, %v2563_v43  ;;  %v2837_v10 = vsel %vm294_vm0, %v2832_v5, %v2836_v33  ;;  %v10166_v43 = vld [vmem:[#allocation68_spill] sm:$0xff] }
 0x4ef   :  { %v2838_v52 = vrot.slane %v2672_v6, 1  ;;  %6547 = vmatprep.subr.bf16.mxu1 %v6546_v16  ;;  %v2987_v13 = vmax.f32 %v2669_v36, %v2837_v10 }
 0x4f0   :  { %v2840_v47 = vrot.slane %v2673_v50, 1  ;;  %v2567_v44 = vpop.f32.mrb[42].mxu1  ;;  %6549 = vmatpush1.bf16.msra.mxu1 %v6548_v18 }
 0x4f1   :  { %v2839_v35 = vsel %vm294_vm0, %v2834_v39, %v2838_v52  ;;  %v2674_v53 = vmax.f32 %v9249_v55, %v2567_v44  ;;  %v2569_v20 = vpop.f32.mrb[43].mxu1 }
 0x4f2   :  { %v2988_v46 = vmax.f32 %v2670_v56, %v2839_v35  ;;  %v2675_v17 = vmax.f32 %v9251_v40, %v2569_v20  ;;  %v2841_v14 = vsel %vm294_vm0, %v2836_v33, %v2840_v47  ;;  %v10164_v56 = vld [vmem:[#allocation66_spill] sm:$0xff]  ;;  %v10167_v35 = vld [vmem:[#allocation69_spill] sm:$0xff] }
 0x4f3   :  { %v2842_v4 = vrot.slane %v2674_v53, 1  ;;  %v2989_v3 = vmax.f32 %v2671_v37, %v2841_v14  ;;  %v10168_v14 = vld [vmem:[#allocation70_spill] sm:$0xff] }
 0x4f4   :  { %v2844_v19 = vrot.slane %v2675_v17, 1  ;;  %v2573_v15 = vpop.f32.mrb[44].mxu1  ;;  %v6552_v58 = vpack.c.bf16 %v2988_v46, %v2986_v7 }
 0x4f5   :  { %v2843_v62 = vsel %vm294_vm0, %v2838_v52, %v2842_v4  ;;  %v2676_v27 = vmax.f32 %v10159_v59, %v2573_v15  ;;  %v2575_v63 = vpop.f32.mrb[45].mxu1  ;;  %v6550_v0 = vpack.c.bf16 %v2989_v3, %v2987_v13 }
 0x4f6   :  { %v2990_v8 = vmax.f32 %v2672_v6, %v2843_v62  ;;  %v2677_v55 = vmax.f32 %v10160_v25, %v2575_v63  ;;  %v2845_v51 = vsel %vm294_vm0, %v2840_v47, %v2844_v19  ;;  %v10170_v25 = vld [vmem:[#allocation72_spill] sm:$0xff] }
 0x4f7   :  { %v2846_v24 = vrot.slane %v2676_v27, 1  ;;  %6551 = vmatprep.subr.bf16.mxu1 %v6550_v0  ;;  %v2991_v40 = vmax.f32 %v2673_v50, %v2845_v51 }
 0x4f8   :  { %v2848_v21 = vrot.slane %v2677_v55, 1  ;;  %v2579_v23 = vpop.f32.mrb[46].mxu1  ;;  %6553 = vmatpush1.bf16.msra.mxu1 %v6552_v58 }
 0x4f9   :  { %v2847_v54 = vsel %vm294_vm0, %v2842_v4, %v2846_v24  ;;  %v2678_v22 = vmax.f32 %v10161_v57, %v2579_v23  ;;  %v2581_v48 = vpop.f32.mrb[47].mxu1 }
 0x4fa   :  { %v2992_v29 = vmax.f32 %v2674_v53, %v2847_v54  ;;  %v2679_v28 = vmax.f32 %v10162_v61, %v2581_v48  ;;  %v2849_v30 = vsel %vm294_vm0, %v2844_v19, %v2848_v21 }
 0x4fb   :  { %v2850_v34 = vrot.slane %v2678_v22, 1  ;;  %v2993_v31 = vmax.f32 %v2675_v17, %v2849_v30  ;;  %v10172_v30 = vld [vmem:[#allocation74_spill] sm:$0xff] }
 0x4fc   :  { %v2852_v12 = vrot.slane %v2679_v28, 1  ;;  %v2585_v60 = vpop.f32.mrb[48].mxu1  ;;  %v6556_v36 = vpack.c.bf16 %v2992_v29, %v2990_v8 }
 0x4fd   :  { %v2851_v42 = vsel %vm294_vm0, %v2846_v24, %v2850_v34  ;;  %v2680_v9 = vmax.f32 %v10163_v26, %v2585_v60  ;;  %v2587_v5 = vpop.f32.mrb[49].mxu1  ;;  %v6554_v1 = vpack.c.bf16 %v2993_v31, %v2991_v40 }
 0x4fe   :  { %v2994_v49 = vmax.f32 %v2676_v27, %v2851_v42  ;;  %v2681_v45 = vmax.f32 %v10164_v56, %v2587_v5  ;;  %v2853_v32 = vsel %vm294_vm0, %v2848_v21, %v2852_v12  ;;  %v10169_v27 = vld [vmem:[#allocation71_spill] sm:$0xff]  ;;  %v10174_v56 = vld [vmem:[#allocation76_spill] sm:$0xff] }
 0x4ff   :  { %v2854_v37 = vrot.slane %v2680_v9, 1  ;;  %6555 = vmatprep.subr.bf16.mxu1 %v6554_v1  ;;  %v2995_v2 = vmax.f32 %v2677_v55, %v2853_v32 }
 0x500   :  { %v2856_v39 = vrot.slane %v2681_v45, 1  ;;  %v2591_v11 = vpop.f32.mrb[50].mxu1  ;;  %6557 = vmatpush1.bf16.msra.mxu1 %v6556_v36 }
 0x501   :  { %v2855_v33 = vsel %vm294_vm0, %v2850_v34, %v2854_v37  ;;  %v2682_v18 = vmax.f32 %v10165_v41, %v2591_v11  ;;  %v2593_v38 = vpop.f32.mrb[51].mxu1 }
 0x502   :  { %v2996_v6 = vmax.f32 %v2678_v22, %v2855_v33  ;;  %v2683_v16 = vmax.f32 %v10166_v43, %v2593_v38  ;;  %v2857_v7 = vsel %vm294_vm0, %v2852_v12, %v2856_v39  ;;  %v10171_v22 = vld [vmem:[#allocation73_spill] sm:$0xff] }
 0x503   :  { %v2858_v50 = vrot.slane %v2682_v18, 1  ;;  %v2997_v10 = vmax.f32 %v2679_v28, %v2857_v7  ;;  %v10176_v7 = vld [vmem:[#allocation78_spill] sm:$0xff] }
 0x504   :  { %v2860_v52 = vrot.slane %v2683_v16, 1  ;;  %v2597_v13 = vpop.f32.mrb[52].mxu1  ;;  %v6560_v47 = vpack.c.bf16 %v2996_v6, %v2994_v49 }
 0x505   :  { %v2859_v44 = vsel %vm294_vm0, %v2854_v37, %v2858_v50  ;;  %v2684_v53 = vmax.f32 %v10167_v35, %v2597_v13  ;;  %v2599_v20 = vpop.f32.mrb[53].mxu1  ;;  %v6558_v46 = vpack.c.bf16 %v2997_v10, %v2995_v2 }
 0x506   :  { %v2998_v17 = vmax.f32 %v2680_v9, %v2859_v44  ;;  %v2685_v4 = vmax.f32 %v10168_v14, %v2599_v20  ;;  %v2861_v3 = vsel %vm294_vm0, %v2856_v39, %v2860_v52  ;;  %v10173_v9 = vld [vmem:[#allocation75_spill] sm:$0xff]  ;;  %v10178_v14 = vld [vmem:[#allocation80_spill] sm:$0xff] }
 0x507   :  { %v2862_v19 = vrot.slane %v2684_v53, 1  ;;  %6559 = vmatprep.subr.bf16.mxu1 %v6558_v46  ;;  %v2999_v15 = vmax.f32 %v2681_v45, %v2861_v3 }
 0x508   :  { %v2864_v58 = vrot.slane %v2685_v4, 1  ;;  %v2603_v62 = vpop.f32.mrb[54].mxu1  ;;  %6561 = vmatpush1.bf16.msra.mxu1 %v6560_v47 }
 0x509   :  { %v2863_v59 = vsel %vm294_vm0, %v2858_v50, %v2862_v19  ;;  %v2686_v63 = vmax.f32 %v10169_v27, %v2603_v62  ;;  %v2605_v0 = vpop.f32.mrb[55].mxu1 }
 0x50a   :  { %v3000_v8 = vmax.f32 %v2682_v18, %v2863_v59  ;;  %v2687_v55 = vmax.f32 %v10170_v25, %v2605_v0  ;;  %v2865_v51 = vsel %vm294_vm0, %v2860_v52, %v2864_v58  ;;  %v10175_v18 = vld [vmem:[#allocation77_spill] sm:$0xff] }
 0x50b   :  { %v2866_v24 = vrot.slane %v2686_v63, 1  ;;  %v3001_v40 = vmax.f32 %v2683_v16, %v2865_v51  ;;  %v3349_v51 = vld [vmem:[#allocation9 + $0x218] sm:$0xff] }
 0x50c   :  { %v2868_v21 = vrot.slane %v2687_v55, 1  ;;  %v2609_v23 = vpop.f32.mrb[56].mxu1  ;;  %v6564_v54 = vpack.c.bf16 %v3000_v8, %v2998_v17 }
 0x50d   :  { %v2867_v57 = vsel %vm294_vm0, %v2862_v19, %v2866_v24  ;;  %v2688_v48 = vmax.f32 %v10171_v22, %v2609_v23  ;;  %v2611_v29 = vpop.f32.mrb[57].mxu1  ;;  %v6562_v61 = vpack.c.bf16 %v3001_v40, %v2999_v15  ;;  %v3348_v22 = vld [vmem:[#allocation9 + $0x210] sm:$0xff] }
 0x50e   :  { %v3002_v28 = vmax.f32 %v2684_v53, %v2867_v57  ;;  %v2689_v34 = vmax.f32 %v10172_v30, %v2611_v29  ;;  %v2869_v31 = vsel %vm294_vm0, %v2864_v58, %v2868_v21  ;;  %v10177_v53 = vld [vmem:[#allocation79_spill] sm:$0xff]  ;;  %v3353_v29 = vld [vmem:[#allocation9 + $0x238] sm:$0xff] }
 0x50f   :  { %v2870_v12 = vrot.slane %v2688_v48, 1  ;;  %6563 = vmatprep.subr.bf16.mxu1 %v6562_v61  ;;  %v3003_v60 = vmax.f32 %v2685_v4, %v2869_v31  ;;  %v3346_v57 = vld [vmem:[#allocation9 + $0x200] sm:$0xff]  ;;  %v3017_v30 = vld [vmem:[#allocation6 + $0x18] sm:$0xff] }
 0x510   :  { %v2872_v36 = vrot.slane %v2689_v34, 1  ;;  %v2615_v42 = vpop.f32.mrb[58].mxu1  ;;  %6565 = vmatpush1.bf16.msra.mxu1 %v6564_v54  ;;  %v3014_v61 = vld [vmem:[#allocation6] sm:$0xff] }
 0x511   :  { %v2871_v26 = vsel %vm294_vm0, %v2866_v24, %v2870_v12  ;;  %v2690_v5 = vmax.f32 %v10173_v9, %v2615_v42  ;;  %v2617_v1 = vpop.f32.mrb[59].mxu1  ;;  %v3350_v31 = vld [vmem:[#allocation9 + $0x220] sm:$0xff]  ;;  %v3016_v42 = vld [vmem:[#allocation6 + $0x10] sm:$0xff] }
 0x512   :  { %v3004_v49 = vmax.f32 %v2686_v63, %v2871_v26  ;;  %v2691_v45 = vmax.f32 %v10174_v56, %v2617_v1  ;;  %v2873_v32 = vsel %vm294_vm0, %v2868_v21, %v2872_v36  ;;  %v3019_v9 = vld [vmem:[#allocation6 + $0x28] sm:$0xff] }
 0x513   :  { %v2874_v37 = vrot.slane %v2690_v5, 1  ;;  %v3005_v2 = vmax.f32 %v2687_v55, %v2873_v32  ;;  %v3347_v55 = vld [vmem:[#allocation9 + $0x208] sm:$0xff]  ;;  %v3354_v1 = vld [vmem:[#allocation9 + $0x240] sm:$0xff] }
 0x514   :  { %v2876_v39 = vrot.slane %v2691_v45, 1  ;;  %v2621_v11 = vpop.f32.mrb[60].mxu1  ;;  %v6568_v33 = vpack.c.bf16 %v3004_v49, %v3002_v28  ;;  %v6580_v54 = vpack.c.bf16 %v3349_v51, %v3347_v55  ;;  %v6582_v28 = vpack.c.bf16 %v3348_v22, %v3346_v57  ;;  %v3356_v49 = vld [vmem:[#allocation9 + $0x250] sm:$0xff]  ;;  %v3359_v56 = vld [vmem:[#allocation9 + $0x268] sm:$0xff]  ;;  %v3018_v32 = vld [vmem:[#allocation6 + $0x20] sm:$0xff] }
 0x515   :  { %v2875_v41 = vsel %vm294_vm0, %v2870_v12, %v2874_v37  ;;  %v2692_v38 = vmax.f32 %v10175_v18, %v2621_v11  ;;  %v2623_v6 = vpop.f32.mrb[61].mxu1  ;;  %v6566_v43 = vpack.c.bf16 %v3005_v2, %v3003_v60  ;;  %v3352_v12 = vld [vmem:[#allocation9 + $0x230] sm:$0xff]  ;;  %v3355_v60 = vld [vmem:[#allocation9 + $0x248] sm:$0xff]  ;;  %v3358_v11 = vld [vmem:[#allocation9 + $0x260] sm:$0xff] }
 0x516   :  { %v3006_v16 = vmax.f32 %v2688_v48, %v2875_v41  ;;  %v2693_v50 = vmax.f32 %v10176_v7, %v2623_v6  ;;  %v2877_v10 = vsel %vm294_vm0, %v2872_v36, %v2876_v39  ;;  %v3351_v48 = vld [vmem:[#allocation9 + $0x228] sm:$0xff]  ;;  %v3357_v36 = vld [vmem:[#allocation9 + $0x258] sm:$0xff]  ;;  %v6586_v26 = vpack.c.bf16 %v3352_v12, %v3350_v31  ;;  %v3362_v7 = vld [vmem:[#allocation9 + $0x280] sm:$0xff] }
 0x517   :  { %v2878_v52 = vrot.slane %v2692_v38, 1  ;;  %6567 = vmatprep.subr.bf16.mxu1 %v6566_v43  ;;  %v3007_v13 = vmax.f32 %v2689_v34, %v2877_v10  ;;  %v6584_v34 = vpack.c.bf16 %v3353_v29, %v3351_v48  ;;  %v3021_v2 = vld [vmem:[#allocation6 + $0x38] sm:$0xff]  ;;  %v3363_v41 = vld [vmem:[#allocation9 + $0x288] sm:$0xff]  ;;  %v3378_v22 = vld [vmem:[#allocation9 + $0x300] sm:$0xff] }
 0x518   :  { %v2880_v47 = vrot.slane %v2693_v50, 1  ;;  %v2627_v44 = vpop.f32.mrb[62].mxu1  ;;  %6569 = vmatpush1.bf16.msra.mxu1 %v6568_v33  ;;  %v3360_v33 = vld [vmem:[#allocation9 + $0x270] sm:$0xff]  ;;  %v3365_v18 = vld [vmem:[#allocation9 + $0x298] sm:$0xff]  ;;  %v3023_v43 = vld [vmem:[#allocation6 + $0x48] sm:$0xff] }
 0x519   :  { %v2879_v35 = vsel %vm294_vm0, %v2874_v37, %v2878_v52  ;;  %v2694_v20 = vmax.f32 %v10177_v53, %v2627_v44  ;;  %v2629_v46 = vpop.f32.mrb[63].mxu1  ;;  %v6590_v37 = vpack.c.bf16 %v3356_v49, %v3354_v1  ;;  %v6594_v6 = vpack.c.bf16 %v3360_v33, %v3358_v11  ;;  %v3367_v10 = vld [vmem:[#allocation9 + $0x2a8] sm:$0xff]  ;;  %v3025_v44 = vld [vmem:[#allocation6 + $0x58] sm:$0xff]  ;;  %v3366_v53 = vld [vmem:[#allocation9 + $0x2a0] sm:$0xff] }
 0x51a   :  { %v3008_v17 = vmax.f32 %v2690_v5, %v2879_v35  ;;  %v2695_v4 = vmax.f32 %v10178_v14, %v2629_v46  ;;  %v2881_v3 = vsel %vm294_vm0, %v2876_v39, %v2880_v47  ;;  %v6588_v5 = vpack.c.bf16 %v3357_v36, %v3355_v60  ;;  %v3371_v46 = vld [vmem:[#allocation9 + $0x2c8] sm:$0xff]  ;;  %v3376_v55 = vld [vmem:[#allocation9 + $0x2f0] sm:$0xff]  ;;  %v3382_v12 = vld [vmem:[#allocation9 + $0x320] sm:$0xff] }
 0x51b   :  { %v2882_v19 = vrot.slane %v2694_v20, 1  ;;  %v3009_v15 = vmax.f32 %v2691_v45, %v2881_v3  ;;  %v3361_v45 = vld [vmem:[#allocation9 + $0x278] sm:$0xff]  ;;  %v3024_v14 = vld [vmem:[#allocation6 + $0x50] sm:$0xff]  ;;  %v3027_v3 = vld [vmem:[#allocation6 + $0x68] sm:$0xff] }
 0x51c   :  { %v2884_v58 = vrot.slane %v2695_v4, 1  ;;  %v6572_v62 = vpack.c.bf16 %v3008_v17, %v3006_v16  ;;  %v6592_v39 = vpack.c.bf16 %v3361_v45, %v3359_v56  ;;  %v6596_v16 = vpack.c.bf16 %v3365_v18, %v3363_v41  ;;  %v3373_v17 = vld [vmem:[#allocation9 + $0x2d8] sm:$0xff]  ;;  %v3379_v51 = vld [vmem:[#allocation9 + $0x308] sm:$0xff]  ;;  %v3380_v48 = vld [vmem:[#allocation9 + $0x310] sm:$0xff] }
 0x51d   :  { %v2883_v59 = vsel %vm294_vm0, %v2878_v52, %v2882_v19  ;;  %v3012_v27 = vmax.f32 %v2694_v20, %v2882_v19  ;;  %v6570_v63 = vpack.c.bf16 %v3009_v15, %v3007_v13  ;;  %v3369_v52 = vld [vmem:[#allocation9 + $0x2b8] sm:$0xff]  ;;  %v3368_v20 = vld [vmem:[#allocation9 + $0x2b0] sm:$0xff]  ;;  %v6604_v19 = vpack.c.bf16 %v3373_v17, %v3371_v46  ;;  %v3370_v15 = vld [vmem:[#allocation9 + $0x2c0] sm:$0xff] }
 0x51e   :  { %v3010_v0 = vmax.f32 %v2692_v38, %v2883_v59  ;;  %v2885_v8 = vsel %vm294_vm0, %v2880_v47, %v2884_v58  ;;  %v3013_v25 = vmax.f32 %v2695_v4, %v2884_v58  ;;  %v3020_v38 = vld [vmem:[#allocation6 + $0x30] sm:$0xff]  ;;  %v3022_v13 = vld [vmem:[#allocation6 + $0x40] sm:$0xff]  ;;  %v6600_v35 = vpack.c.bf16 %v3369_v52, %v3367_v10 }
 0x51f   :  { %v3011_v24 = vmax.f32 %v2693_v50, %v2885_v8  ;;  %6571 = vmatprep.subr.bf16.mxu1 %v6570_v63  ;;  %v3364_v50 = vld [vmem:[#allocation9 + $0x290] sm:$0xff]  ;;  %v6602_v4 = vpack.c.bf16 %v3368_v20, %v3366_v53  ;;  %v3377_v59 = vld [vmem:[#allocation9 + $0x2f8] sm:$0xff]  ;;  %v3383_v29 = vld [vmem:[#allocation9 + $0x328] sm:$0xff] }
 0x520   :  { %v6577_v40 = vpack.c.bf16 %v3012_v27, %v3010_v0  ;;  %6573 = vmatpush1.bf16.msra.mxu1 %v6572_v62  ;;  %v6598_v47 = vpack.c.bf16 %v3364_v50, %v3362_v7  ;;  %v3372_v58 = vld [vmem:[#allocation9 + $0x2d0] sm:$0xff]  ;;  %v3375_v62 = vld [vmem:[#allocation9 + $0x2e8] sm:$0xff]  ;;  %v3026_v27 = vld [vmem:[#allocation6 + $0x60] sm:$0xff] }
 0x521   :  { %v6574_v23 = vpack.c.bf16 %v3013_v25, %v3011_v24  ;;  %v6606_v63 = vpack.c.bf16 %v3372_v58, %v3370_v15  ;;  %v3029_v0 = vld [vmem:[#allocation6 + $0x78] sm:$0xff]  ;;  %v6608_v8 = vpack.c.bf16 %v3377_v59, %v3375_v62  ;;  %v3374_v25 = vld [vmem:[#allocation9 + $0x2e0] sm:$0xff]  ;;  %v3387_v36 = vld [vmem:[#allocation9 + $0x348] sm:$0xff] }
 0x522   :  { %v3381_v24 = vld [vmem:[#allocation9 + $0x318] sm:$0xff]  ;;  %v3384_v60 = vld [vmem:[#allocation9 + $0x330] sm:$0xff]  ;;  %v3386_v49 = vld [vmem:[#allocation9 + $0x340] sm:$0xff] }
 0x523   :  { %6576 = vmatprep.subr.msk.bf16.mxu1 %vm9442_vm8, %v6574_v23  ;;  %v6610_v23 = vpack.c.bf16 %v3376_v55, %v3374_v25  ;;  %v6612_v57 = vpack.c.bf16 %v3381_v24, %v3379_v51  ;;  %v3388_v56 = vld [vmem:[#allocation9 + $0x350] sm:$0xff]  ;;  %v3391_v45 = vld [vmem:[#allocation9 + $0x368] sm:$0xff]  ;;  %v3390_v33 = vld [vmem:[#allocation9 + $0x360] sm:$0xff] }
 0x524   :  { %6579 = vmatpush1.bf16.msk.msra.mxu1 %vm9442_vm8, %v6577_v40  ;;  %v3028_v40 = vld [vmem:[#allocation6 + $0x70] sm:$0xff]  ;;  %v3394_v50 = vld [vmem:[#allocation9 + $0x380] sm:$0xff]  ;;  %v3401_v53 = vld [vmem:[#allocation9 + $0x3b8] sm:$0xff] }
 0x525   :  { %6581 = vmatprep.subr.bf16.mxu1 %v6580_v54  ;;  %v3031_v54 = vld [vmem:[#allocation6 + $0x88] sm:$0xff]  ;;  %v3392_v41 = vld [vmem:[#allocation9 + $0x370] sm:$0xff]  ;;  %v3038_v52 = vld [vmem:[#allocation6 + $0xc0] sm:$0xff] }
 0x526   :  { %v3395_v18 = vld [vmem:[#allocation9 + $0x388] sm:$0xff]  ;;  %v3396_v10 = vld [vmem:[#allocation9 + $0x390] sm:$0xff]  ;;  %v3398_v46 = vld [vmem:[#allocation9 + $0x3a0] sm:$0xff] }
 0x527   :  { %3169 = vmatmul.mubr.f32.vlgmr.msra.gmra.mrb[64].mxu1 %v3014_v61  ;;  %v3385_v61 = vld [vmem:[#allocation9 + $0x338] sm:$0xff]  ;;  %v3400_v17 = vld [vmem:[#allocation9 + $0x3b0] sm:$0xff]  ;;  %v3402_v15 = vld [vmem:[#allocation9 + $0x3c0] sm:$0xff] }
 0x528   :  { %6108 = vmatprep.mubr.msk.f32.mxu1 %vm3054_vm5, %v3017_v30  ;;  %6583 = vmatpush1.bf16.msra.mxu1 %v6582_v28  ;;  %v3030_v28 = vld [vmem:[#allocation6 + $0x80] sm:$0xff]  ;;  %v6614_v30 = vpack.c.bf16 %v3380_v48, %v3378_v22  ;;  %v6616_v31 = vpack.c.bf16 %v3385_v61, %v3383_v29  ;;  %v3404_v58 = vld [vmem:[#allocation9 + $0x3d0] sm:$0xff]  ;;  %v3407_v59 = vld [vmem:[#allocation9 + $0x3e8] sm:$0xff] }
 0x529   :  { %6585 = vmatprep.subr.bf16.mxu1 %v6584_v34  ;;  %v3033_v34 = vld [vmem:[#allocation6 + $0x98] sm:$0xff]  ;;  %v6638_v62 = vpack.c.bf16 %v3404_v58, %v3402_v15  ;;  %v3736_v55 = vld [vmem:[#allocation9 + $0x608] sm:$0xff] }
 0x52a   :  { %v3738_v51 = vld [vmem:[#allocation9 + $0x618] sm:$0xff]  ;;  %v5394_v21 = vld [vmem:[#allocation13 + $0x320] sm:$0xff] }
 0x52b   :  { %3175 = vmatmul.mubr.f32.gmra.mrb[66].mxu1 %v3016_v42  ;;  %v3389_v42 = vld [vmem:[#allocation9 + $0x358] sm:$0xff]  ;;  %v6644_v24 = vpack.c.bf16 %v3738_v51, %v3736_v55 }
 0x52c   :  { %6109 = vmatprep.mubr.msk.f32.mxu1 %vm3054_vm5, %v3019_v9  ;;  %6587 = vmatpush1.bf16.msra.mxu1 %v6586_v26  ;;  %v3032_v26 = vld [vmem:[#allocation6 + $0x90] sm:$0xff]  ;;  %v6618_v9 = vpack.c.bf16 %v3384_v60, %v3382_v12  ;;  %v6620_v1 = vpack.c.bf16 %v3389_v42, %v3387_v36  ;;  %v3750_v55 = vld [vmem:[#allocation9 + $0x678] sm:$0xff] }
 0x52d   :  { %6589 = vmatprep.subr.bf16.mxu1 %v6588_v5  ;;  %v3035_v5 = vld [vmem:[#allocation6 + $0xa8] sm:$0xff] }
 0x52f   :  { %3181 = vmatmul.mubr.f32.gmra.mrb[68].mxu1 %v3018_v32  ;;  %v3393_v32 = vld [vmem:[#allocation9 + $0x378] sm:$0xff] }
 0x530   :  { %6110 = vmatprep.mubr.msk.f32.mxu1 %vm3054_vm5, %v3021_v2  ;;  %6591 = vmatpush1.bf16.msra.mxu1 %v6590_v37  ;;  %v3034_v37 = vld [vmem:[#allocation6 + $0xa0] sm:$0xff]  ;;  %v6622_v2 = vpack.c.bf16 %v3388_v56, %v3386_v49  ;;  %v6624_v11 = vpack.c.bf16 %v3393_v32, %v3391_v45  ;;  %v3737_v56 = vld [vmem:[#allocation9 + $0x610] sm:$0xff] }
 0x531   :  { %6593 = vmatprep.subr.bf16.mxu1 %v6592_v39  ;;  %v3037_v39 = vld [vmem:[#allocation6 + $0xb8] sm:$0xff]  ;;  %v3735_v49 = vld [vmem:[#allocation9 + $0x600] sm:$0xff] }
 0x533   :  { %3187 = vmatmul.mubr.f32.gmra.mrb[70].mxu1 %v3020_v38  ;;  %v3397_v38 = vld [vmem:[#allocation9 + $0x398] sm:$0xff] }
 0x534   :  { %6111 = vmatprep.mubr.msk.f32.mxu1 %vm3054_vm5, %v3023_v43  ;;  %6595 = vmatpush1.bf16.msra.mxu1 %v6594_v6  ;;  %v3036_v6 = vld [vmem:[#allocation6 + $0xb0] sm:$0xff]  ;;  %v6626_v43 = vpack.c.bf16 %v3392_v41, %v3390_v33  ;;  %v6628_v7 = vpack.c.bf16 %v3397_v38, %v3395_v18 }
 0x535   :  { %6597 = vmatprep.subr.bf16.mxu1 %v6596_v16  ;;  %v3039_v16 = vld [vmem:[#allocation6 + $0xc8] sm:$0xff] }
 0x537   :  { %3193 = vmatmul.mubr.f32.gmra.mrb[72].mxu1 %v3022_v13  ;;  %v6630_v13 = vpack.c.bf16 %v3396_v10, %v3394_v50  ;;  %v3739_v10 = vld [vmem:[#allocation9 + $0x620] sm:$0xff] }
 0x538   :  { %6112 = vmatprep.mubr.msk.f32.mxu1 %vm3054_vm5, %v3025_v44  ;;  %6599 = vmatpush1.bf16.msra.mxu1 %v6598_v47  ;;  %v3041_v47 = vld [vmem:[#allocation6 + $0xd8] sm:$0xff]  ;;  %v3040_v44 = vld [vmem:[#allocation6 + $0xd0] sm:$0xff] }
 0x539   :  { %6601 = vmatprep.subr.bf16.mxu1 %v6600_v35  ;;  %v3399_v35 = vld [vmem:[#allocation9 + $0x3a8] sm:$0xff] }
 0x53a   :  { %v6632_v20 = vpack.c.bf16 %v3401_v53, %v3399_v35  ;;  %v3744_v53 = vld [vmem:[#allocation9 + $0x648] sm:$0xff] }
 0x53b   :  { %3199 = vmatmul.mubr.f32.gmra.mrb[74].mxu1 %v3024_v14  ;;  %v6634_v14 = vpack.c.bf16 %v3400_v17, %v3398_v46 }
 0x53c   :  { %6113 = vmatprep.mubr.msk.f32.mxu1 %vm3054_vm5, %v3027_v3  ;;  %6603 = vmatpush1.bf16.msra.mxu1 %v6602_v4  ;;  %v3403_v4 = vld [vmem:[#allocation9 + $0x3c8] sm:$0xff]  ;;  %v3405_v3 = vld [vmem:[#allocation9 + $0x3d8] sm:$0xff] }
 0x53d   :  { %6605 = vmatprep.subr.bf16.mxu1 %v6604_v19  ;;  %v6636_v19 = vpack.c.bf16 %v3405_v3, %v3403_v4 }
 0x53f   :  { %3205 = vmatmul.mubr.f32.gmra.mrb[76].mxu1 %v3026_v27  ;;  %v3409_v27 = vld [vmem:[#allocation9 + $0x3f8] sm:$0xff] }
 0x540   :  { %6114 = vmatprep.mubr.msk.f32.mxu1 %vm3054_vm5, %v3029_v0  ;;  %6607 = vmatpush1.bf16.msra.mxu1 %v6606_v63  ;;  %v6640_v63 = vpack.c.bf16 %v3409_v27, %v3407_v59  ;;  %v3406_v0 = vld [vmem:[#allocation9 + $0x3e0] sm:$0xff]  ;;  %v3745_v59 = vld [vmem:[#allocation9 + $0x650] sm:$0xff] }
 0x541   :  { %6609 = vmatprep.subr.bf16.mxu1 %v6608_v8  ;;  %v3408_v8 = vld [vmem:[#allocation9 + $0x3f0] sm:$0xff] }
 0x542   :  { %v6642_v25 = vpack.c.bf16 %v3408_v8, %v3406_v0 }
 0x543   :  { %3211 = vmatmul.mubr.f32.gmra.mrb[78].mxu1 %v3028_v40  ;;  %v3044_v40 = vlaneseq }
 0x544   :  { %6115 = vmatprep.mubr.msk.f32.mxu1 %vm3054_vm5, %v3031_v54  ;;  %6611 = vmatpush1.bf16.msra.mxu1 %v6610_v23 }
 0x545   :  { %6613 = vmatprep.subr.bf16.mxu1 %v6612_v57  ;;  %v9463_v23 = vshrl.u32 %v3044_v40, 7  ;;  %v3042_v57 = vld [vmem:[#allocation7] sm:$0x3] }
 0x547   :  { %3217 = vmatmul.mubr.f32.gmra.mrb[80].mxu1 %v3030_v28  ;;  %v3050_v54 = vsub.s32 1, %v9463_v23  ;;  %v3046_v22 = vsub.s32 0, %v9463_v23 }
 0x548   :  { %6116 = vmatprep.mubr.msk.f32.mxu1 %vm3054_vm5, %v3033_v34  ;;  %6615 = vmatpush1.bf16.msra.mxu1 %v6614_v30 }
 0x549   :  { %6617 = vmatprep.subr.bf16.mxu1 %v6616_v31  ;;  %v9469_v48 = vrot.slane %v3042_v57, %v3050_v54  ;;  %v9473_v29 = vrot.slane %v3042_v57, %v3046_v22 }
 0x54b   :  { %3223 = vmatmul.mubr.f32.gmra.mrb[82].mxu1 %v3032_v26 }
 0x54c   :  { %6117 = vmatprep.mubr.msk.f32.mxu1 %vm3054_vm5, %v3035_v5  ;;  %6619 = vmatpush1.bf16.msra.mxu1 %v6618_v9 }
 0x54d   :  { %6621 = vmatprep.subr.bf16.mxu1 %v6620_v1 }
 0x54f   :  { %3229 = vmatmul.mubr.f32.gmra.mrb[84].mxu1 %v3034_v37 }
 0x550   :  { %6118 = vmatprep.mubr.msk.f32.mxu1 %vm3054_vm5, %v3037_v39  ;;  %6623 = vmatpush1.bf16.msra.mxu1 %v6622_v2  ;;  %v3740_v2 = vld [vmem:[#allocation9 + $0x628] sm:$0xff]  ;;  %v3742_v39 = vld [vmem:[#allocation9 + $0x638] sm:$0xff] }
 0x551   :  { %6625 = vmatprep.subr.bf16.mxu1 %v6624_v11  ;;  %v6648_v50 = vpack.c.bf16 %v3742_v39, %v3740_v2 }
 0x553   :  { %3235 = vmatmul.mubr.f32.gmra.mrb[86].mxu1 %v3036_v6  ;;  %v6646_v6 = vpack.c.bf16 %v3737_v56, %v3735_v49  ;;  %v3752_v56 = vld [vmem:[#allocation9 + $0x688] sm:$0xff] }
 0x554   :  { %6119 = vmatprep.mubr.msk.f32.mxu1 %vm3054_vm5, %v3039_v16  ;;  %6627 = vmatpush1.bf16.msra.mxu1 %v6626_v43 }
 0x555   :  { %6629 = vmatprep.subr.bf16.mxu1 %v6628_v7 }
 0x557   :  { %3241 = vmatmul.mubr.f32.gmra.mrb[88].mxu1 %v3038_v52  ;;  %v3741_v52 = vld [vmem:[#allocation9 + $0x630] sm:$0xff] }
 0x558   :  { %6120 = vmatprep.mubr.msk.f32.mxu1 %vm3054_vm5, %v3041_v47  ;;  %6631 = vmatpush1.bf16.msra.mxu1 %v6630_v13  ;;  %v6650_v4 = vpack.c.bf16 %v3741_v52, %v3739_v10 }
 0x559   :  { %6633 = vmatprep.subr.bf16.mxu1 %v6632_v20  ;;  %v3746_v20 = vld [vmem:[#allocation9 + $0x658] sm:$0xff] }
 0x55a   :  { %v6652_v58 = vpack.c.bf16 %v3746_v20, %v3744_v53 }
 0x55b   :  { %3247 = vmatmul.mubr.f32.gmra.mrb[90].mxu1 %v3040_v44 }
 0x55c   :  { %6635 = vmatpush1.bf16.msra.mxu1 %v6634_v14 }
 0x55d   :  { %6637 = vmatprep.subr.bf16.mxu1 %v6636_v19 }
 0x560   :  { %6639 = vmatpush1.bf16.msra.mxu1 %v6638_v62  ;;  %v3743_v62 = vld [vmem:[#allocation9 + $0x640] sm:$0xff] }
 0x561   :  { %6641 = vmatprep.subr.bf16.mxu1 %v6640_v63 }
 0x564   :  { %6643 = vmatpush1.bf16.msra.mxu1 %v6642_v25  ;;  %v3748_v25 = vld [vmem:[#allocation9 + $0x668] sm:$0xff] }
 0x565   :  { %6645 = vmatprep.subr.bf16.mxu1 %v6644_v24 }
 0x5fa   :  { %v3170_v61 = vpop.f32.mrb[64].mxu1 }
 0x5fb   :  { %v3172_v28 = vpop.f32.mrb[65].mxu1  ;;  %v3171_v34 = vadd.f32 %v3170_v61, %v9473_v29  ;;  %v6654_v61 = vpack.c.bf16 %v3745_v59, %v3743_v62  ;;  %v3757_v62 = vld [vmem:[#allocation9 + $0x6b0] sm:$0xff] }
 0x5fc   :  { %v3173_v30 = vadd.f32 %v3172_v28, %v9469_v48 }
 0x5fd   :  { %v9481_v26 = vmax.f32 %v3171_v34, 0.0 }
 0x5fe   :  { %v3176_v31 = vpop.f32.mrb[66].mxu1  ;;  %v9478_v36 = vmax.f32 %v3173_v30, 0.0 }
 0x5ff   :  { %v3177_v12 = vadd.f32 %v3176_v31, %v9473_v29  ;;  %v3178_v60 = vpop.f32.mrb[67].mxu1  ;;  %v3438_v38 = vrot.slane %v9481_v26, 1  ;;  %v6656_v31 = vpack.c.bf16 %v3750_v55, %v3748_v25 }
 0x600   :  { %v3179_v42 = vadd.f32 %v3178_v60, %v9469_v48  ;;  %v3441_v33 = vrot.slane %v9478_v36, 1  ;;  %v3749_v60 = vld [vmem:[#allocation9 + $0x670] sm:$0xff] }
 0x601   :  { %v9483_v9 = vmax.f32 %v3177_v12, 0.0  ;;  %v3747_v12 = vld [vmem:[#allocation9 + $0x660] sm:$0xff] }
 0x602   :  { %v9485_v5 = vmax.f32 %v3179_v42, 0.0  ;;  %v3182_v1 = vpop.f32.mrb[68].mxu1 }
 0x603   :  { %v3183_v45 = vadd.f32 %v3182_v1, %v9473_v29  ;;  %v3184_v32 = vpop.f32.mrb[69].mxu1  ;;  %v3439_v37 = vrot.slane %v9483_v9, 1 }
 0x604   :  { %v3185_v11 = vadd.f32 %v3184_v32, %v9469_v48  ;;  %v3442_v41 = vrot.slane %v9485_v5, 1 }
 0x605   :  { %v9492_v18 = vmax.f32 %v3183_v45, 0.0  ;;  %v3440_v44 = vsel %vm294_vm0, %v3438_v38, %v3439_v37  ;;  %v3754_v45 = vld [vmem:[#allocation9 + $0x698] sm:$0xff] }
 0x606   :  { %v9495_v43 = vmax.f32 %v3185_v11, 0.0  ;;  %v3188_v16 = vpop.f32.mrb[70].mxu1  ;;  %v3443_v7 = vsel %vm294_vm0, %v3441_v33, %v3442_v41  ;;  %v6658_v11 = vpack.c.bf16 %v3749_v60, %v3747_v12  ;;  %v3759_v12 = vld [vmem:[#allocation9 + $0x6c0] sm:$0xff]  ;;  %v3761_v60 = vld [vmem:[#allocation9 + $0x6d0] sm:$0xff] }
 0x607   :  { %v3189_v13 = vadd.f32 %v3188_v16, %v9473_v29  ;;  %v3190_v47 = vpop.f32.mrb[71].mxu1  ;;  %3584 = vmatprep.mubr.f32.mxu1 %v3443_v7  ;;  %v3444_v35 = vrot.slane %v9492_v18, 1  ;;  %v3751_v16 = vld [vmem:[#allocation9 + $0x680] sm:$0xff]  ;;  %v3753_v7 = vld [vmem:[#allocation9 + $0x690] sm:$0xff] }
 0x608   :  { %v3191_v46 = vadd.f32 %v3190_v47, %v9469_v48  ;;  %3585 = vmatmul.mubr.f32.vlgmr.msra.gmra.mrb[92].mxu1 %v3440_v44  ;;  %v3446_v17 = vrot.slane %v9495_v43, 1  ;;  %v3758_v47 = vld [vmem:[#allocation9 + $0x6b8] sm:$0xff] }
 0x609   :  { %v9503_v14 = vmax.f32 %v3189_v13, 0.0  ;;  %6647 = vmatpush1.bf16.msra.mxu1 %v6646_v6  ;;  %v3445_v0 = vsel %vm294_vm0, %v3439_v37, %v3444_v35  ;;  %v6660_v6 = vpack.c.bf16 %v3754_v45, %v3752_v56  ;;  %v3756_v13 = vld [vmem:[#allocation9 + $0x6a8] sm:$0xff]  ;;  %v3766_v45 = vld [vmem:[#allocation9 + $0x6f8] sm:$0xff] }
 0x60a   :  { %v9505_v3 = vmax.f32 %v3191_v46, 0.0  ;;  %v3194_v19 = vpop.f32.mrb[72].mxu1  ;;  %v3447_v15 = vsel %vm294_vm0, %v3442_v41, %v3446_v17  ;;  %6649 = vmatprep.subr.bf16.mxu1 %v6648_v50  ;;  %v6662_v46 = vpack.c.bf16 %v3753_v7, %v3751_v16  ;;  %v3764_v56 = vld [vmem:[#allocation9 + $0x6e8] sm:$0xff] }
 0x60b   :  { %v3195_v27 = vadd.f32 %v3194_v19, %v9473_v29  ;;  %v3196_v63 = vpop.f32.mrb[73].mxu1  ;;  %3590 = vmatprep.mubr.f32.mxu1 %v3447_v15  ;;  %v3448_v8 = vrot.slane %v9503_v14, 1  ;;  %v6664_v15 = vpack.c.bf16 %v3758_v47, %v3756_v13  ;;  %v6672_v7 = vpack.c.bf16 %v3766_v45, %v3764_v56  ;;  %v3771_v45 = vld [vmem:[#allocation9 + $0x720] sm:$0xff] }
 0x60c   :  { %v3197_v51 = vadd.f32 %v3196_v63, %v9469_v48  ;;  %3591 = vmatmul.mubr.f32.gmra.mrb[94].mxu1 %v3445_v0  ;;  %v3450_v24 = vrot.slane %v9505_v3, 1  ;;  %v3760_v0 = vld [vmem:[#allocation9 + $0x6c8] sm:$0xff] }
 0x60d   :  { %v9513_v40 = vmax.f32 %v3195_v27, 0.0  ;;  %6651 = vmatpush1.bf16.msra.mxu1 %v6650_v4  ;;  %v3449_v57 = vsel %vm294_vm0, %v3444_v35, %v3448_v8 }
 0x60e   :  { %v9516_v28 = vmax.f32 %v3197_v51, 0.0  ;;  %v3200_v30 = vpop.f32.mrb[74].mxu1  ;;  %v3451_v34 = vsel %vm294_vm0, %v3446_v17, %v3450_v24  ;;  %6653 = vmatprep.subr.bf16.mxu1 %v6652_v58  ;;  %v3755_v58 = vld [vmem:[#allocation9 + $0x6a0] sm:$0xff] }
 0x60f   :  { %v3201_v42 = vadd.f32 %v3200_v30, %v9473_v29  ;;  %v3202_v1 = vpop.f32.mrb[75].mxu1  ;;  %3596 = vmatprep.mubr.f32.mxu1 %v3451_v34  ;;  %v3452_v49 = vrot.slane %v9513_v40, 1 }
 0x610   :  { %v3203_v32 = vadd.f32 %v3202_v1, %v9469_v48  ;;  %3597 = vmatmul.mubr.f32.gmra.mrb[96].mxu1 %v3449_v57  ;;  %v3454_v37 = vrot.slane %v9516_v28, 1  ;;  %v6666_v57 = vpack.c.bf16 %v3757_v62, %v3755_v58 }
 0x611   :  { %v9523_v2 = vmax.f32 %v3201_v42, 0.0  ;;  %6655 = vmatpush1.bf16.msra.mxu1 %v6654_v61  ;;  %v3453_v39 = vsel %vm294_vm0, %v3448_v8, %v3452_v49  ;;  %v3762_v8 = vld [vmem:[#allocation9 + $0x6d8] sm:$0xff] }
 0x612   :  { %v9526_v33 = vmax.f32 %v3203_v32, 0.0  ;;  %v3206_v41 = vpop.f32.mrb[76].mxu1  ;;  %v3455_v38 = vsel %vm294_vm0, %v3450_v24, %v3454_v37  ;;  %6657 = vmatprep.subr.bf16.mxu1 %v6656_v31  ;;  %v6668_v31 = vpack.c.bf16 %v3762_v8, %v3760_v0  ;;  %v3769_v0 = vld [vmem:[#allocation9 + $0x710] sm:$0xff] }
 0x613   :  { %v3207_v50 = vadd.f32 %v3206_v41, %v9473_v29  ;;  %v3208_v10 = vpop.f32.mrb[77].mxu1  ;;  %3602 = vmatprep.mubr.f32.mxu1 %v3455_v38  ;;  %v3456_v52 = vrot.slane %v9523_v2, 1  ;;  %v6670_v41 = vpack.c.bf16 %v3761_v60, %v3759_v12 }
 0x614   :  { %v3209_v44 = vadd.f32 %v3208_v10, %v9469_v48  ;;  %3603 = vmatmul.mubr.f32.gmra.mrb[98].mxu1 %v3453_v39  ;;  %v3458_v35 = vrot.slane %v9526_v33, 1  ;;  %v3765_v10 = vld [vmem:[#allocation9 + $0x6f0] sm:$0xff] }
 0x615   :  { %v9533_v53 = vmax.f32 %v3207_v50, 0.0  ;;  %6659 = vmatpush1.bf16.msra.mxu1 %v6658_v11  ;;  %v3457_v20 = vsel %vm294_vm0, %v3452_v49, %v3456_v52  ;;  %v3763_v50 = vld [vmem:[#allocation9 + $0x6e0] sm:$0xff] }
 0x616   :  { %v9536_v17 = vmax.f32 %v3209_v44, 0.0  ;;  %v3212_v4 = vpop.f32.mrb[78].mxu1  ;;  %v3459_v19 = vsel %vm294_vm0, %v3454_v37, %v3458_v35  ;;  %6661 = vmatprep.subr.bf16.mxu1 %v6660_v6  ;;  %v3768_v44 = vld [vmem:[#allocation9 + $0x708] sm:$0xff] }
 0x617   :  { %v3213_v59 = vadd.f32 %v3212_v4, %v9473_v29  ;;  %v3214_v27 = vpop.f32.mrb[79].mxu1  ;;  %3608 = vmatprep.mubr.f32.mxu1 %v3459_v19  ;;  %v3460_v63 = vrot.slane %v9533_v53, 1 }
 0x618   :  { %v3215_v25 = vadd.f32 %v3214_v27, %v9469_v48  ;;  %3609 = vmatmul.mubr.f32.gmra.mrb[100].mxu1 %v3457_v20  ;;  %v3462_v55 = vrot.slane %v9536_v17, 1 }
 0x619   :  { %v9543_v51 = vmax.f32 %v3213_v59, 0.0  ;;  %6663 = vmatpush1.bf16.msra.mxu1 %v6662_v46  ;;  %v3461_v24 = vsel %vm294_vm0, %v3456_v52, %v3460_v63 }
 0x61a   :  { %v9546_v61 = vmax.f32 %v3215_v25, 0.0  ;;  %v3218_v30 = vpop.f32.mrb[80].mxu1  ;;  %v3463_v34 = vsel %vm294_vm0, %v3458_v35, %v3462_v55  ;;  %6665 = vmatprep.subr.bf16.mxu1 %v6664_v15  ;;  %v3770_v35 = vld [vmem:[#allocation9 + $0x718] sm:$0xff]  ;;  %v6674_v15 = vpack.c.bf16 %v3765_v10, %v3763_v50 }
 0x61b   :  { %v3219_v42 = vadd.f32 %v3218_v30, %v9473_v29  ;;  %v3220_v1 = vpop.f32.mrb[81].mxu1  ;;  %3614 = vmatprep.mubr.f32.mxu1 %v3463_v34  ;;  %v3464_v49 = vrot.slane %v9543_v51, 1  ;;  %v6676_v27 = vpack.c.bf16 %v3770_v35, %v3768_v44 }
 0x61c   :  { %v3221_v32 = vadd.f32 %v3220_v1, %v9469_v48  ;;  %3615 = vmatmul.mubr.f32.gmra.mrb[102].mxu1 %v3461_v24  ;;  %v3466_v37 = vrot.slane %v9546_v61, 1  ;;  %v3772_v24 = vld [vmem:[#allocation9 + $0x728] sm:$0xff] }
 0x61d   :  { %v9553_v39 = vmax.f32 %v3219_v42, 0.0  ;;  %6667 = vmatpush1.bf16.msra.mxu1 %v6666_v57  ;;  %v3465_v11 = vsel %vm294_vm0, %v3460_v63, %v3464_v49  ;;  %v3767_v63 = vld [vmem:[#allocation9 + $0x700] sm:$0xff]  ;;  %v3774_v57 = vld [vmem:[#allocation9 + $0x738] sm:$0xff] }
 0x61e   :  { %v9556_v38 = vmax.f32 %v3221_v32, 0.0  ;;  %v3224_v6 = vpop.f32.mrb[82].mxu1  ;;  %v3467_v16 = vsel %vm294_vm0, %v3462_v55, %v3466_v37  ;;  %6669 = vmatprep.subr.bf16.mxu1 %v6668_v31  ;;  %v6678_v60 = vpack.c.bf16 %v3769_v0, %v3767_v63  ;;  %v6680_v56 = vpack.c.bf16 %v3774_v57, %v3772_v24  ;;  %v3773_v32 = vld [vmem:[#allocation9 + $0x730] sm:$0xff]  ;;  %v3782_v63 = vld [vmem:[#allocation9 + $0x778] sm:$0xff] }
 0x61f   :  { %v3225_v52 = vadd.f32 %v3224_v6, %v9473_v29  ;;  %v3226_v13 = vpop.f32.mrb[83].mxu1  ;;  %3620 = vmatprep.mubr.f32.mxu1 %v3467_v16  ;;  %v3468_v47 = vrot.slane %v9553_v39, 1  ;;  %v3776_v6 = vld [vmem:[#allocation9 + $0x748] sm:$0xff]  ;;  %v3778_v16 = vld [vmem:[#allocation9 + $0x758] sm:$0xff] }
 0x620   :  { %v3227_v20 = vadd.f32 %v3226_v13, %v9469_v48  ;;  %3621 = vmatmul.mubr.f32.gmra.mrb[104].mxu1 %v3465_v11  ;;  %v3470_v46 = vrot.slane %v9556_v38, 1  ;;  %v6682_v13 = vpack.c.bf16 %v3773_v32, %v3771_v45  ;;  %v3784_v32 = vld [vmem:[#allocation9 + $0x788] sm:$0xff] }
 0x621   :  { %v9563_v4 = vmax.f32 %v3225_v52, 0.0  ;;  %6671 = vmatpush1.bf16.msra.mxu1 %v6670_v41  ;;  %v3469_v19 = vsel %vm294_vm0, %v3464_v49, %v3468_v47 }
 0x622   :  { %v9566_v58 = vmax.f32 %v3227_v20, 0.0  ;;  %v3230_v62 = vpop.f32.mrb[84].mxu1  ;;  %v3471_v59 = vsel %vm294_vm0, %v3466_v37, %v3470_v46  ;;  %6673 = vmatprep.subr.bf16.mxu1 %v6672_v7  ;;  %v6684_v20 = vpack.c.bf16 %v3778_v16, %v3776_v6 }
 0x623   :  { %v3231_v8 = vadd.f32 %v3230_v62, %v9473_v29  ;;  %v3232_v25 = vpop.f32.mrb[85].mxu1  ;;  %3626 = vmatprep.mubr.f32.mxu1 %v3471_v59  ;;  %v3472_v55 = vrot.slane %v9563_v4, 1 }
 0x624   :  { %v3233_v30 = vadd.f32 %v3232_v25, %v9469_v48  ;;  %3627 = vmatmul.mubr.f32.gmra.mrb[106].mxu1 %v3469_v19  ;;  %v3474_v34 = vrot.slane %v9566_v58, 1  ;;  %v3777_v19 = vld [vmem:[#allocation9 + $0x750] sm:$0xff] }
 0x625   :  { %v9573_v31 = vmax.f32 %v3231_v8, 0.0  ;;  %6675 = vmatpush1.bf16.msra.mxu1 %v6674_v15  ;;  %v3473_v12 = vsel %vm294_vm0, %v3468_v47, %v3472_v55 }
 0x626   :  { %v9576_v42 = vmax.f32 %v3233_v30, 0.0  ;;  %v3236_v1 = vpop.f32.mrb[86].mxu1  ;;  %v3475_v49 = vsel %vm294_vm0, %v3470_v46, %v3474_v34  ;;  %6677 = vmatprep.subr.bf16.mxu1 %v6676_v27  ;;  %v3775_v46 = vld [vmem:[#allocation9 + $0x740] sm:$0xff]  ;;  %v3780_v27 = vld [vmem:[#allocation9 + $0x768] sm:$0xff] }
 0x627   :  { %v3237_v37 = vadd.f32 %v3236_v1, %v9473_v29  ;;  %v3238_v11 = vpop.f32.mrb[87].mxu1  ;;  %3632 = vmatprep.mubr.f32.mxu1 %v3475_v49  ;;  %v3476_v41 = vrot.slane %v9573_v31, 1  ;;  %v6686_v24 = vpack.c.bf16 %v3777_v19, %v3775_v46  ;;  %v3781_v1 = vld [vmem:[#allocation9 + $0x770] sm:$0xff] }
 0x628   :  { %v3239_v7 = vadd.f32 %v3238_v11, %v9469_v48  ;;  %3633 = vmatmul.mubr.f32.gmra.mrb[108].mxu1 %v3473_v12  ;;  %v3478_v50 = vrot.slane %v9576_v42, 1  ;;  %v6688_v12 = vpack.c.bf16 %v3782_v63, %v3780_v27  ;;  %v3787_v27 = vld [vmem:[#allocation9 + $0x7a0] sm:$0xff]  ;;  %v3789_v63 = vld [vmem:[#allocation9 + $0x7b0] sm:$0xff] }
 0x629   :  { %v9583_v10 = vmax.f32 %v3237_v37, 0.0  ;;  %6679 = vmatpush1.bf16.msra.mxu1 %v6678_v60  ;;  %v3477_v52 = vsel %vm294_vm0, %v3472_v55, %v3476_v41  ;;  %v3779_v60 = vld [vmem:[#allocation9 + $0x760] sm:$0xff]  ;;  %v3786_v37 = vld [vmem:[#allocation9 + $0x798] sm:$0xff] }
 0x62a   :  { %v9586_v47 = vmax.f32 %v3239_v7, 0.0  ;;  %v3242_v44 = vpop.f32.mrb[88].mxu1  ;;  %v3479_v35 = vsel %vm294_vm0, %v3474_v34, %v3478_v50  ;;  %6681 = vmatprep.subr.bf16.mxu1 %v6680_v56  ;;  %v6690_v7 = vpack.c.bf16 %v3781_v1, %v3779_v60  ;;  %v3793_v60 = vld [vmem:[#allocation9 + $0x7d0] sm:$0xff]  ;;  %v3796_v1 = vld [vmem:[#allocation9 + $0x7e8] sm:$0xff] }
 0x62b   :  { %v3243_v15 = vadd.f32 %v3242_v44, %v9473_v29  ;;  %v3244_v62 = vpop.f32.mrb[89].mxu1  ;;  %3638 = vmatprep.mubr.f32.mxu1 %v3479_v35  ;;  %v3480_v59 = vrot.slane %v9583_v10, 1  ;;  %v3785_v44 = vld [vmem:[#allocation9 + $0x790] sm:$0xff]  ;;  %v3788_v35 = vld [vmem:[#allocation9 + $0x7a8] sm:$0xff] }
 0x62c   :  { %v3245_v0 = vadd.f32 %v3244_v62, %v9469_v48  ;;  %3639 = vmatmul.mubr.f32.gmra.mrb[110].mxu1 %v3477_v52  ;;  %v3482_v8 = vrot.slane %v9586_v47, 1  ;;  %v6692_v52 = vpack.c.bf16 %v3786_v37, %v3784_v32  ;;  %v3795_v37 = vld [vmem:[#allocation9 + $0x7e0] sm:$0xff] }
 0x62d   :  { %v9593_v25 = vmax.f32 %v3243_v15, 0.0  ;;  %6683 = vmatpush1.bf16.msra.mxu1 %v6682_v13  ;;  %v3481_v55 = vsel %vm294_vm0, %v3476_v41, %v3480_v59  ;;  %v3783_v13 = vld [vmem:[#allocation9 + $0x780] sm:$0xff] }
 0x62e   :  { %v9596_v57 = vmax.f32 %v3245_v0, 0.0  ;;  %v3248_v30 = vpop.f32.mrb[90].mxu1  ;;  %v3483_v34 = vsel %vm294_vm0, %v3478_v50, %v3482_v8  ;;  %6685 = vmatprep.subr.bf16.mxu1 %v6684_v20  ;;  %v3790_v20 = vld [vmem:[#allocation9 + $0x7b8] sm:$0xff]  ;;  %v6694_v15 = vpack.c.bf16 %v3785_v44, %v3783_v13  ;;  %v3792_v0 = vld [vmem:[#allocation9 + $0x7c8] sm:$0xff]  ;;  %v4033_v13 = vld [vmem:[#allocation9 + $0x810] sm:$0xff]  ;;  %v3800_v44 = vrot.slane %v9483_v9, 3 }
 0x62f   :  { %v3249_v49 = vadd.f32 %v3248_v30, %v9473_v29  ;;  %v3250_v56 = vpop.f32.mrb[91].mxu1  ;;  %3644 = vmatprep.mubr.f32.mxu1 %v3483_v34  ;;  %v3484_v45 = vrot.slane %v9593_v25, 1  ;;  %v3802_v30 = vrot.slane %v9478_v36, 3 }
 0x630   :  { %v3251_v11 = vadd.f32 %v3250_v56, %v9469_v48  ;;  %3645 = vmatmul.mubr.f32.gmra.mrb[112].mxu1 %v3481_v55  ;;  %v3486_v41 = vrot.slane %v9596_v57, 1  ;;  %v3803_v55 = vrot.slane %v9485_v5, 3 }
 0x631   :  { %v9603_v6 = vmax.f32 %v3249_v49, 0.0  ;;  %6687 = vmatpush1.bf16.msra.mxu1 %v6686_v24  ;;  %v3485_v16 = vsel %vm294_vm0, %v3480_v59, %v3484_v45  ;;  %v6696_v59 = vpack.c.bf16 %v3790_v20, %v3788_v35  ;;  %v6698_v24 = vpack.c.bf16 %v3789_v63, %v3787_v27  ;;  %v3798_v49 = vld [vmem:[#allocation9 + $0x7f8] sm:$0xff] }
 0x632   :  { %v9606_v50 = vmax.f32 %v3251_v11, 0.0  ;;  %v3487_v29 = vsel %vm294_vm0, %v3482_v8, %v3486_v41  ;;  %6689 = vmatprep.subr.bf16.mxu1 %v6688_v12  ;;  %v3794_v8 = vld [vmem:[#allocation9 + $0x7d8] sm:$0xff]  ;;  %v3791_v12 = vld [vmem:[#allocation9 + $0x7c0] sm:$0xff]  ;;  %v3804_v56 = vsel %vm698_vm2, %v3802_v30, %v3803_v55  ;;  %v6704_v32 = vpack.c.bf16 %v3798_v49, %v3796_v1  ;;  %v3797_v11 = vld [vmem:[#allocation9 + $0x7f0] sm:$0xff] }
 0x633   :  { %3650 = vmatprep.mubr.f32.mxu1 %v3487_v29  ;;  %v3488_v48 = vrot.slane %v9603_v6, 1  ;;  %v6700_v34 = vpack.c.bf16 %v3794_v8, %v3792_v0  ;;  %v4038_v35 = vld [vmem:[#allocation9 + $0x838] sm:$0xff]  ;;  %v3807_v20 = vrot.slane %v9495_v43, 3  ;;  %v3805_v63 = vrot.slane %v9492_v18, 3  ;;  %v4040_v0 = vld [vmem:[#allocation9 + $0x848] sm:$0xff]  ;;  %v4041_v1 = vld [vmem:[#allocation9 + $0x850] sm:$0xff] }
 0x634   :  { %3651 = vmatmul.mubr.f32.gmra.mrb[114].mxu1 %v3485_v16  ;;  %v3490_v46 = vrot.slane %v9606_v50, 1  ;;  %v4034_v16 = vld [vmem:[#allocation9 + $0x818] sm:$0xff]  ;;  %v3811_v30 = vrot.slane %v9505_v3, 3 }
 0x635   :  { %6691 = vmatpush1.bf16.msra.mxu1 %v6690_v7  ;;  %v3489_v19 = vsel %vm294_vm0, %v3484_v45, %v3488_v48  ;;  %v6702_v45 = vpack.c.bf16 %v3793_v60, %v3791_v12  ;;  %v6706_v7 = vpack.c.bf16 %v3797_v11, %v3795_v37  ;;  %v4042_v8 = vld [vmem:[#allocation9 + $0x858] sm:$0xff]  ;;  %v4039_v60 = vld [vmem:[#allocation9 + $0x840] sm:$0xff]  ;;  %v3806_v49 = vsel %vm698_vm2, %v3800_v44, %v3805_v63 }
 0x636   :  { %v3491_v62 = vsel %vm294_vm0, %v3486_v41, %v3490_v46  ;;  %6693 = vmatprep.subr.bf16.mxu1 %v6692_v52  ;;  %v4032_v41 = vld [vmem:[#allocation9 + $0x808] sm:$0xff]  ;;  %v4031_v52 = vld [vmem:[#allocation9 + $0x800] sm:$0xff]  ;;  %v6716_v12 = vpack.c.bf16 %v4042_v8, %v4040_v0  ;;  %v3812_v37 = vsel %vm698_vm2, %v3807_v20, %v3811_v30  ;;  %v6718_v11 = vpack.c.bf16 %v4041_v1, %v4039_v60 }
 0x637   :  { %3656 = vmatprep.mubr.f32.mxu1 %v3491_v62  ;;  %v6708_v29 = vpack.c.bf16 %v4034_v16, %v4032_v41  ;;  %v4035_v62 = vld [vmem:[#allocation9 + $0x820] sm:$0xff]  ;;  %v3823_v8 = vrot.slane %v9536_v17, 3  ;;  %v3821_v1 = vrot.slane %v9533_v53, 3 }
 0x638   :  { %3657 = vmatmul.mubr.f32.gmra.mrb[116].mxu1 %v3489_v19  ;;  %v6710_v19 = vpack.c.bf16 %v4033_v13, %v4031_v52  ;;  %v4043_v16 = vld [vmem:[#allocation9 + $0x860] sm:$0xff]  ;;  %v3813_v52 = vrot.slane %v9513_v40, 3  ;;  %v4048_v13 = vld [vmem:[#allocation9 + $0x888] sm:$0xff] }
 0x639   :  { %6695 = vmatpush1.bf16.msra.mxu1 %v6694_v15  ;;  %3662 = vmatprep.mubr.f32.mxu1 %v3490_v46  ;;  %v3799_v46 = vrot.slane %v9481_v26, 3 }
 0x63a   :  { %6697 = vmatprep.subr.bf16.mxu1 %v6696_v59  ;;  %v4037_v59 = vld [vmem:[#allocation9 + $0x830] sm:$0xff] }
 0x63b   :  { %v3801_v27 = vsel %vm698_vm2, %v3799_v46, %v3800_v44  ;;  %v4050_v44 = vld [vmem:[#allocation9 + $0x898] sm:$0xff] }
 0x63c   :  { %3663 = vmatmul.mubr.f32.gmra.mrb[118].mxu1 %v3488_v48  ;;  %v4036_v48 = vld [vmem:[#allocation9 + $0x828] sm:$0xff]  ;;  %v6724_v46 = vpack.c.bf16 %v4050_v44, %v4048_v13  ;;  %v3831_v44 = vrot.slane %v9556_v38, 3 }
 0x63d   :  { %6699 = vmatpush1.bf16.msra.mxu1 %v6698_v24  ;;  %3945 = vmatprep.mubr.f32.mxu1 %v3804_v56  ;;  %v6712_v15 = vpack.c.bf16 %v4038_v35, %v4036_v48  ;;  %v3808_v24 = vsel %vm698_vm2, %v3803_v55, %v3807_v20  ;;  %v3809_v56 = vrot.slane %v9503_v14, 3  ;;  %v3815_v55 = vrot.slane %v9516_v28, 3 }
 0x63e   :  { %6701 = vmatprep.subr.bf16.mxu1 %v6700_v34  ;;  %v6714_v34 = vpack.c.bf16 %v4037_v59, %v4035_v62  ;;  %v3819_v35 = vrot.slane %v9526_v33, 3  ;;  %v3817_v59 = vrot.slane %v9523_v2, 3 }
 0x63f   :  { %v3816_v48 = vsel %vm698_vm2, %v3811_v30, %v3815_v55  ;;  %v3814_v62 = vsel %vm698_vm2, %v3809_v56, %v3813_v52 }
 0x640   :  { %v3820_v0 = vsel %vm698_vm2, %v3815_v55, %v3819_v35  ;;  %v3818_v60 = vsel %vm698_vm2, %v3813_v52, %v3817_v59  ;;  %v4062_v52 = vld [vmem:[#allocation9 + $0x8f8] sm:$0xff] }
 0x641   :  { %6703 = vmatpush1.bf16.msra.mxu1 %v6702_v45  ;;  %v4044_v45 = vld [vmem:[#allocation9 + $0x868] sm:$0xff] }
 0x642   :  { %6705 = vmatprep.subr.bf16.mxu1 %v6704_v32  ;;  %v4046_v32 = vld [vmem:[#allocation9 + $0x878] sm:$0xff] }
 0x643   :  { %v6720_v41 = vpack.c.bf16 %v4046_v32, %v4044_v45  ;;  %v3824_v45 = vsel %vm698_vm2, %v3819_v35, %v3823_v8  ;;  %v3827_v32 = vrot.slane %v9546_v61, 3 }
 0x645   :  { %6707 = vmatpush1.bf16.msra.mxu1 %v6706_v7  ;;  %v4045_v7 = vld [vmem:[#allocation9 + $0x870] sm:$0xff]  ;;  %v3828_v13 = vsel %vm698_vm2, %v3823_v8, %v3827_v32 }
 0x646   :  { %6709 = vmatprep.subr.bf16.mxu1 %v6708_v29  ;;  %v3810_v29 = vsel %vm698_vm2, %v3805_v63, %v3809_v56  ;;  %v6722_v20 = vpack.c.bf16 %v4045_v7, %v4043_v16  ;;  %v4054_v63 = vld [vmem:[#allocation9 + $0x8b8] sm:$0xff]  ;;  %v3822_v16 = vsel %vm698_vm2, %v3817_v59, %v3821_v1  ;;  %v3825_v7 = vrot.slane %v9543_v51, 3 }
 0x647   :  { %v4058_v56 = vld [vmem:[#allocation9 + $0x8d8] sm:$0xff] }
 0x648   :  { %3946 = vmatmul.mubr.f32.vlgmr.msra.gmra.mrb[92].mxu1 %v3801_v27  ;;  %v4052_v27 = vld [vmem:[#allocation9 + $0x8a8] sm:$0xff]  ;;  %v4066_v59 = vld [vmem:[#allocation9 + $0x918] sm:$0xff] }
 0x649   :  { %3951 = vmatprep.mubr.f32.mxu1 %v3808_v24  ;;  %6711 = vmatpush1.bf16.msra.mxu1 %v6710_v19  ;;  %v4047_v19 = vld [vmem:[#allocation9 + $0x880] sm:$0xff]  ;;  %v6728_v30 = vpack.c.bf16 %v4054_v63, %v4052_v27  ;;  %v3832_v27 = vsel %vm698_vm2, %v3827_v32, %v3831_v44  ;;  %v3835_v63 = vrot.slane %v9566_v58, 3 }
 0x64a   :  { %6713 = vmatprep.subr.bf16.mxu1 %v6712_v15  ;;  %v4049_v15 = vld [vmem:[#allocation9 + $0x890] sm:$0xff] }
 0x64b   :  { %v6726_v24 = vpack.c.bf16 %v4049_v15, %v4047_v19  ;;  %v3826_v19 = vsel %vm698_vm2, %v3821_v1, %v3825_v7  ;;  %v3829_v15 = vrot.slane %v9553_v39, 3  ;;  %v4070_v1 = vld [vmem:[#allocation9 + $0x938] sm:$0xff] }
 0x64c   :  { %3952 = vmatmul.mubr.f32.gmra.mrb[94].mxu1 %v3806_v49  ;;  %v4056_v49 = vld [vmem:[#allocation9 + $0x8c8] sm:$0xff] }
 0x64d   :  { %3957 = vmatprep.mubr.f32.mxu1 %v3812_v37  ;;  %6715 = vmatpush1.bf16.msra.mxu1 %v6714_v34  ;;  %v4051_v34 = vld [vmem:[#allocation9 + $0x8a0] sm:$0xff]  ;;  %v6732_v55 = vpack.c.bf16 %v4058_v56, %v4056_v49  ;;  %v3836_v49 = vsel %vm698_vm2, %v3831_v44, %v3835_v63  ;;  %v3839_v56 = vrot.slane %v9576_v42, 3 }
 0x64e   :  { %6717 = vmatprep.subr.bf16.mxu1 %v6716_v12  ;;  %v4053_v12 = vld [vmem:[#allocation9 + $0x8b0] sm:$0xff] }
 0x64f   :  { %v6730_v37 = vpack.c.bf16 %v4053_v12, %v4051_v34  ;;  %v3830_v34 = vsel %vm698_vm2, %v3825_v7, %v3829_v15  ;;  %v3833_v12 = vrot.slane %v9563_v4, 3  ;;  %v4074_v7 = vld [vmem:[#allocation9 + $0x958] sm:$0xff] }
 0x650   :  { %3958 = vmatmul.mubr.f32.gmra.mrb[96].mxu1 %v3810_v29  ;;  %v4060_v29 = vld [vmem:[#allocation9 + $0x8e8] sm:$0xff] }
 0x651   :  { %3963 = vmatprep.mubr.f32.mxu1 %v3816_v48  ;;  %6719 = vmatpush1.bf16.msra.mxu1 %v6718_v11  ;;  %v4055_v11 = vld [vmem:[#allocation9 + $0x8c0] sm:$0xff]  ;;  %v6736_v35 = vpack.c.bf16 %v4062_v52, %v4060_v29  ;;  %v3840_v29 = vsel %vm698_vm2, %v3835_v63, %v3839_v56  ;;  %v3843_v52 = vrot.slane %v9586_v47, 3 }
 0x652   :  { %6721 = vmatprep.subr.bf16.mxu1 %v6720_v41  ;;  %v4057_v41 = vld [vmem:[#allocation9 + $0x8d0] sm:$0xff] }
 0x653   :  { %v6734_v48 = vpack.c.bf16 %v4057_v41, %v4055_v11  ;;  %v3834_v11 = vsel %vm698_vm2, %v3829_v15, %v3833_v12  ;;  %v3837_v41 = vrot.slane %v9573_v31, 3  ;;  %v4078_v15 = vld [vmem:[#allocation9 + $0x978] sm:$0xff] }
 0x654   :  { %3964 = vmatmul.mubr.f32.gmra.mrb[98].mxu1 %v3814_v62  ;;  %v4064_v62 = vld [vmem:[#allocation9 + $0x908] sm:$0xff] }
 0x655   :  { %3969 = vmatprep.mubr.f32.mxu1 %v3820_v0  ;;  %6723 = vmatpush1.bf16.msra.mxu1 %v6722_v20  ;;  %v4059_v20 = vld [vmem:[#allocation9 + $0x8e0] sm:$0xff]  ;;  %v6740_v8 = vpack.c.bf16 %v4066_v59, %v4064_v62  ;;  %v3844_v62 = vsel %vm698_vm2, %v3839_v56, %v3843_v52  ;;  %v3847_v59 = vrot.slane %v9596_v57, 3 }
 0x656   :  { %6725 = vmatprep.subr.bf16.mxu1 %v6724_v46  ;;  %v4061_v46 = vld [vmem:[#allocation9 + $0x8f0] sm:$0xff] }
 0x657   :  { %v6738_v0 = vpack.c.bf16 %v4061_v46, %v4059_v20  ;;  %v3838_v20 = vsel %vm698_vm2, %v3833_v12, %v3837_v41  ;;  %v3841_v46 = vrot.slane %v9583_v10, 3  ;;  %v4082_v12 = vld [vmem:[#allocation9 + $0x998] sm:$0xff] }
 0x658   :  { %3970 = vmatmul.mubr.f32.gmra.mrb[100].mxu1 %v3818_v60  ;;  %v4068_v60 = vld [vmem:[#allocation9 + $0x928] sm:$0xff] }
 0x659   :  { %3975 = vmatprep.mubr.f32.mxu1 %v3824_v45  ;;  %6727 = vmatpush1.bf16.msra.mxu1 %v6726_v24  ;;  %v4063_v24 = vld [vmem:[#allocation9 + $0x900] sm:$0xff]  ;;  %v6744_v32 = vpack.c.bf16 %v4070_v1, %v4068_v60  ;;  %v3848_v60 = vsel %vm698_vm2, %v3843_v52, %v3847_v59  ;;  %v3851_v1 = vrot.slane %v9606_v50, 3 }
 0x65a   :  { %6729 = vmatprep.subr.bf16.mxu1 %v6728_v30  ;;  %v4065_v30 = vld [vmem:[#allocation9 + $0x910] sm:$0xff]  ;;  %v4083_v52 = vld [vmem:[#allocation9 + $0x9a0] sm:$0xff] }
 0x65b   :  { %v6742_v45 = vpack.c.bf16 %v4065_v30, %v4063_v24  ;;  %v3842_v24 = vsel %vm698_vm2, %v3837_v41, %v3841_v46  ;;  %v3845_v30 = vrot.slane %v9593_v25, 3  ;;  %v4086_v41 = vld [vmem:[#allocation9 + $0x9b8] sm:$0xff] }
 0x65c   :  { %3976 = vmatmul.mubr.f32.gmra.mrb[102].mxu1 %v3822_v16  ;;  %v4072_v16 = vld [vmem:[#allocation9 + $0x948] sm:$0xff] }
 0x65d   :  { %3981 = vmatprep.mubr.f32.mxu1 %v3828_v13  ;;  %6731 = vmatpush1.bf16.msra.mxu1 %v6730_v37  ;;  %v4067_v37 = vld [vmem:[#allocation9 + $0x920] sm:$0xff]  ;;  %v6748_v44 = vpack.c.bf16 %v4074_v7, %v4072_v16  ;;  %v3852_v16 = vsel %vm698_vm2, %v3847_v59, %v3851_v1  ;;  %v4089_v59 = vld [vmem:[#allocation9 + $0x9d0] sm:$0xff] }
 0x65e   :  { %6733 = vmatprep.subr.bf16.mxu1 %v6732_v55  ;;  %v4069_v55 = vld [vmem:[#allocation9 + $0x930] sm:$0xff] }
 0x65f   :  { %v6746_v13 = vpack.c.bf16 %v4069_v55, %v4067_v37  ;;  %v3846_v37 = vsel %vm698_vm2, %v3841_v46, %v3845_v30  ;;  %v3849_v55 = vrot.slane %v9603_v6, 3 }
 0x660   :  { %3982 = vmatmul.mubr.f32.gmra.mrb[104].mxu1 %v3826_v19  ;;  %v4076_v19 = vld [vmem:[#allocation9 + $0x968] sm:$0xff] }
 0x661   :  { %3987 = vmatprep.mubr.f32.mxu1 %v3832_v27  ;;  %6735 = vmatpush1.bf16.msra.mxu1 %v6734_v48  ;;  %v4071_v48 = vld [vmem:[#allocation9 + $0x940] sm:$0xff]  ;;  %v6752_v63 = vpack.c.bf16 %v4078_v15, %v4076_v19  ;;  %v4098_v19 = vrot.slane %v9478_v36, 4 }
 0x662   :  { %6737 = vmatprep.subr.bf16.mxu1 %v6736_v35  ;;  %v4073_v35 = vld [vmem:[#allocation9 + $0x950] sm:$0xff] }
 0x663   :  { %v6750_v27 = vpack.c.bf16 %v4073_v35, %v4071_v48  ;;  %v4088_v48 = vld [vmem:[#allocation9 + $0x9c8] sm:$0xff]  ;;  %v4090_v35 = vld [vmem:[#allocation9 + $0x9d8] sm:$0xff] }
 0x664   :  { %3988 = vmatmul.mubr.f32.gmra.mrb[106].mxu1 %v3830_v34  ;;  %v4080_v34 = vld [vmem:[#allocation9 + $0x988] sm:$0xff]  ;;  %v6764_v15 = vpack.c.bf16 %v4090_v35, %v4088_v48  ;;  %v3292_v35 = vld [vmem:[#allocation9 + $0x58] sm:$0xff] }
 0x665   :  { %3993 = vmatprep.mubr.f32.mxu1 %v3836_v49  ;;  %6739 = vmatpush1.bf16.msra.mxu1 %v6738_v0  ;;  %v4075_v0 = vld [vmem:[#allocation9 + $0x960] sm:$0xff]  ;;  %v6756_v56 = vpack.c.bf16 %v4082_v12, %v4080_v34  ;;  %v4093_v34 = vld [vmem:[#allocation9 + $0x9f0] sm:$0xff]  ;;  %v3282_v12 = vld [vmem:[#allocation9 + $0x8] sm:$0xff] }
 0x666   :  { %6741 = vmatprep.subr.bf16.mxu1 %v6740_v8  ;;  %v4077_v8 = vld [vmem:[#allocation9 + $0x970] sm:$0xff]  ;;  %v3290_v48 = vld [vmem:[#allocation9 + $0x48] sm:$0xff] }
 0x667   :  { %v6754_v49 = vpack.c.bf16 %v4077_v8, %v4075_v0 }
 0x668   :  { %3994 = vmatmul.mubr.f32.gmra.mrb[108].mxu1 %v3834_v11  ;;  %v4084_v11 = vld [vmem:[#allocation9 + $0x9a8] sm:$0xff] }
 0x669   :  { %3999 = vmatprep.mubr.f32.mxu1 %v3840_v29  ;;  %6743 = vmatpush1.bf16.msra.mxu1 %v6742_v45  ;;  %v4079_v45 = vld [vmem:[#allocation9 + $0x980] sm:$0xff]  ;;  %v6760_v29 = vpack.c.bf16 %v4086_v41, %v4084_v11  ;;  %v4103_v11 = vrot.slane %v9495_v43, 4  ;;  %v4095_v41 = vrot.slane %v9481_v26, 4 }
 0x66a   :  { %6745 = vmatprep.subr.bf16.mxu1 %v6744_v32  ;;  %v4081_v32 = vld [vmem:[#allocation9 + $0x990] sm:$0xff] }
 0x66b   :  { %v6758_v7 = vpack.c.bf16 %v4081_v32, %v4079_v45  ;;  %v3283_v45 = vld [vmem:[#allocation9 + $0x10] sm:$0xff]  ;;  %v4096_v32 = vrot.slane %v9483_v9, 4 }
 0x66c   :  { %4000 = vmatmul.mubr.f32.gmra.mrb[110].mxu1 %v3838_v20  ;;  %v4099_v20 = vrot.slane %v9485_v5, 4 }
 0x66d   :  { %4005 = vmatprep.mubr.f32.mxu1 %v3844_v62  ;;  %6747 = vmatpush1.bf16.msra.mxu1 %v6746_v13  ;;  %v4085_v13 = vld [vmem:[#allocation9 + $0x9b0] sm:$0xff]  ;;  %v4087_v62 = vld [vmem:[#allocation9 + $0x9c0] sm:$0xff] }
 0x66e   :  { %6749 = vmatprep.subr.bf16.mxu1 %v6748_v44  ;;  %v3850_v44 = vsel %vm698_vm2, %v3845_v30, %v3849_v55  ;;  %v6762_v46 = vpack.c.bf16 %v4085_v13, %v4083_v52  ;;  %v4100_v0 = vsel %vm1092_vm3, %v4098_v19, %v4099_v20  ;;  %v6766_v8 = vpack.c.bf16 %v4089_v59, %v4087_v62  ;;  %v4091_v30 = vld [vmem:[#allocation9 + $0x9e0] sm:$0xff]  ;;  %v3287_v52 = vld [vmem:[#allocation9 + $0x30] sm:$0xff] }
 0x66f   :  { %v4097_v13 = vsel %vm1092_vm3, %v4095_v41, %v4096_v32  ;;  %v4107_v19 = vrot.slane %v9505_v3, 4  ;;  %v6780_v62 = vpack.c.bf16 %v3292_v35, %v3290_v48  ;;  %v3289_v59 = vld [vmem:[#allocation9 + $0x40] sm:$0xff]  ;;  %v4119_v35 = vrot.slane %v9536_v17, 4 }
 0x670   :  { %4006 = vmatmul.mubr.f32.gmra.mrb[112].mxu1 %v3842_v24 }
 0x671   :  { %4011 = vmatprep.mubr.f32.mxu1 %v3848_v60  ;;  %6751 = vmatpush1.bf16.msra.mxu1 %v6750_v27  ;;  %v4092_v27 = vld [vmem:[#allocation9 + $0x9e8] sm:$0xff]  ;;  %v3284_v60 = vld [vmem:[#allocation9 + $0x18] sm:$0xff] }
 0x672   :  { %6753 = vmatprep.subr.bf16.mxu1 %v6752_v63  ;;  %v4094_v63 = vld [vmem:[#allocation9 + $0x9f8] sm:$0xff] }
 0x673   :  { %v6768_v24 = vpack.c.bf16 %v4094_v63, %v4092_v27  ;;  %v3291_v27 = vld [vmem:[#allocation9 + $0x50] sm:$0xff] }
 0x674   :  { %4012 = vmatmul.mubr.f32.gmra.mrb[114].mxu1 %v3846_v37  ;;  %v3286_v37 = vld [vmem:[#allocation9 + $0x28] sm:$0xff] }
 0x675   :  { %4017 = vmatprep.mubr.f32.mxu1 %v3852_v16  ;;  %6755 = vmatpush1.bf16.msra.mxu1 %v6754_v49  ;;  %v6772_v49 = vpack.c.bf16 %v3284_v60, %v3282_v12  ;;  %v3293_v60 = vld [vmem:[#allocation9 + $0x60] sm:$0xff] }
 0x676   :  { %6757 = vmatprep.subr.bf16.mxu1 %v6756_v56  ;;  %v3281_v56 = vld [vmem:[#allocation9] sm:$0xff] }
 0x677   :  { %v6774_v16 = vpack.c.bf16 %v3283_v45, %v3281_v56  ;;  %v4109_v56 = vrot.slane %v9513_v40, 4  ;;  %v3298_v45 = vld [vmem:[#allocation9 + $0x88] sm:$0xff] }
 0x678   :  { %4018 = vmatmul.mubr.f32.gmra.mrb[116].mxu1 %v3850_v44  ;;  %v4101_v44 = vrot.slane %v9492_v18, 4 }
 0x679   :  { %4023 = vmatprep.mubr.f32.mxu1 %v3851_v1  ;;  %6759 = vmatpush1.bf16.msra.mxu1 %v6758_v7  ;;  %v6770_v1 = vpack.c.bf16 %v4093_v34, %v4091_v30  ;;  %v4108_v30 = vsel %vm1092_vm3, %v4103_v11, %v4107_v19  ;;  %v6782_v34 = vpack.c.bf16 %v3291_v27, %v3289_v59  ;;  %v4117_v27 = vrot.slane %v9533_v53, 4 }
 0x67a   :  { %6761 = vmatprep.subr.bf16.mxu1 %v6760_v29  ;;  %v3285_v29 = vld [vmem:[#allocation9 + $0x20] sm:$0xff]  ;;  %v4102_v63 = vsel %vm1092_vm3, %v4096_v32, %v4101_v44  ;;  %v3300_v32 = vld [vmem:[#allocation9 + $0x98] sm:$0xff] }
 0x67b   :  { %v6788_v41 = vpack.c.bf16 %v3300_v32, %v3298_v45  ;;  %v4127_v32 = vrot.slane %v9556_v38, 4 }
 0x67c   :  { %4024 = vmatmul.mubr.f32.gmra.mrb[118].mxu1 %v3849_v55  ;;  %v3288_v55 = vld [vmem:[#allocation9 + $0x38] sm:$0xff] }
 0x67d   :  { %6763 = vmatpush1.bf16.msra.mxu1 %v6762_v46  ;;  %4241 = vmatprep.mubr.f32.mxu1 %v4100_v0  ;;  %v6776_v7 = vpack.c.bf16 %v3288_v55, %v3286_v37  ;;  %v4104_v46 = vsel %vm1092_vm3, %v4099_v20, %v4103_v11  ;;  %v4105_v0 = vrot.slane %v9503_v14, 4  ;;  %v4111_v20 = vrot.slane %v9516_v28, 4 }
 0x67e   :  { %6765 = vmatprep.subr.bf16.mxu1 %v6764_v15  ;;  %v6778_v15 = vpack.c.bf16 %v3287_v52, %v3285_v29  ;;  %v4115_v55 = vrot.slane %v9526_v33, 4  ;;  %v4113_v52 = vrot.slane %v9523_v2, 4 }
 0x67f   :  { %v4112_v37 = vsel %vm1092_vm3, %v4107_v19, %v4111_v20  ;;  %v4110_v29 = vsel %vm1092_vm3, %v4105_v0, %v4109_v56 }
 0x680   :  { %v4116_v48 = vsel %vm1092_vm3, %v4111_v20, %v4115_v55  ;;  %v4114_v59 = vsel %vm1092_vm3, %v4109_v56, %v4113_v52  ;;  %v3312_v56 = vld [vmem:[#allocation9 + $0xf8] sm:$0xff] }
 0x681   :  { %6767 = vmatpush1.bf16.msra.mxu1 %v6766_v8  ;;  %v3294_v8 = vld [vmem:[#allocation9 + $0x68] sm:$0xff] }
 0x682   :  { %6769 = vmatprep.subr.bf16.mxu1 %v6768_v24  ;;  %v3296_v24 = vld [vmem:[#allocation9 + $0x78] sm:$0xff] }
 0x683   :  { %v6784_v12 = vpack.c.bf16 %v3296_v24, %v3294_v8  ;;  %v4120_v8 = vsel %vm1092_vm3, %v4115_v55, %v4119_v35  ;;  %v4123_v24 = vrot.slane %v9546_v61, 4 }
 0x685   :  { %6771 = vmatpush1.bf16.msra.mxu1 %v6770_v1  ;;  %v3295_v1 = vld [vmem:[#allocation9 + $0x70] sm:$0xff]  ;;  %v4124_v45 = vsel %vm1092_vm3, %v4119_v35, %v4123_v24 }
 0x686   :  { %6773 = vmatprep.subr.bf16.mxu1 %v6772_v49  ;;  %v4106_v49 = vsel %vm1092_vm3, %v4101_v44, %v4105_v0  ;;  %v6786_v11 = vpack.c.bf16 %v3295_v1, %v3293_v60  ;;  %v3304_v44 = vld [vmem:[#allocation9 + $0xb8] sm:$0xff]  ;;  %v4118_v60 = vsel %vm1092_vm3, %v4113_v52, %v4117_v27  ;;  %v4121_v1 = vrot.slane %v9543_v51, 4 }
 0x687   :  { %v3308_v0 = vld [vmem:[#allocation9 + $0xd8] sm:$0xff] }
 0x688   :  { %4242 = vmatmul.mubr.f32.vlgmr.msra.gmra.mrb[92].mxu1 %v4097_v13  ;;  %v3302_v13 = vld [vmem:[#allocation9 + $0xa8] sm:$0xff]  ;;  %v3316_v52 = vld [vmem:[#allocation9 + $0x118] sm:$0xff] }
 0x689   :  { %4247 = vmatprep.mubr.f32.mxu1 %v4104_v46  ;;  %6775 = vmatpush1.bf16.msra.mxu1 %v6774_v16  ;;  %v3297_v16 = vld [vmem:[#allocation9 + $0x80] sm:$0xff]  ;;  %v6792_v19 = vpack.c.bf16 %v3304_v44, %v3302_v13  ;;  %v4128_v13 = vsel %vm1092_vm3, %v4123_v24, %v4127_v32  ;;  %v4131_v44 = vrot.slane %v9566_v58, 4 }
 0x68a   :  { %6777 = vmatprep.subr.bf16.mxu1 %v6776_v7  ;;  %v3299_v7 = vld [vmem:[#allocation9 + $0x90] sm:$0xff] }
 0x68b   :  { %v6790_v46 = vpack.c.bf16 %v3299_v7, %v3297_v16  ;;  %v4122_v16 = vsel %vm1092_vm3, %v4117_v27, %v4121_v1  ;;  %v4125_v7 = vrot.slane %v9553_v39, 4  ;;  %v3320_v27 = vld [vmem:[#allocation9 + $0x138] sm:$0xff] }
 0x68c   :  { %4248 = vmatmul.mubr.f32.gmra.mrb[94].mxu1 %v4102_v63  ;;  %v3306_v63 = vld [vmem:[#allocation9 + $0xc8] sm:$0xff] }
 0x68d   :  { %4253 = vmatprep.mubr.f32.mxu1 %v4108_v30  ;;  %6779 = vmatpush1.bf16.msra.mxu1 %v6778_v15  ;;  %v3301_v15 = vld [vmem:[#allocation9 + $0xa0] sm:$0xff]  ;;  %v6796_v20 = vpack.c.bf16 %v3308_v0, %v3306_v63  ;;  %v4132_v63 = vsel %vm1092_vm3, %v4127_v32, %v4131_v44  ;;  %v4135_v0 = vrot.slane %v9576_v42, 4 }
 0x68e   :  { %6781 = vmatprep.subr.bf16.mxu1 %v6780_v62  ;;  %v3303_v62 = vld [vmem:[#allocation9 + $0xb0] sm:$0xff] }
 0x68f   :  { %v6794_v30 = vpack.c.bf16 %v3303_v62, %v3301_v15  ;;  %v4126_v15 = vsel %vm1092_vm3, %v4121_v1, %v4125_v7  ;;  %v4129_v62 = vrot.slane %v9563_v4, 4  ;;  %v3324_v1 = vld [vmem:[#allocation9 + $0x158] sm:$0xff] }
 0x690   :  { %4254 = vmatmul.mubr.f32.gmra.mrb[96].mxu1 %v4106_v49  ;;  %v3310_v49 = vld [vmem:[#allocation9 + $0xe8] sm:$0xff] }
 0x691   :  { %4259 = vmatprep.mubr.f32.mxu1 %v4112_v37  ;;  %6783 = vmatpush1.bf16.msra.mxu1 %v6782_v34  ;;  %v3305_v34 = vld [vmem:[#allocation9 + $0xc0] sm:$0xff]  ;;  %v6800_v55 = vpack.c.bf16 %v3312_v56, %v3310_v49  ;;  %v4136_v49 = vsel %vm1092_vm3, %v4131_v44, %v4135_v0  ;;  %v4139_v56 = vrot.slane %v9586_v47, 4 }
 0x692   :  { %6785 = vmatprep.subr.bf16.mxu1 %v6784_v12  ;;  %v3307_v12 = vld [vmem:[#allocation9 + $0xd0] sm:$0xff] }
 0x693   :  { %v6798_v37 = vpack.c.bf16 %v3307_v12, %v3305_v34  ;;  %v4130_v34 = vsel %vm1092_vm3, %v4125_v7, %v4129_v62  ;;  %v4133_v12 = vrot.slane %v9573_v31, 4  ;;  %v3328_v7 = vld [vmem:[#allocation9 + $0x178] sm:$0xff] }
 0x694   :  { %4260 = vmatmul.mubr.f32.gmra.mrb[98].mxu1 %v4110_v29  ;;  %v3314_v29 = vld [vmem:[#allocation9 + $0x108] sm:$0xff] }
 0x695   :  { %4265 = vmatprep.mubr.f32.mxu1 %v4116_v48  ;;  %6787 = vmatpush1.bf16.msra.mxu1 %v6786_v11  ;;  %v3309_v11 = vld [vmem:[#allocation9 + $0xe0] sm:$0xff]  ;;  %v6804_v35 = vpack.c.bf16 %v3316_v52, %v3314_v29  ;;  %v4140_v29 = vsel %vm1092_vm3, %v4135_v0, %v4139_v56  ;;  %v4143_v52 = vrot.slane %v9596_v57, 4 }
 0x696   :  { %6789 = vmatprep.subr.bf16.mxu1 %v6788_v41  ;;  %v3311_v41 = vld [vmem:[#allocation9 + $0xf0] sm:$0xff] }
 0x697   :  { %v6802_v48 = vpack.c.bf16 %v3311_v41, %v3309_v11  ;;  %v4134_v11 = vsel %vm1092_vm3, %v4129_v62, %v4133_v12  ;;  %v4137_v41 = vrot.slane %v9583_v10, 4  ;;  %v3332_v62 = vld [vmem:[#allocation9 + $0x198] sm:$0xff] }
 0x698   :  { %4266 = vmatmul.mubr.f32.gmra.mrb[100].mxu1 %v4114_v59  ;;  %v3318_v59 = vld [vmem:[#allocation9 + $0x128] sm:$0xff] }
 0x699   :  { %4271 = vmatprep.mubr.f32.mxu1 %v4120_v8  ;;  %6791 = vmatpush1.bf16.msra.mxu1 %v6790_v46  ;;  %v3313_v46 = vld [vmem:[#allocation9 + $0x100] sm:$0xff]  ;;  %v6808_v24 = vpack.c.bf16 %v3320_v27, %v3318_v59  ;;  %v4144_v59 = vsel %vm1092_vm3, %v4139_v56, %v4143_v52  ;;  %v4147_v27 = vrot.slane %v9606_v50, 4 }
 0x69a   :  { %6793 = vmatprep.subr.bf16.mxu1 %v6792_v19  ;;  %v3315_v19 = vld [vmem:[#allocation9 + $0x110] sm:$0xff]  ;;  %v3333_v56 = vld [vmem:[#allocation9 + $0x1a0] sm:$0xff] }
 0x69b   :  { %v6806_v8 = vpack.c.bf16 %v3315_v19, %v3313_v46  ;;  %v4138_v46 = vsel %vm1092_vm3, %v4133_v12, %v4137_v41  ;;  %v4141_v19 = vrot.slane %v9593_v25, 4  ;;  %v3336_v12 = vld [vmem:[#allocation9 + $0x1b8] sm:$0xff] }
 0x69c   :  { %4272 = vmatmul.mubr.f32.gmra.mrb[102].mxu1 %v4118_v60  ;;  %v3322_v60 = vld [vmem:[#allocation9 + $0x148] sm:$0xff] }
 0x69d   :  { %4277 = vmatprep.mubr.f32.mxu1 %v4124_v45  ;;  %6795 = vmatpush1.bf16.msra.mxu1 %v6794_v30  ;;  %v3317_v30 = vld [vmem:[#allocation9 + $0x120] sm:$0xff]  ;;  %v6812_v32 = vpack.c.bf16 %v3324_v1, %v3322_v60  ;;  %v4148_v60 = vsel %vm1092_vm3, %v4143_v52, %v4147_v27  ;;  %v3344_v52 = vld [vmem:[#allocation9 + $0x1f8] sm:$0xff] }
 0x69e   :  { %6797 = vmatprep.subr.bf16.mxu1 %v6796_v20  ;;  %v3319_v20 = vld [vmem:[#allocation9 + $0x130] sm:$0xff] }
 0x69f   :  { %v6810_v45 = vpack.c.bf16 %v3319_v20, %v3317_v30  ;;  %v4142_v30 = vsel %vm1092_vm3, %v4137_v41, %v4141_v19  ;;  %v4145_v20 = vrot.slane %v9603_v6, 4 }
 0x6a0   :  { %4278 = vmatmul.mubr.f32.gmra.mrb[104].mxu1 %v4122_v16  ;;  %v3326_v16 = vld [vmem:[#allocation9 + $0x168] sm:$0xff] }
 0x6a1   :  { %4283 = vmatprep.mubr.f32.mxu1 %v4128_v13  ;;  %6799 = vmatpush1.bf16.msra.mxu1 %v6798_v37  ;;  %v3321_v37 = vld [vmem:[#allocation9 + $0x140] sm:$0xff]  ;;  %v6816_v44 = vpack.c.bf16 %v3328_v7, %v3326_v16  ;;  %v3339_v7 = vld [vmem:[#allocation9 + $0x1d0] sm:$0xff] }
 0x6a2   :  { %6801 = vmatprep.subr.bf16.mxu1 %v6800_v55  ;;  %v3323_v55 = vld [vmem:[#allocation9 + $0x150] sm:$0xff]  ;;  %v3337_v16 = vld [vmem:[#allocation9 + $0x1c0] sm:$0xff] }
 0x6a3   :  { %v6814_v13 = vpack.c.bf16 %v3323_v55, %v3321_v37  ;;  %v3338_v37 = vld [vmem:[#allocation9 + $0x1c8] sm:$0xff]  ;;  %v3340_v55 = vld [vmem:[#allocation9 + $0x1d8] sm:$0xff] }
 0x6a4   :  { %4284 = vmatmul.mubr.f32.gmra.mrb[106].mxu1 %v4126_v15  ;;  %v3330_v15 = vld [vmem:[#allocation9 + $0x188] sm:$0xff]  ;;  %v6828_v41 = vpack.c.bf16 %v3340_v55, %v3338_v37 }
 0x6a5   :  { %4289 = vmatprep.mubr.f32.mxu1 %v4132_v63  ;;  %6803 = vmatpush1.bf16.msra.mxu1 %v6802_v48  ;;  %v3325_v48 = vld [vmem:[#allocation9 + $0x160] sm:$0xff]  ;;  %v6820_v0 = vpack.c.bf16 %v3332_v62, %v3330_v15 }
 0x6a6   :  { %6805 = vmatprep.subr.bf16.mxu1 %v6804_v35  ;;  %v3327_v35 = vld [vmem:[#allocation9 + $0x170] sm:$0xff] }
 0x6a7   :  { %v6818_v63 = vpack.c.bf16 %v3327_v35, %v3325_v48  ;;  %v3341_v48 = vld [vmem:[#allocation9 + $0x1e0] sm:$0xff]  ;;  %v3343_v35 = vld [vmem:[#allocation9 + $0x1f0] sm:$0xff] }
 0x6a8   :  { %4290 = vmatmul.mubr.f32.gmra.mrb[108].mxu1 %v4130_v34  ;;  %v3334_v34 = vld [vmem:[#allocation9 + $0x1a8] sm:$0xff]  ;;  %v6834_v15 = vpack.c.bf16 %v3343_v35, %v3341_v48  ;;  %v3693_v35 = vld [vmem:[#allocation9 + $0x4b8] sm:$0xff] }
 0x6a9   :  { %4295 = vmatprep.mubr.f32.mxu1 %v4136_v49  ;;  %6807 = vmatpush1.bf16.msra.mxu1 %v6806_v8  ;;  %v3329_v8 = vld [vmem:[#allocation9 + $0x180] sm:$0xff]  ;;  %v6824_v49 = vpack.c.bf16 %v3336_v12, %v3334_v34  ;;  %v3679_v34 = vld [vmem:[#allocation9 + $0x448] sm:$0xff]  ;;  %v3681_v12 = vld [vmem:[#allocation9 + $0x458] sm:$0xff] }
 0x6aa   :  { %6809 = vmatprep.subr.bf16.mxu1 %v6808_v24  ;;  %v3331_v24 = vld [vmem:[#allocation9 + $0x190] sm:$0xff]  ;;  %v3691_v48 = vld [vmem:[#allocation9 + $0x4a8] sm:$0xff] }
 0x6ab   :  { %v6822_v1 = vpack.c.bf16 %v3331_v24, %v3329_v8 }
 0x6ac   :  { %4296 = vmatmul.mubr.f32.gmra.mrb[110].mxu1 %v4134_v11 }
 0x6ad   :  { %4301 = vmatprep.mubr.f32.mxu1 %v4140_v29  ;;  %6811 = vmatpush1.bf16.msra.mxu1 %v6810_v45  ;;  %v3335_v45 = vld [vmem:[#allocation9 + $0x1b0] sm:$0xff]  ;;  %v3342_v29 = vld [vmem:[#allocation9 + $0x1e8] sm:$0xff] }
 0x6ae   :  { %6813 = vmatprep.subr.bf16.mxu1 %v6812_v32  ;;  %v4146_v32 = vsel %vm1092_vm3, %v4141_v19, %v4145_v20  ;;  %v6826_v11 = vpack.c.bf16 %v3335_v45, %v3333_v56  ;;  %v3673_v19 = vld [vmem:[#allocation9 + $0x418] sm:$0xff]  ;;  %v3680_v56 = vld [vmem:[#allocation9 + $0x450] sm:$0xff]  ;;  %v3683_v45 = vld [vmem:[#allocation9 + $0x468] sm:$0xff] }
 0x6b0   :  { %4302 = vmatmul.mubr.f32.gmra.mrb[112].mxu1 %v4138_v46  ;;  %v3671_v46 = vld [vmem:[#allocation9 + $0x408] sm:$0xff] }
 0x6b1   :  { %4307 = vmatprep.mubr.f32.mxu1 %v4144_v59  ;;  %6815 = vmatpush1.bf16.msra.mxu1 %v6814_v13  ;;  %v6830_v13 = vpack.c.bf16 %v3339_v7, %v3337_v16  ;;  %v6836_v62 = vpack.c.bf16 %v3673_v19, %v3671_v46  ;;  %v3670_v59 = vld [vmem:[#allocation9 + $0x400] sm:$0xff]  ;;  %v3687_v16 = vld [vmem:[#allocation9 + $0x488] sm:$0xff]  ;;  %v3689_v7 = vld [vmem:[#allocation9 + $0x498] sm:$0xff]  ;;  %v6856_v19 = vpack.c.bf16 %v3693_v35, %v3691_v48 }
 0x6b2   :  { %6817 = vmatprep.subr.bf16.mxu1 %v6816_v44  ;;  %v6832_v44 = vpack.c.bf16 %v3344_v52, %v3342_v29  ;;  %v6852_v52 = vpack.c.bf16 %v3689_v7, %v3687_v16 }
 0x6b4   :  { %4308 = vmatmul.mubr.f32.gmra.mrb[114].mxu1 %v4142_v30  ;;  %v3674_v30 = vld [vmem:[#allocation9 + $0x420] sm:$0xff] }
 0x6b5   :  { %4313 = vmatprep.mubr.f32.mxu1 %v4148_v60  ;;  %6819 = vmatpush1.bf16.msra.mxu1 %v6818_v63  ;;  %v3675_v63 = vld [vmem:[#allocation9 + $0x428] sm:$0xff] }
 0x6b6   :  { %6821 = vmatprep.subr.bf16.mxu1 %v6820_v0  ;;  %v3677_v0 = vld [vmem:[#allocation9 + $0x438] sm:$0xff] }
 0x6b7   :  { %v6840_v24 = vpack.c.bf16 %v3677_v0, %v3675_v63 }
 0x6b8   :  { %4314 = vmatmul.mubr.f32.gmra.mrb[116].mxu1 %v4146_v32  ;;  %v3685_v32 = vld [vmem:[#allocation9 + $0x478] sm:$0xff] }
 0x6b9   :  { %4319 = vmatprep.mubr.f32.mxu1 %v4147_v27  ;;  %6823 = vmatpush1.bf16.msra.mxu1 %v6822_v1  ;;  %v3672_v27 = vld [vmem:[#allocation9 + $0x410] sm:$0xff]  ;;  %v6844_v1 = vpack.c.bf16 %v3681_v12, %v3679_v34  ;;  %v6848_v55 = vpack.c.bf16 %v3685_v32, %v3683_v45 }
 0x6ba   :  { %6825 = vmatprep.subr.bf16.mxu1 %v6824_v49  ;;  %v6838_v8 = vpack.c.bf16 %v3672_v27, %v3670_v59  ;;  %v3678_v49 = vld [vmem:[#allocation9 + $0x440] sm:$0xff]  ;;  %v3695_v59 = vld [vmem:[#allocation9 + $0x4c8] sm:$0xff]  ;;  %v3697_v27 = vld [vmem:[#allocation9 + $0x4d8] sm:$0xff] }
 0x6bb   :  { %v6846_v37 = vpack.c.bf16 %v3680_v56, %v3678_v49  ;;  %v6860_v0 = vpack.c.bf16 %v3697_v27, %v3695_v59  ;;  %v3703_v49 = vld [vmem:[#allocation9 + $0x508] sm:$0xff]  ;;  %v3705_v56 = vld [vmem:[#allocation9 + $0x518] sm:$0xff] }
 0x6bc   :  { %4320 = vmatmul.mubr.f32.gmra.mrb[118].mxu1 %v4145_v20  ;;  %v3676_v20 = vld [vmem:[#allocation9 + $0x430] sm:$0xff]  ;;  %v6868_v32 = vpack.c.bf16 %v3705_v56, %v3703_v49 }
 0x6bd   :  { %6827 = vmatpush1.bf16.msra.mxu1 %v6826_v11  ;;  %4390 = vmatprep.mubr.f32.mxu1 %v9478_v36  ;;  %v6842_v60 = vpack.c.bf16 %v3676_v20, %v3674_v30  ;;  %v3682_v11 = vld [vmem:[#allocation9 + $0x460] sm:$0xff]  ;;  %v3699_v30 = vld [vmem:[#allocation9 + $0x4e8] sm:$0xff]  ;;  %v3701_v20 = vld [vmem:[#allocation9 + $0x4f8] sm:$0xff] }
 0x6be   :  { %6829 = vmatprep.subr.bf16.mxu1 %v6828_v41  ;;  %v3684_v41 = vld [vmem:[#allocation9 + $0x470] sm:$0xff]  ;;  %v6864_v12 = vpack.c.bf16 %v3701_v20, %v3699_v30 }
 0x6bf   :  { %v6850_v29 = vpack.c.bf16 %v3684_v41, %v3682_v11  ;;  %v3707_v11 = vld [vmem:[#allocation9 + $0x528] sm:$0xff]  ;;  %v3709_v41 = vld [vmem:[#allocation9 + $0x538] sm:$0xff] }
 0x6c0   :  { %v6872_v7 = vpack.c.bf16 %v3709_v41, %v3707_v11  ;;  %v4479_v11 = vrot.slane %v9485_v5, 2 }
 0x6c1   :  { %6831 = vmatpush1.bf16.msra.mxu1 %v6830_v13  ;;  %v3686_v13 = vld [vmem:[#allocation9 + $0x480] sm:$0xff] }
 0x6c2   :  { %6833 = vmatprep.subr.bf16.mxu1 %v6832_v44  ;;  %v3688_v44 = vld [vmem:[#allocation9 + $0x490] sm:$0xff] }
 0x6c3   :  { %v6854_v46 = vpack.c.bf16 %v3688_v44, %v3686_v13  ;;  %v3711_v13 = vld [vmem:[#allocation9 + $0x548] sm:$0xff]  ;;  %v3713_v44 = vld [vmem:[#allocation9 + $0x558] sm:$0xff] }
 0x6c4   :  { %v6876_v35 = vpack.c.bf16 %v3713_v44, %v3711_v13  ;;  %v3731_v13 = vld [vmem:[#allocation9 + $0x5e8] sm:$0xff]  ;;  %v3733_v44 = vld [vmem:[#allocation9 + $0x5f8] sm:$0xff] }
 0x6c5   :  { %6835 = vmatpush1.bf16.msra.mxu1 %v6834_v15  ;;  %v3690_v15 = vld [vmem:[#allocation9 + $0x4a0] sm:$0xff] }
 0x6c6   :  { %6837 = vmatprep.subr.bf16.mxu1 %v6836_v62  ;;  %v3692_v62 = vld [vmem:[#allocation9 + $0x4b0] sm:$0xff] }
 0x6c7   :  { %v6858_v63 = vpack.c.bf16 %v3692_v62, %v3690_v15  ;;  %v3715_v15 = vld [vmem:[#allocation9 + $0x568] sm:$0xff]  ;;  %v3717_v62 = vld [vmem:[#allocation9 + $0x578] sm:$0xff] }
 0x6c8   :  { %4391 = vmatmul.mubr.f32.vlgmr.msra.gmra.mrb[92].mxu1 %v9481_v26  ;;  %v6880_v27 = vpack.c.bf16 %v3717_v62, %v3715_v15  ;;  %v4483_v62 = vrot.slane %v9495_v43, 2 }
 0x6c9   :  { %4396 = vmatprep.mubr.f32.mxu1 %v9485_v5  ;;  %6839 = vmatpush1.bf16.msra.mxu1 %v6838_v8  ;;  %v3694_v8 = vld [vmem:[#allocation9 + $0x4c0] sm:$0xff]  ;;  %v6896_v5 = vpack.c.bf16 %v3733_v44, %v3731_v13  ;;  %v4507_v13 = vrot.slane %v9556_v38, 2  ;;  %v10193_v44 = vld [vmem:[#allocation41_spill] sm:$0xff] }
 0x6ca   :  { %6841 = vmatprep.subr.bf16.mxu1 %v6840_v24  ;;  %v3696_v24 = vld [vmem:[#allocation9 + $0x4d0] sm:$0xff] }
 0x6cb   :  { %v6862_v34 = vpack.c.bf16 %v3696_v24, %v3694_v8  ;;  %v3719_v8 = vld [vmem:[#allocation9 + $0x588] sm:$0xff]  ;;  %v3721_v24 = vld [vmem:[#allocation9 + $0x598] sm:$0xff] }
 0x6cc   :  { %4397 = vmatmul.mubr.f32.gmra.mrb[94].mxu1 %v9483_v9  ;;  %v6884_v20 = vpack.c.bf16 %v3721_v24, %v3719_v8  ;;  %v4484_v8 = vsel %vm1798_vm4, %v4479_v11, %v4483_v62  ;;  %v4487_v24 = vrot.slane %v9505_v3, 2 }
 0x6cd   :  { %4402 = vmatprep.mubr.f32.mxu1 %v9495_v43  ;;  %6843 = vmatpush1.bf16.msra.mxu1 %v6842_v60  ;;  %v3698_v60 = vld [vmem:[#allocation9 + $0x4e0] sm:$0xff] }
 0x6ce   :  { %6845 = vmatprep.subr.bf16.mxu1 %v6844_v1  ;;  %v3700_v1 = vld [vmem:[#allocation9 + $0x4f0] sm:$0xff] }
 0x6cf   :  { %v6866_v45 = vpack.c.bf16 %v3700_v1, %v3698_v60  ;;  %v3723_v60 = vld [vmem:[#allocation9 + $0x5a8] sm:$0xff]  ;;  %v3725_v1 = vld [vmem:[#allocation9 + $0x5b8] sm:$0xff] }
 0x6d0   :  { %4403 = vmatmul.mubr.f32.gmra.mrb[96].mxu1 %v9492_v18  ;;  %v6888_v56 = vpack.c.bf16 %v3725_v1, %v3723_v60  ;;  %v4489_v60 = vrot.slane %v9513_v40, 2 }
 0x6d1   :  { %4408 = vmatprep.mubr.f32.mxu1 %v9505_v3  ;;  %6847 = vmatpush1.bf16.msra.mxu1 %v6846_v37  ;;  %v3702_v37 = vld [vmem:[#allocation9 + $0x500] sm:$0xff] }
 0x6d2   :  { %6849 = vmatprep.subr.bf16.mxu1 %v6848_v55  ;;  %v3704_v55 = vld [vmem:[#allocation9 + $0x510] sm:$0xff] }
 0x6d3   :  { %v6870_v16 = vpack.c.bf16 %v3704_v55, %v3702_v37  ;;  %v3727_v37 = vld [vmem:[#allocation9 + $0x5c8] sm:$0xff]  ;;  %v3729_v55 = vld [vmem:[#allocation9 + $0x5d8] sm:$0xff] }
 0x6d4   :  { %4409 = vmatmul.mubr.f32.gmra.mrb[98].mxu1 %v9503_v14 }
 0x6d5   :  { %4414 = vmatprep.mubr.f32.mxu1 %v9516_v28  ;;  %6851 = vmatpush1.bf16.msra.mxu1 %v6850_v29  ;;  %v3706_v29 = vld [vmem:[#allocation9 + $0x520] sm:$0xff] }
 0x6d6   :  { %6853 = vmatprep.subr.bf16.mxu1 %v6852_v52  ;;  %v3708_v52 = vld [vmem:[#allocation9 + $0x530] sm:$0xff] }
 0x6d7   :  { %v6874_v48 = vpack.c.bf16 %v3708_v52, %v3706_v29  ;;  %v3726_v29 = vld [vmem:[#allocation9 + $0x5c0] sm:$0xff]  ;;  %v3728_v52 = vld [vmem:[#allocation9 + $0x5d0] sm:$0xff] }
 0x6d8   :  { %4415 = vmatmul.mubr.f32.gmra.mrb[100].mxu1 %v9513_v40  ;;  %v10188_v40 = vld [vmem:[#allocation36_spill] sm:$0xff] }
 0x6d9   :  { %4420 = vmatprep.mubr.f32.mxu1 %v9526_v33  ;;  %6855 = vmatpush1.bf16.msra.mxu1 %v6854_v46  ;;  %v3710_v46 = vld [vmem:[#allocation9 + $0x540] sm:$0xff] }
 0x6da   :  { %6857 = vmatprep.subr.bf16.mxu1 %v6856_v19  ;;  %v3712_v19 = vld [vmem:[#allocation9 + $0x550] sm:$0xff] }
 0x6db   :  { %v6878_v59 = vpack.c.bf16 %v3712_v19, %v3710_v46  ;;  %v3730_v46 = vld [vmem:[#allocation9 + $0x5e0] sm:$0xff]  ;;  %v3732_v19 = vld [vmem:[#allocation9 + $0x5f0] sm:$0xff] }
 0x6dc   :  { %4421 = vmatmul.mubr.f32.gmra.mrb[102].mxu1 %v9523_v2  ;;  %v6898_v15 = vpack.c.bf16 %v3732_v19, %v3730_v46  ;;  %v10195_v46 = vld [vmem:[#allocation43_spill] sm:$0xff]  ;;  %v4509_v19 = vrot.slane %v9563_v4, 2 }
 0x6dd   :  { %4426 = vmatprep.mubr.f32.mxu1 %v9536_v17  ;;  %6859 = vmatpush1.bf16.msra.mxu1 %v6858_v63  ;;  %v3714_v63 = vld [vmem:[#allocation9 + $0x560] sm:$0xff] }
 0x6de   :  { %6861 = vmatprep.subr.bf16.mxu1 %v6860_v0  ;;  %v3716_v0 = vld [vmem:[#allocation9 + $0x570] sm:$0xff] }
 0x6df   :  { %v6882_v30 = vpack.c.bf16 %v3716_v0, %v3714_v63  ;;  %v4481_v0 = vrot.slane %v9492_v18, 2  ;;  %v10184_v18 = vld [vmem:[#allocation32_spill] sm:$0xff] }
 0x6e0   :  { %4427 = vmatmul.mubr.f32.gmra.mrb[104].mxu1 %v9533_v53 }
 0x6e1   :  { %4432 = vmatprep.mubr.f32.mxu1 %v9546_v61  ;;  %6863 = vmatpush1.bf16.msra.mxu1 %v6862_v34  ;;  %v3718_v34 = vld [vmem:[#allocation9 + $0x580] sm:$0xff] }
 0x6e2   :  { %6865 = vmatprep.subr.bf16.mxu1 %v6864_v12  ;;  %v3720_v12 = vld [vmem:[#allocation9 + $0x590] sm:$0xff] }
 0x6e3   :  { %v6886_v49 = vpack.c.bf16 %v3720_v12, %v3718_v34  ;;  %v4491_v34 = vrot.slane %v9516_v28, 2  ;;  %v10185_v12 = vld [vmem:[#allocation33_spill] sm:$0xff] }
 0x6e4   :  { %4433 = vmatmul.mubr.f32.gmra.mrb[106].mxu1 %v9543_v51 }
 0x6e5   :  { %4438 = vmatprep.mubr.f32.mxu1 %v9556_v38  ;;  %6867 = vmatpush1.bf16.msra.mxu1 %v6866_v45  ;;  %v3722_v45 = vld [vmem:[#allocation9 + $0x5a0] sm:$0xff]  ;;  %v4492_v1 = vsel %vm1798_vm4, %v4487_v24, %v4491_v34 }
 0x6e6   :  { %6869 = vmatprep.subr.bf16.mxu1 %v6868_v32  ;;  %v3724_v32 = vld [vmem:[#allocation9 + $0x5b0] sm:$0xff] }
 0x6e7   :  { %v6890_v41 = vpack.c.bf16 %v3724_v32, %v3722_v45  ;;  %v4493_v45 = vrot.slane %v9523_v2, 2  ;;  %v10190_v2 = vld [vmem:[#allocation38_spill] sm:$0xff] }
 0x6e8   :  { %4439 = vmatmul.mubr.f32.gmra.mrb[108].mxu1 %v9553_v39 }
 0x6e9   :  { %4444 = vmatprep.mubr.f32.mxu1 %v9566_v58  ;;  %6871 = vmatpush1.bf16.msra.mxu1 %v6870_v16  ;;  %v4478_v16 = vrot.slane %v9478_v36, 2  ;;  %v4476_v36 = vrot.slane %v9483_v9, 2  ;;  %v10183_v9 = vld [vmem:[#allocation31_spill] sm:$0xff] }
 0x6ea   :  { %6873 = vmatprep.subr.bf16.mxu1 %v6872_v7  ;;  %v6892_v7 = vpack.c.bf16 %v3729_v55, %v3727_v37  ;;  %v4499_v37 = vrot.slane %v9536_v17, 2  ;;  %v10189_v55 = vld [vmem:[#allocation37_spill] sm:$0xff] }
 0x6eb   :  { %v4482_v43 = vsel %vm1798_vm4, %v4476_v36, %v4481_v0 }
 0x6ec   :  { %4445 = vmatmul.mubr.f32.gmra.mrb[110].mxu1 %v9563_v4  ;;  %v10198_v4 = vld [vmem:[#allocation46_spill] sm:$0xff] }
 0x6ed   :  { %4450 = vmatprep.mubr.f32.mxu1 %v9576_v42  ;;  %6875 = vmatpush1.bf16.msra.mxu1 %v6874_v48  ;;  %v4480_v48 = vsel %vm1798_vm4, %v4478_v16, %v4479_v11  ;;  %v4497_v11 = vrot.slane %v9533_v53, 2  ;;  %v4503_v16 = vrot.slane %v9546_v61, 2  ;;  %v10192_v53 = vld [vmem:[#allocation40_spill] sm:$0xff] }
 0x6ee   :  { %6877 = vmatprep.subr.bf16.mxu1 %v6876_v35  ;;  %v6894_v35 = vpack.c.bf16 %v3728_v52, %v3726_v29  ;;  %v4501_v29 = vrot.slane %v9543_v51, 2  ;;  %v10194_v51 = vld [vmem:[#allocation42_spill] sm:$0xff] }
 0x6ef   :  { %v4498_v17 = vsel %vm1798_vm4, %v4493_v45, %v4497_v11  ;;  %v4504_v52 = vsel %vm1798_vm4, %v4499_v37, %v4503_v16 }
 0x6f0   :  { %4451 = vmatmul.mubr.f32.gmra.mrb[112].mxu1 %v9573_v31  ;;  %v4502_v61 = vsel %vm1798_vm4, %v4497_v11, %v4501_v29 }
 0x6f1   :  { %4456 = vmatprep.mubr.f32.mxu1 %v9586_v47  ;;  %6879 = vmatpush1.bf16.msra.mxu1 %v6878_v59  ;;  %v4475_v59 = vrot.slane %v9481_v26, 2  ;;  %v4485_v26 = vrot.slane %v9503_v14, 2  ;;  %v10186_v14 = vld [vmem:[#allocation34_spill] sm:$0xff] }
 0x6f2   :  { %6881 = vmatprep.subr.bf16.mxu1 %v6880_v27  ;;  %v10181_v27 = vld [vmem:[#allocation29_spill] sm:$0xff] }
 0x6f3   :  { %v4477_v63 = vsel %vm1798_vm4, %v4475_v59, %v4476_v36  ;;  %v4486_v3 = vsel %vm1798_vm4, %v4481_v0, %v4485_v26  ;;  %v4490_v28 = vsel %vm1798_vm4, %v4485_v26, %v4489_v60  ;;  %v4515_v36 = vrot.slane %v9576_v42, 2  ;;  %v10199_v0 = vld [vmem:[#allocation47_spill] sm:$0xff] }
 0x6f4   :  { %4457 = vmatmul.mubr.f32.gmra.mrb[114].mxu1 %v9583_v10  ;;  %v4513_v59 = vrot.slane %v9573_v31, 2  ;;  %v10200_v31 = vld [vmem:[#allocation48_spill] sm:$0xff] }
 0x6f5   :  { %4462 = vmatprep.mubr.f32.mxu1 %v9596_v57  ;;  %6883 = vmatpush1.bf16.msra.mxu1 %v6882_v30  ;;  %v10182_v30 = vld [vmem:[#allocation30_spill] sm:$0xff] }
 0x6f6   :  { %6885 = vmatprep.subr.bf16.mxu1 %v6884_v20  ;;  %v4488_v20 = vsel %vm1798_vm4, %v4483_v62, %v4487_v24  ;;  %v10197_v62 = vld [vmem:[#allocation45_spill] sm:$0xff]  ;;  %v4514_v42 = vsel %vm1798_vm4, %v4509_v19, %v4513_v59 }
 0x6f8   :  { %4463 = vmatmul.mubr.f32.gmra.mrb[116].mxu1 %v9593_v25 }
 0x6f9   :  { %4468 = vmatprep.mubr.f32.mxu1 %v9606_v50  ;;  %6887 = vmatpush1.bf16.msra.mxu1 %v6886_v49  ;;  %v4495_v49 = vrot.slane %v9526_v33, 2  ;;  %v4494_v33 = vsel %vm1798_vm4, %v4489_v60, %v4493_v45 }
 0x6fa   :  { %6889 = vmatprep.subr.bf16.mxu1 %v6888_v56  ;;  %v10187_v56 = vld [vmem:[#allocation35_spill] sm:$0xff] }
 0x6fb   :  { %v4496_v32 = vsel %vm1798_vm4, %v4491_v34, %v4495_v49  ;;  %v10203_v34 = vld [vmem:[#allocation51_spill] sm:$0xff] }
 0x6fc   :  { %4469 = vmatmul.mubr.f32.gmra.mrb[118].mxu1 %v9603_v6 }
 0x6fd   :  { %6891 = vmatpush1.bf16.msra.mxu1 %v6890_v41  ;;  %4621 = vmatprep.mubr.f32.mxu1 %v4480_v48  ;;  %v4500_v41 = vsel %vm1798_vm4, %v4495_v49, %v4499_v37  ;;  %v4505_v48 = vrot.slane %v9553_v39, 2  ;;  %v10196_v39 = vld [vmem:[#allocation44_spill] sm:$0xff] }
 0x6fe   :  { %6893 = vmatprep.subr.bf16.mxu1 %v6892_v7  ;;  %v10191_v7 = vld [vmem:[#allocation39_spill] sm:$0xff]  ;;  %v10208_v49 = vld [vmem:[#allocation56_spill] sm:$0xff] }
 0x6ff   :  { %v4506_v38 = vsel %vm1798_vm4, %v4501_v29, %v4505_v48 }
 0x701   :  { %6895 = vmatpush1.bf16.msra.mxu1 %v6894_v35  ;;  %v4508_v35 = vsel %vm1798_vm4, %v4503_v16, %v4507_v13 }
 0x702   :  { %6897 = vmatprep.subr.bf16.mxu1 %v6896_v5  ;;  %v4511_v5 = vrot.slane %v9566_v58, 2  ;;  %v4510_v58 = vsel %vm1798_vm4, %v4505_v48, %v4509_v19 }
 0x705   :  { %6899 = vmatpush1.bf16.msra.mxu1 %v6898_v15  ;;  %v4512_v15 = vsel %vm1798_vm4, %v4507_v13, %v4511_v5 }
 0x706   :  { %6901 = vmatprep.subr.bf16.mxu1 %v10181_v27  ;;  %v4516_v27 = vsel %vm1798_vm4, %v4511_v5, %v4515_v36 }
 0x708   :  { %4622 = vmatmul.mubr.f32.vlgmr.msra.gmra.mrb[92].mxu1 %v4477_v63  ;;  %v4519_v63 = vrot.slane %v9586_v47, 2 }
 0x709   :  { %4627 = vmatprep.mubr.f32.mxu1 %v4484_v8  ;;  %6903 = vmatpush1.bf16.msra.mxu1 %v10182_v30  ;;  %v4517_v8 = vrot.slane %v9583_v10, 2  ;;  %v4523_v30 = vrot.slane %v9596_v57, 2  ;;  %v10202_v10 = vld [vmem:[#allocation50_spill] sm:$0xff] }
 0x70a   :  { %6905 = vmatprep.subr.bf16.mxu1 %v10183_v9  ;;  %v4520_v24 = vsel %vm1798_vm4, %v4515_v36, %v4519_v63  ;;  %v10201_v9 = vld [vmem:[#allocation49_spill] sm:$0xff] }
 0x70b   :  { %v4518_v47 = vsel %vm1798_vm4, %v4513_v59, %v4517_v8  ;;  %v4524_v26 = vsel %vm1798_vm4, %v4519_v63, %v4523_v30  ;;  %v5271_v59 = vld [vmem:[#allocation13 + $0x188] sm:$0xff] }
 0x70c   :  { %4628 = vmatmul.mubr.f32.gmra.mrb[94].mxu1 %v4482_v43  ;;  %v4521_v43 = vrot.slane %v9593_v25, 2  ;;  %v10205_v25 = vld [vmem:[#allocation53_spill] sm:$0xff] }
 0x70d   :  { %4633 = vmatprep.mubr.f32.mxu1 %v4488_v20  ;;  %6907 = vmatpush1.bf16.msra.mxu1 %v10184_v18  ;;  %v4527_v20 = vrot.slane %v9606_v50, 2  ;;  %v4525_v18 = vrot.slane %v9603_v6, 2  ;;  %v10206_v50 = vld [vmem:[#allocation54_spill] sm:$0xff]  ;;  %v10209_v6 = vld [vmem:[#allocation57_spill] sm:$0xff] }
 0x70e   :  { %6909 = vmatprep.subr.bf16.mxu1 %v10185_v12  ;;  %v4522_v57 = vsel %vm1798_vm4, %v4517_v8, %v4521_v43 }
 0x70f   :  { %v4528_v12 = vsel %vm1798_vm4, %v4523_v30, %v4527_v20  ;;  %v4526_v60 = vsel %vm1798_vm4, %v4521_v43, %v4525_v18  ;;  %v5256_v30 = vld [vmem:[#allocation13 + $0x110] sm:$0xff] }
 0x710   :  { %4634 = vmatmul.mubr.f32.gmra.mrb[96].mxu1 %v4486_v3  ;;  %v10204_v3 = vld [vmem:[#allocation52_spill] sm:$0xff] }
 0x711   :  { %4639 = vmatprep.mubr.f32.mxu1 %v4492_v1  ;;  %6911 = vmatpush1.bf16.msra.mxu1 %v10186_v14  ;;  %v10207_v1 = vld [vmem:[#allocation55_spill] sm:$0xff]  ;;  %v10210_v14 = vld [vmem:[#allocation58_spill] sm:$0xff] }
 0x712   :  { %6913 = vmatprep.subr.bf16.mxu1 %v10187_v56  ;;  %v10211_v56 = vld [vmem:[#allocation59_spill] sm:$0xff] }
 0x714   :  { %4640 = vmatmul.mubr.f32.gmra.mrb[98].mxu1 %v4490_v28  ;;  %v10212_v28 = vld [vmem:[#allocation60_spill] sm:$0xff] }
 0x715   :  { %4645 = vmatprep.mubr.f32.mxu1 %v4496_v32  ;;  %6915 = vmatpush1.bf16.msra.mxu1 %v10188_v40 }
 0x716   :  { %6917 = vmatprep.subr.bf16.mxu1 %v10189_v55 }
 0x718   :  { %4646 = vmatmul.mubr.f32.gmra.mrb[100].mxu1 %v4494_v33 }
 0x719   :  { %4651 = vmatprep.mubr.f32.mxu1 %v4500_v41  ;;  %6919 = vmatpush1.bf16.msra.mxu1 %v10190_v2 }
 0x71a   :  { %6921 = vmatprep.subr.bf16.mxu1 %v10191_v7 }
 0x71c   :  { %4652 = vmatmul.mubr.f32.gmra.mrb[102].mxu1 %v4498_v17 }
 0x71d   :  { %4657 = vmatprep.mubr.f32.mxu1 %v4504_v52  ;;  %6923 = vmatpush1.bf16.msra.mxu1 %v10192_v53 }
 0x71e   :  { %6925 = vmatprep.subr.bf16.mxu1 %v10193_v44 }
 0x720   :  { %4658 = vmatmul.mubr.f32.gmra.mrb[104].mxu1 %v4502_v61 }
 0x721   :  { %4663 = vmatprep.mubr.f32.mxu1 %v4508_v35  ;;  %6927 = vmatpush1.bf16.msra.mxu1 %v10194_v51 }
 0x722   :  { %6929 = vmatprep.subr.bf16.mxu1 %v10195_v46 }
 0x724   :  { %4664 = vmatmul.mubr.f32.gmra.mrb[106].mxu1 %v4506_v38 }
 0x725   :  { %4669 = vmatprep.mubr.f32.mxu1 %v4512_v15  ;;  %6931 = vmatpush1.bf16.msra.mxu1 %v10196_v39 }
 0x726   :  { %6933 = vmatprep.subr.bf16.mxu1 %v10197_v62  ;;  %v10213_v62 = vmov 0.0  }
 0x728   :  { %4670 = vmatmul.mubr.f32.gmra.mrb[108].mxu1 %v4510_v58  ;;  %v5270_v58 = vld [vmem:[#allocation13 + $0x180] sm:$0xff] }
 0x729   :  { %4675 = vmatprep.mubr.f32.mxu1 %v4516_v27  ;;  %6935 = vmatpush1.bf16.msra.mxu1 %v10198_v4  ;;  %v5254_v27 = vld [vmem:[#allocation13 + $0x100] sm:$0xff]  ;;  %v6994_v63 = vpack.c.bf16 %v5271_v59, %v5270_v58  ;;  %v5255_v4 = vld [vmem:[#allocation13 + $0x108] sm:$0xff] }
 0x72a   :  { %6937 = vmatprep.subr.bf16.mxu1 %v10199_v0  ;;  %v5272_v0 = vld [vmem:[#allocation13 + $0x190] sm:$0xff]  ;;  %v6996_v8 = vpack.c.bf16 %v5255_v4, %v5254_v27  ;;  %v5282_v4 = vld [vmem:[#allocation13 + $0x1e0] sm:$0xff] }
 0x72b   :  { %6995 = vmatprep.subr.bf16.mxu0 %v6994_v63  ;;  %v5264_v27 = vld [vmem:[#allocation13 + $0x150] sm:$0xff]  ;;  %v5265_v63 = vld [vmem:[#allocation13 + $0x158] sm:$0xff] }
 0x72c   :  { %4676 = vmatmul.mubr.f32.gmra.mrb[110].mxu1 %v4514_v42  ;;  %v5273_v42 = vld [vmem:[#allocation13 + $0x198] sm:$0xff]  ;;  %6997 = vmatpush3.bf16.msra.mxu0 %v6996_v8 }
 0x72d   :  { %4681 = vmatprep.mubr.f32.mxu1 %v4520_v24  ;;  %6939 = vmatpush1.bf16.msra.mxu1 %v10200_v31  ;;  %v6998_v24 = vpack.c.bf16 %v5273_v42, %v5272_v0  ;;  %v5257_v31 = vld [vmem:[#allocation13 + $0x118] sm:$0xff]  ;;  %v5283_v0 = vld [vmem:[#allocation13 + $0x1e8] sm:$0xff]  ;;  %v7016_v42 = vpack.c.bf16 %v5265_v63, %v5264_v27 }
 0x72e   :  { %6941 = vmatprep.subr.bf16.mxu1 %v10201_v9  ;;  %v5274_v9 = vld [vmem:[#allocation13 + $0x1a0] sm:$0xff]  ;;  %v7000_v43 = vpack.c.bf16 %v5257_v31, %v5256_v30  ;;  %v7018_v8 = vpack.c.bf16 %v5283_v0, %v5282_v4  ;;  %v5267_v30 = vld [vmem:[#allocation13 + $0x168] sm:$0xff] }
 0x72f   :  { %6999 = vmatprep.subr.bf16.mxu0 %v6998_v24  ;;  %v5266_v24 = vld [vmem:[#allocation13 + $0x160] sm:$0xff] }
 0x730   :  { %4682 = vmatmul.mubr.f32.gmra.mrb[112].mxu1 %v4518_v47  ;;  %v5275_v47 = vld [vmem:[#allocation13 + $0x1a8] sm:$0xff]  ;;  %7001 = vmatpush3.bf16.msra.mxu0 %v7000_v43  ;;  %v7020_v31 = vpack.c.bf16 %v5267_v30, %v5266_v24 }
 0x731   :  { %4687 = vmatprep.mubr.f32.mxu1 %v4524_v26  ;;  %6943 = vmatpush1.bf16.msra.mxu1 %v10202_v10  ;;  %v7002_v26 = vpack.c.bf16 %v5275_v47, %v5274_v9  ;;  %v5259_v10 = vld [vmem:[#allocation13 + $0x128] sm:$0xff] }
 0x732   :  { %6945 = vmatprep.subr.bf16.mxu1 %v10203_v34  ;;  %v5276_v34 = vld [vmem:[#allocation13 + $0x1b0] sm:$0xff] }
 0x733   :  { %7003 = vmatprep.subr.bf16.mxu0 %v7002_v26 }
 0x734   :  { %4688 = vmatmul.mubr.f32.gmra.mrb[114].mxu1 %v4522_v57  ;;  %v5277_v57 = vld [vmem:[#allocation13 + $0x1b8] sm:$0xff] }
 0x735   :  { %4693 = vmatprep.mubr.f32.mxu1 %v4528_v12  ;;  %6947 = vmatpush1.bf16.msra.mxu1 %v10204_v3  ;;  %v7006_v12 = vpack.c.bf16 %v5277_v57, %v5276_v34  ;;  %v5260_v3 = vld [vmem:[#allocation13 + $0x130] sm:$0xff] }
 0x736   :  { %6949 = vmatprep.subr.bf16.mxu1 %v10205_v25  ;;  %v5261_v25 = vld [vmem:[#allocation13 + $0x138] sm:$0xff] }
 0x738   :  { %4694 = vmatmul.mubr.f32.gmra.mrb[116].mxu1 %v4526_v60  ;;  %v5278_v60 = vld [vmem:[#allocation13 + $0x1c0] sm:$0xff] }
 0x739   :  { %4699 = vmatprep.mubr.f32.mxu1 %v4527_v20  ;;  %6951 = vmatpush1.bf16.msra.mxu1 %v10206_v50  ;;  %v5258_v20 = vld [vmem:[#allocation13 + $0x120] sm:$0xff]  ;;  %v5279_v50 = vld [vmem:[#allocation13 + $0x1c8] sm:$0xff] }
 0x73a   :  { %6953 = vmatprep.subr.bf16.mxu1 %v10207_v1  ;;  %v7008_v1 = vpack.c.bf16 %v5261_v25, %v5260_v3 }
 0x73c   :  { %4700 = vmatmul.mubr.f32.gmra.mrb[118].mxu1 %v4525_v18  ;;  %v7004_v18 = vpack.c.bf16 %v5259_v10, %v5258_v20 }
 0x73d   :  { %6955 = vmatpush1.bf16.msra.mxu1 %v10208_v49  ;;  %v7010_v49 = vpack.c.bf16 %v5279_v50, %v5278_v60 }
 0x73e   :  { %6957 = vmatprep.subr.bf16.mxu1 %v10209_v6  ;;  %7005 = vmatpush3.bf16.msra.mxu0 %v7004_v18  ;;  %v5262_v6 = vld [vmem:[#allocation13 + $0x140] sm:$0xff] }
 0x73f   :  { %7007 = vmatprep.subr.bf16.mxu0 %v7006_v12 }
 0x741   :  { %6959 = vmatpush1.bf16.msra.mxu1 %v10210_v14  ;;  %v5263_v14 = vld [vmem:[#allocation13 + $0x148] sm:$0xff] }
 0x742   :  { %6961 = vmatprep.subr.bf16.mxu1 %v10211_v56  ;;  %v5280_v56 = vld [vmem:[#allocation13 + $0x1d0] sm:$0xff]  ;;  %7009 = vmatpush3.bf16.msra.mxu0 %v7008_v1  ;;  %v7012_v58 = vpack.c.bf16 %v5263_v14, %v5262_v6 }
 0x743   :  { %7011 = vmatprep.subr.bf16.mxu0 %v7010_v49 }
 0x745   :  { %6963 = vmatpush1.bf16.msra.mxu1 %v10212_v28  ;;  %v5281_v28 = vld [vmem:[#allocation13 + $0x1d8] sm:$0xff] }
 0x746   :  { %v7014_v59 = vpack.c.bf16 %v5281_v28, %v5280_v56  ;;  %7013 = vmatpush3.bf16.msra.mxu0 %v7012_v58 }
 0x748   :  { %7015 = vmatprep.subr.bf16.mxu0 %v7014_v59 }
 0x74a   :  { %7017 = vmatpush3.bf16.msra.mxu0 %v7016_v42 }
 0x74b   :  { %7019 = vmatprep.subr.bf16.mxu0 %v7018_v8 }
 0x74e   :  { %7021 = vmatpush3.bf16.msra.mxu0 %v7020_v31 }
 0x7db   :  { %v9835_v45 = vpop.f32.mrb[92].mxu1 }
 0x7dc   :  { %v9837_v32 = vpop.f32.mrb[93].mxu1 }
 0x7dd   :  { %4826 = vmatprep.mubr.f32.mxu1 %v9837_v32 }
 0x7de   :  { %4827 = vmatmul.mubr.f32.vlgmr.msra.gmra.mrb[120].mxu1 %v9835_v45 }
 0x7df   :  { %v9841_v37 = vpop.f32.mrb[94].mxu1 }
 0x7e0   :  { %v9843_v40 = vpop.f32.mrb[95].mxu1 }
 0x7e1   :  { %4832 = vmatprep.mubr.f32.mxu1 %v9843_v40 }
 0x7e2   :  { %4833 = vmatmul.mubr.f32.gmra.mrb[122].mxu1 %v9841_v37 }
 0x7e3   :  { %v9847_v55 = vpop.f32.mrb[96].mxu1 }
 0x7e4   :  { %v9849_v33 = vpop.f32.mrb[97].mxu1 }
 0x7e5   :  { %4838 = vmatprep.mubr.f32.mxu1 %v9849_v33 }
 0x7e6   :  { %4839 = vmatmul.mubr.f32.gmra.mrb[124].mxu1 %v9847_v55 }
 0x7e7   :  { %v9853_v11 = vpop.f32.mrb[98].mxu1 }
 0x7e8   :  { %v9855_v41 = vpop.f32.mrb[99].mxu1 }
 0x7e9   :  { %4844 = vmatprep.mubr.f32.mxu1 %v9855_v41 }
 0x7ea   :  { %4845 = vmatmul.mubr.f32.gmra.mrb[126].mxu1 %v9853_v11 }
 0x7eb   :  { %v9859_v16 = vpop.f32.mrb[100].mxu1 }
 0x7ec   :  { %v9861_v2 = vpop.f32.mrb[101].mxu1 }
 0x7ed   :  { %4850 = vmatprep.mubr.f32.mxu1 %v9861_v2 }
 0x7ee   :  { %4851 = vmatmul.mubr.f32.gmra.mrb[128].mxu1 %v9859_v16 }
 0x7ef   :  { %v9865_v7 = vpop.f32.mrb[102].mxu1 }
 0x7f0   :  { %v9867_v17 = vpop.f32.mrb[103].mxu1 }
 0x7f1   :  { %4856 = vmatprep.mubr.f32.mxu1 %v9867_v17 }
 0x7f2   :  { %4857 = vmatmul.mubr.f32.gmra.mrb[130].mxu1 %v9865_v7 }
 0x7f3   :  { %v9871_v29 = vpop.f32.mrb[104].mxu1 }
 0x7f4   :  { %v9873_v52 = vpop.f32.mrb[105].mxu1 }
 0x7f5   :  { %4862 = vmatprep.mubr.f32.mxu1 %v9873_v52 }
 0x7f6   :  { %4863 = vmatmul.mubr.f32.gmra.mrb[132].mxu1 %v9871_v29 }
 0x7f7   :  { %v9877_v13 = vpop.f32.mrb[106].mxu1 }
 0x7f8   :  { %v9879_v53 = vpop.f32.mrb[107].mxu1 }
 0x7f9   :  { %4868 = vmatprep.mubr.f32.mxu1 %v9879_v53 }
 0x7fa   :  { %4869 = vmatmul.mubr.f32.gmra.mrb[134].mxu1 %v9877_v13 }
 0x7fb   :  { %v9883_v44 = vpop.f32.mrb[108].mxu1 }
 0x7fc   :  { %v9885_v61 = vpop.f32.mrb[109].mxu1 }
 0x7fd   :  { %4874 = vmatprep.mubr.f32.mxu1 %v9885_v61 }
 0x7fe   :  { %4875 = vmatmul.mubr.f32.gmra.mrb[136].mxu1 %v9883_v44 }
 0x7ff   :  { %v9889_v48 = vpop.f32.mrb[110].mxu1 }
 0x800   :  { %v9891_v35 = vpop.f32.mrb[111].mxu1 }
 0x801   :  { %4880 = vmatprep.mubr.f32.mxu1 %v9891_v35 }
 0x802   :  { %4881 = vmatmul.mubr.f32.gmra.mrb[138].mxu1 %v9889_v48 }
 0x803   :  { %v9895_v5 = vpop.f32.mrb[112].mxu1 }
 0x804   :  { %v9897_v51 = vpop.f32.mrb[113].mxu1 }
 0x805   :  { %4886 = vmatprep.mubr.f32.mxu1 %v9897_v51 }
 0x806   :  { %4887 = vmatmul.mubr.f32.gmra.mrb[140].mxu1 %v9895_v5 }
 0x807   :  { %v9901_v46 = vpop.f32.mrb[114].mxu1 }
 0x808   :  { %v9903_v38 = vpop.f32.mrb[115].mxu1 }
 0x809   :  { %4892 = vmatprep.mubr.f32.mxu1 %v9903_v38 }
 0x80a   :  { %4893 = vmatmul.mubr.f32.gmra.mrb[142].mxu1 %v9901_v46 }
 0x80b   :  { %v9907_v19 = vpop.f32.mrb[116].mxu1 }
 0x80c   :  { %v9909_v15 = vpop.f32.mrb[117].mxu1 }
 0x80d   :  { %4898 = vmatprep.mubr.f32.mxu1 %v9909_v15 }
 0x80e   :  { %4899 = vmatmul.mubr.f32.gmra.mrb[144].mxu1 %v9907_v19 }
 0x80f   :  { %v9913_v36 = vpop.f32.mrb[118].mxu1 }
 0x810   :  { %v9915_v39 = vpop.f32.mrb[119].mxu1 }
 0x811   :  { %4904 = vmatprep.mubr.f32.mxu1 %v9915_v39 }
 0x812   :  { %4905 = vmatmul.mubr.f32.gmra.mrb[146].mxu1 %v9913_v36 }
 0x813   :  { %5180 = vmatprep.mubr.f32.mxu1 %v10213_v62 }
 0x8b1   :  { %v4828_v9 = vpop.f32.mrb[120].mxu1 }
 0x8b2   :  { %v4911_v47 = vmax.f32 %v9835_v45, %v4828_v9  ;;  %v4830_v43 = vpop.f32.mrb[121].mxu1 }
 0x8b3   :  { %v4912_v26 = vmax.f32 %v9837_v32, %v4830_v43 }
 0x8b4   :  { %v4967_v18 = vrot.slane %v4911_v47, 1 }
 0x8b5   :  { %v4834_v20 = vpop.f32.mrb[122].mxu1  ;;  %v4970_v3 = vrot.slane %v4912_v26, 1 }
 0x8b6   :  { %v4913_v10 = vmax.f32 %v9841_v37, %v4834_v20  ;;  %v4836_v34 = vpop.f32.mrb[123].mxu1 }
 0x8b7   :  { %v4914_v57 = vmax.f32 %v9843_v40, %v4836_v34 }
 0x8b8   :  { %v4968_v12 = vrot.slane %v4913_v10, 1 }
 0x8b9   :  { %v4971_v25 = vrot.slane %v4914_v57, 1  ;;  %v4840_v60 = vpop.f32.mrb[124].mxu1 }
 0x8ba   :  { %v4969_v50 = vsel %vm294_vm0, %v4967_v18, %v4968_v12  ;;  %v4915_v1 = vmax.f32 %v9847_v55, %v4840_v60  ;;  %v4842_v49 = vpop.f32.mrb[125].mxu1 }
 0x8bb   :  { %v5049_v45 = vmax.f32 %v4911_v47, %v4969_v50  ;;  %v4916_v6 = vmax.f32 %v9849_v33, %v4842_v49  ;;  %v4972_v32 = vsel %vm294_vm0, %v4970_v3, %v4971_v25 }
 0x8bc   :  { %v4973_v14 = vrot.slane %v4915_v1, 1  ;;  %v5050_v37 = vmax.f32 %v4912_v26, %v4972_v32 }
 0x8bd   :  { %v4975_v56 = vrot.slane %v4916_v6, 1  ;;  %v4846_v28 = vpop.f32.mrb[126].mxu1 }
 0x8be   :  { %v4974_v40 = vsel %vm294_vm0, %v4968_v12, %v4973_v14  ;;  %v4917_v58 = vmax.f32 %v9853_v11, %v4846_v28  ;;  %v4848_v59 = vpop.f32.mrb[127].mxu1 }
 0x8bf   :  { %v5051_v27 = vmax.f32 %v4913_v10, %v4974_v40  ;;  %v4918_v63 = vmax.f32 %v9855_v41, %v4848_v59  ;;  %v4976_v55 = vsel %vm294_vm0, %v4971_v25, %v4975_v56 }
 0x8c0   :  { %v4977_v4 = vrot.slane %v4917_v58, 1  ;;  %v5052_v0 = vmax.f32 %v4914_v57, %v4976_v55 }
 0x8c1   :  { %v4979_v42 = vrot.slane %v4918_v63, 1  ;;  %v4852_v33 = vpop.f32.mrb[128].mxu1  ;;  %v6966_v8 = vpack.c.bf16 %v5051_v27, %v5049_v45 }
 0x8c2   :  { %v4978_v24 = vsel %vm294_vm0, %v4973_v14, %v4977_v4  ;;  %v4919_v30 = vmax.f32 %v9859_v16, %v4852_v33  ;;  %v4854_v31 = vpop.f32.mrb[129].mxu1  ;;  %v6964_v9 = vpack.c.bf16 %v5052_v0, %v5050_v37 }
 0x8c3   :  { %v5053_v47 = vmax.f32 %v4915_v1, %v4978_v24  ;;  %v4920_v11 = vmax.f32 %v9861_v2, %v4854_v31  ;;  %v4980_v43 = vsel %vm294_vm0, %v4975_v56, %v4979_v42 }
 0x8c4   :  { %v4981_v26 = vrot.slane %v4919_v30, 1  ;;  %6965 = vmatprep.subr.bf16.mxu1 %v6964_v9  ;;  %v5054_v41 = vmax.f32 %v4916_v6, %v4980_v43 }
 0x8c5   :  { %v4983_v20 = vrot.slane %v4920_v11, 1  ;;  %v4858_v10 = vpop.f32.mrb[130].mxu1  ;;  %6967 = vmatpush1.bf16.msra.mxu1 %v6966_v8 }
 0x8c6   :  { %v4982_v34 = vsel %vm294_vm0, %v4977_v4, %v4981_v26  ;;  %v4921_v57 = vmax.f32 %v9865_v7, %v4858_v10  ;;  %v4860_v18 = vpop.f32.mrb[131].mxu1 }
 0x8c7   :  { %v5055_v12 = vmax.f32 %v4917_v58, %v4982_v34  ;;  %v4922_v16 = vmax.f32 %v9867_v17, %v4860_v18  ;;  %v4984_v3 = vsel %vm294_vm0, %v4979_v42, %v4983_v20 }
 0x8c8   :  { %v4985_v25 = vrot.slane %v4921_v57, 1  ;;  %v5056_v2 = vmax.f32 %v4918_v63, %v4984_v3 }
 0x8c9   :  { %v4987_v60 = vrot.slane %v4922_v16, 1  ;;  %v4864_v50 = vpop.f32.mrb[132].mxu1  ;;  %v6970_v1 = vpack.c.bf16 %v5055_v12, %v5053_v47 }
 0x8ca   :  { %v4986_v49 = vsel %vm294_vm0, %v4981_v26, %v4985_v25  ;;  %v4923_v45 = vmax.f32 %v9871_v29, %v4864_v50  ;;  %v4866_v6 = vpop.f32.mrb[133].mxu1  ;;  %v6968_v32 = vpack.c.bf16 %v5056_v2, %v5054_v41 }
 0x8cb   :  { %v5057_v14 = vmax.f32 %v4919_v30, %v4986_v49  ;;  %v4924_v7 = vmax.f32 %v9873_v52, %v4866_v6  ;;  %v4988_v37 = vsel %vm294_vm0, %v4983_v20, %v4987_v60 }
 0x8cc   :  { %v4989_v56 = vrot.slane %v4923_v45, 1  ;;  %6969 = vmatprep.subr.bf16.mxu1 %v6968_v32  ;;  %v5058_v17 = vmax.f32 %v4920_v11, %v4988_v37 }
 0x8cd   :  { %v4991_v28 = vrot.slane %v4924_v7, 1  ;;  %v4870_v40 = vpop.f32.mrb[134].mxu1  ;;  %6971 = vmatpush1.bf16.msra.mxu1 %v6970_v1 }
 0x8ce   :  { %v4990_v58 = vsel %vm294_vm0, %v4985_v25, %v4989_v56  ;;  %v4925_v59 = vmax.f32 %v9877_v13, %v4870_v40  ;;  %v4872_v27 = vpop.f32.mrb[135].mxu1 }
 0x8cf   :  { %v5059_v63 = vmax.f32 %v4921_v57, %v4990_v58  ;;  %v4926_v29 = vmax.f32 %v9879_v53, %v4872_v27  ;;  %v4992_v55 = vsel %vm294_vm0, %v4987_v60, %v4991_v28 }
 0x8d0   :  { %v4993_v4 = vrot.slane %v4925_v59, 1  ;;  %v5060_v52 = vmax.f32 %v4922_v16, %v4992_v55 }
 0x8d1   :  { %v4995_v0 = vrot.slane %v4926_v29, 1  ;;  %v4876_v42 = vpop.f32.mrb[136].mxu1  ;;  %v6974_v33 = vpack.c.bf16 %v5059_v63, %v5057_v14 }
 0x8d2   :  { %v4994_v8 = vsel %vm294_vm0, %v4989_v56, %v4993_v4  ;;  %v4927_v24 = vmax.f32 %v9883_v44, %v4876_v42  ;;  %v4878_v30 = vpop.f32.mrb[137].mxu1  ;;  %v6972_v31 = vpack.c.bf16 %v5060_v52, %v5058_v17 }
 0x8d3   :  { %v5061_v9 = vmax.f32 %v4923_v45, %v4994_v8  ;;  %v4928_v13 = vmax.f32 %v9885_v61, %v4878_v30  ;;  %v4996_v47 = vsel %vm294_vm0, %v4991_v28, %v4995_v0 }
 0x8d4   :  { %v4997_v11 = vrot.slane %v4927_v24, 1  ;;  %6973 = vmatprep.subr.bf16.mxu1 %v6972_v31  ;;  %v5062_v53 = vmax.f32 %v4924_v7, %v4996_v47 }
 0x8d5   :  { %v4999_v43 = vrot.slane %v4928_v13, 1  ;;  %v4882_v26 = vpop.f32.mrb[138].mxu1  ;;  %6975 = vmatpush1.bf16.msra.mxu1 %v6974_v33 }
 0x8d6   :  { %v4998_v41 = vsel %vm294_vm0, %v4993_v4, %v4997_v11  ;;  %v4929_v20 = vmax.f32 %v9889_v48, %v4882_v26  ;;  %v4884_v10 = vpop.f32.mrb[139].mxu1 }
 0x8d7   :  { %v5063_v34 = vmax.f32 %v4925_v59, %v4998_v41  ;;  %v4930_v44 = vmax.f32 %v9891_v35, %v4884_v10  ;;  %v5000_v57 = vsel %vm294_vm0, %v4995_v0, %v4999_v43 }
 0x8d8   :  { %v5001_v18 = vrot.slane %v4929_v20, 1  ;;  %v5064_v61 = vmax.f32 %v4926_v29, %v5000_v57 }
 0x8d9   :  { %v5003_v12 = vrot.slane %v4930_v44, 1  ;;  %v4888_v16 = vpop.f32.mrb[140].mxu1  ;;  %v6978_v3 = vpack.c.bf16 %v5063_v34, %v5061_v9  ;;  %v5406_v34 = vld [vmem:[#allocation13 + $0x380] sm:$0xff] }
 0x8da   :  { %v5002_v25 = vsel %vm294_vm0, %v4997_v11, %v5001_v18  ;;  %v4931_v2 = vmax.f32 %v9895_v5, %v4888_v16  ;;  %v4890_v60 = vpop.f32.mrb[141].mxu1  ;;  %v6976_v50 = vpack.c.bf16 %v5064_v61, %v5062_v53  ;;  %v5390_v61 = vld [vmem:[#allocation13 + $0x300] sm:$0xff]  ;;  %v5408_v16 = vld [vmem:[#allocation13 + $0x390] sm:$0xff] }
 0x8db   :  { %v5065_v1 = vmax.f32 %v4927_v24, %v5002_v25  ;;  %v4932_v48 = vmax.f32 %v9897_v51, %v4890_v60  ;;  %v5004_v49 = vsel %vm294_vm0, %v4999_v43, %v5003_v12  ;;  %v5077_v25 = vld [vmem:[#allocation10] sm:$0xff] }
 0x8dc   :  { %v5005_v45 = vrot.slane %v4931_v2, 1  ;;  %6977 = vmatprep.subr.bf16.mxu1 %v6976_v50  ;;  %v5066_v35 = vmax.f32 %v4928_v13, %v5004_v49  ;;  %v5392_v50 = vld [vmem:[#allocation13 + $0x310] sm:$0xff]  ;;  %v5411_v49 = vld [vmem:[#allocation13 + $0x3a8] sm:$0xff] }
 0x8dd   :  { %v5007_v6 = vrot.slane %v4932_v48, 1  ;;  %v4894_v32 = vpop.f32.mrb[142].mxu1  ;;  %6979 = vmatpush1.bf16.msra.mxu1 %v6978_v3  ;;  %v5409_v3 = vld [vmem:[#allocation13 + $0x398] sm:$0xff] }
 0x8de   :  { %v5006_v14 = vsel %vm294_vm0, %v5001_v18, %v5005_v45  ;;  %v4933_v7 = vmax.f32 %v9901_v46, %v4894_v32  ;;  %v4896_v37 = vpop.f32.mrb[143].mxu1  ;;  %v7030_v60 = vpack.c.bf16 %v5409_v3, %v5408_v16  ;;  %v5395_v32 = vld [vmem:[#allocation13 + $0x328] sm:$0xff]  ;;  %v5082_v16 = vld [vmem:[#allocation12] sm:$0x3] }
 0x8df   :  { %v5067_v56 = vmax.f32 %v4929_v20, %v5006_v14  ;;  %v4934_v5 = vmax.f32 %v9903_v38, %v4896_v37  ;;  %v5008_v17 = vsel %vm294_vm0, %v5003_v12, %v5007_v6  ;;  %v5391_v12 = vld [vmem:[#allocation13 + $0x308] sm:$0xff]  ;;  %v5412_v14 = vld [vmem:[#allocation13 + $0x3b0] sm:$0xff] }
 0x8e0   :  { %v5009_v28 = vrot.slane %v4933_v7, 1  ;;  %v5068_v51 = vmax.f32 %v4930_v44, %v5008_v17  ;;  %v5079_v37 = vld [vmem:[#allocation10 + $0x10] sm:$0xff]  ;;  %v5396_v17 = vld [vmem:[#allocation13 + $0x330] sm:$0xff] }
 0x8e1   :  { %v5011_v40 = vrot.slane %v4934_v5, 1  ;;  %v4900_v58 = vpop.f32.mrb[144].mxu1  ;;  %v6982_v59 = vpack.c.bf16 %v5067_v56, %v5065_v1  ;;  %v5393_v1 = vld [vmem:[#allocation13 + $0x318] sm:$0xff]  ;;  %v7036_v56 = vpack.c.bf16 %v5395_v32, %v5394_v21 }
 0x8e2   :  { %v5010_v27 = vsel %vm294_vm0, %v5005_v45, %v5009_v28  ;;  %v4935_v63 = vmax.f32 %v9907_v19, %v4900_v58  ;;  %v4902_v29 = vpop.f32.mrb[145].mxu1  ;;  %v6980_v55 = vpack.c.bf16 %v5068_v51, %v5066_v35  ;;  %v5078_v45 = vld [vmem:[#allocation10 + $0x8] sm:$0xff]  ;;  %v7032_v35 = vpack.c.bf16 %v5393_v1, %v5392_v50  ;;  %v5080_v51 = vld [vmem:[#allocation10 + $0x18] sm:$0xff]  ;;  %v5081_v58 = vld [vmem:[#allocation10 + $0x20] sm:$0xff] }
 0x8e3   :  { %v5069_v4 = vmax.f32 %v4931_v2, %v5010_v27  ;;  %v4936_v46 = vmax.f32 %v9909_v15, %v4902_v29  ;;  %v5012_v52 = vsel %vm294_vm0, %v5007_v6, %v5011_v40  ;;  %v7028_v2 = vpack.c.bf16 %v5391_v12, %v5390_v61  ;;  %v5415_v27 = vld [vmem:[#allocation13 + $0x3c8] sm:$0xff]  ;;  %v5284_v29 = vld [vmem:[#allocation13 + $0x1f0] sm:$0xff]  ;;  %v5512_v21 = vld [vmem:[#allocation13 + $0x498] sm:$0xff] }
 0x8e4   :  { %v5013_v0 = vrot.slane %v4935_v63, 1  ;;  %6981 = vmatprep.subr.bf16.mxu1 %v6980_v55  ;;  %v5070_v38 = vmax.f32 %v4932_v48, %v5012_v52  ;;  %v5410_v48 = vld [vmem:[#allocation13 + $0x3a0] sm:$0xff]  ;;  %v5285_v55 = vld [vmem:[#allocation13 + $0x1f8] sm:$0xff]  ;;  %v5399_v52 = vld [vmem:[#allocation13 + $0x348] sm:$0xff] }
 0x8e5   :  { %v5015_v42 = vrot.slane %v4936_v46, 1  ;;  %v4906_v33 = vpop.f32.mrb[146].mxu1  ;;  %6983 = vmatpush1.bf16.msra.mxu1 %v6982_v59  ;;  %v7034_v6 = vpack.c.bf16 %v5411_v49, %v5410_v48  ;;  %v5414_v59 = vld [vmem:[#allocation13 + $0x3c0] sm:$0xff]  ;;  %v5238_v61 = vld [vmem:[#allocation13 + $0x88] sm:$0xff] }
 0x8e6   :  { %v5014_v8 = vsel %vm294_vm0, %v5009_v28, %v5013_v0  ;;  %v4937_v24 = vmax.f32 %v9913_v36, %v4906_v33  ;;  %v4908_v30 = vpop.f32.mrb[147].mxu1  ;;  %v5407_v36 = vld [vmem:[#allocation13 + $0x388] sm:$0xff]  ;;  %v5397_v28 = vld [vmem:[#allocation13 + $0x338] sm:$0xff]  ;;  %v5493_v49 = vld [vmem:[#allocation13 + $0x400] sm:$0xff] }
 0x8e7   :  { %v5071_v31 = vmax.f32 %v4933_v7, %v5014_v8  ;;  %v4938_v19 = vmax.f32 %v9915_v39, %v4908_v30  ;;  %v5016_v9 = vsel %vm294_vm0, %v5011_v40, %v5015_v42  ;;  %v7026_v18 = vpack.c.bf16 %v5407_v36, %v5406_v34  ;;  %v5413_v7 = vld [vmem:[#allocation13 + $0x3b8] sm:$0xff]  ;;  %v5416_v8 = vld [vmem:[#allocation13 + $0x3d0] sm:$0xff] }
 0x8e8   :  { %v5017_v13 = vrot.slane %v4937_v24, 1  ;;  %v5072_v15 = vmax.f32 %v4934_v5, %v5016_v9  ;;  %v7038_v5 = vpack.c.bf16 %v5413_v7, %v5412_v14  ;;  %v7040_v40 = vpack.c.bf16 %v5397_v28, %v5396_v17  ;;  %v5400_v30 = vld [vmem:[#allocation13 + $0x350] sm:$0xff]  ;;  %v5421_v34 = vld [vmem:[#allocation13 + $0x3f8] sm:$0xff]  ;;  %v5513_v17 = vld [vmem:[#allocation13 + $0x4a0] sm:$0xff] }
 0x8e9   :  { %v5019_v47 = vrot.slane %v4938_v19, 1  ;;  %v6986_v11 = vpack.c.bf16 %v5071_v31, %v5069_v4  ;;  %v5398_v4 = vld [vmem:[#allocation13 + $0x340] sm:$0xff]  ;;  %v5514_v28 = vld [vmem:[#allocation13 + $0x4a8] sm:$0xff] }
 0x8ea   :  { %v5018_v53 = vsel %vm294_vm0, %v5013_v0, %v5017_v13  ;;  %v5075_v43 = vmax.f32 %v4937_v24, %v5017_v13  ;;  %v6984_v26 = vpack.c.bf16 %v5072_v15, %v5070_v38  ;;  %v7044_v0 = vpack.c.bf16 %v5399_v52, %v5398_v4  ;;  %v5268_v38 = vld [vmem:[#allocation13 + $0x170] sm:$0xff]  ;;  %v5417_v24 = vld [vmem:[#allocation13 + $0x3d8] sm:$0xff]  ;;  %v5418_v13 = vld [vmem:[#allocation13 + $0x3e0] sm:$0xff] }
 0x8eb   :  { %v5073_v41 = vmax.f32 %v4935_v63, %v5018_v53  ;;  %v5020_v20 = vsel %vm294_vm0, %v5015_v42, %v5019_v47  ;;  %v5076_v10 = vmax.f32 %v4938_v19, %v5019_v47  ;;  %v7042_v63 = vpack.c.bf16 %v5415_v27, %v5414_v59  ;;  %v5269_v42 = vld [vmem:[#allocation13 + $0x178] sm:$0xff]  ;;  %v5419_v15 = vld [vmem:[#allocation13 + $0x3e8] sm:$0xff]  ;;  %v5509_v47 = vld [vmem:[#allocation13 + $0x480] sm:$0xff] }
 0x8ec   :  { %v5074_v44 = vmax.f32 %v4936_v46, %v5020_v20  ;;  %6985 = vmatprep.subr.bf16.mxu1 %v6984_v26  ;;  %v7022_v46 = vpack.c.bf16 %v5285_v55, %v5284_v29  ;;  %v7024_v33 = vpack.c.bf16 %v5269_v42, %v5268_v38  ;;  %v7046_v31 = vpack.c.bf16 %v5417_v24, %v5416_v8  ;;  %v5401_v19 = vld [vmem:[#allocation13 + $0x358] sm:$0xff]  ;;  %v5510_v53 = vld [vmem:[#allocation13 + $0x488] sm:$0xff]  ;;  %v5221_v55 = vld [vmem:[#allocation13] sm:$0xff] }
 0x8ed   :  { %v6991_v57 = vpack.c.bf16 %v5075_v43, %v5073_v41  ;;  %6987 = vmatpush1.bf16.msra.mxu1 %v6986_v11  ;;  %v7048_v9 = vpack.c.bf16 %v5401_v19, %v5400_v30  ;;  %v7050_v11 = vpack.c.bf16 %v5419_v15, %v5418_v13  ;;  %v5402_v43 = vld [vmem:[#allocation13 + $0x360] sm:$0xff]  ;;  %v5403_v26 = vld [vmem:[#allocation13 + $0x368] sm:$0xff]  ;;  %v7058_v41 = vpack.c.bf16 %v5510_v53, %v5509_v47  ;;  %v5515_v52 = vld [vmem:[#allocation13 + $0x4b0] sm:$0xff] }
 0x8ee   :  { %v6988_v39 = vpack.c.bf16 %v5076_v10, %v5074_v44  ;;  %7023 = vmatprep.subr.bf16.mxu0 %v7022_v46  ;;  %v7052_v20 = vpack.c.bf16 %v5403_v26, %v5402_v43  ;;  %v5420_v10 = vld [vmem:[#allocation13 + $0x3f0] sm:$0xff]  ;;  %v5498_v29 = vld [vmem:[#allocation13 + $0x428] sm:$0xff]  ;;  %v5240_v8 = vld [vmem:[#allocation13 + $0x98] sm:$0xff] }
 0x8ef   :  { %7025 = vmatpush3.bf16.msra.mxu0 %v7024_v33  ;;  %v7054_v36 = vpack.c.bf16 %v5421_v34, %v5420_v10  ;;  %v5404_v44 = vld [vmem:[#allocation13 + $0x370] sm:$0xff]  ;;  %v5222_v4 = vld [vmem:[#allocation13 + $0x8] sm:$0xff]  ;;  %v5517_v53 = vld [vmem:[#allocation13 + $0x4c0] sm:$0xff] }
 0x8f0   :  { %6990 = vmatprep.subr.msk.bf16.mxu1 %vm9442_vm8, %v6988_v39  ;;  %7059 = vmatprep.subr.bf16.mxu0 %v7058_v41  ;;  %v5239_v33 = vld [vmem:[#allocation13 + $0x90] sm:$0xff]  ;;  %v5518_v41 = vld [vmem:[#allocation13 + $0x4c8] sm:$0xff] }
 0x8f1   :  { %6993 = vmatpush1.bf16.msk.msra.mxu1 %vm9442_vm8, %v6991_v57  ;;  %v5405_v57 = vld [vmem:[#allocation13 + $0x378] sm:$0xff]  ;;  %v5499_v19 = vld [vmem:[#allocation13 + $0x430] sm:$0xff]  ;;  %v7094_v26 = vpack.c.bf16 %v5240_v8, %v5239_v33  ;;  %v5242_v10 = vld [vmem:[#allocation13 + $0xa8] sm:$0xff] }
 0x8f2   :  { %7027 = vmatprep.subr.bf16.mxu1 %v7026_v18  ;;  %v7056_v39 = vpack.c.bf16 %v5405_v57, %v5404_v44  ;;  %v5237_v18 = vld [vmem:[#allocation13 + $0x80] sm:$0xff]  ;;  %v5223_v47 = vld [vmem:[#allocation13 + $0x10] sm:$0xff]  ;;  %v5508_v8 = vld [vmem:[#allocation13 + $0x478] sm:$0xff] }
 0x8f3   :  { %v7090_v12 = vpack.c.bf16 %v5238_v61, %v5237_v18  ;;  %v5502_v18 = vld [vmem:[#allocation13 + $0x448] sm:$0xff]  ;;  %v5507_v33 = vld [vmem:[#allocation13 + $0x470] sm:$0xff] }
 0x8f4   :  { %6123 = vmatmul.mubr.msk.f32.vlgmr.msra.gmra.mrb[148].mxu1 %vm5094_vm9, %v5077_v25 }
 0x8f5   :  { %5186 = vmatprep.mubr.f32.mxu1 %v10213_v62  ;;  %7029 = vmatpush3.bf16.msra.mxu1 %v7028_v2  ;;  %v9991_v2 = vrot.slane %v5082_v16, %v3046_v22 }
 0x8f6   :  { %7031 = vmatprep.subr.bf16.mxu1 %v7030_v60  ;;  %v9995_v60 = vrot.slane %v5082_v16, %v3050_v54 }
 0x8f8   :  { %6124 = vmatmul.mubr.msk.f32.gmra.mrb[150].mxu1 %vm5094_vm9, %v5078_v45  ;;  %v5494_v45 = vld [vmem:[#allocation13 + $0x408] sm:$0xff] }
 0x8f9   :  { %5192 = vmatprep.mubr.f32.mxu1 %v10213_v62  ;;  %7033 = vmatpush3.bf16.msra.mxu1 %v7032_v35  ;;  %v7060_v7 = vpack.c.bf16 %v5494_v45, %v5493_v49  ;;  %v5243_v49 = vld [vmem:[#allocation13 + $0xb0] sm:$0xff]  ;;  %v5244_v45 = vld [vmem:[#allocation13 + $0xb8] sm:$0xff] }
 0x8fa   :  { %7035 = vmatprep.subr.bf16.mxu1 %v7034_v6  ;;  %v5511_v6 = vld [vmem:[#allocation13 + $0x490] sm:$0xff] }
 0x8fb   :  { %v7062_v54 = vpack.c.bf16 %v5512_v21, %v5511_v6  ;;  %v5503_v21 = vld [vmem:[#allocation13 + $0x450] sm:$0xff] }
 0x8fc   :  { %6125 = vmatmul.mubr.msk.f32.gmra.mrb[152].mxu1 %vm5094_vm9, %v5079_v37 }
 0x8fd   :  { %5198 = vmatprep.mubr.f32.mxu1 %v10213_v62  ;;  %7037 = vmatpush3.bf16.msra.mxu1 %v7036_v56  ;;  %v5495_v56 = vld [vmem:[#allocation13 + $0x410] sm:$0xff] }
 0x8fe   :  { %7039 = vmatprep.subr.bf16.mxu1 %v7038_v5  ;;  %v5496_v5 = vld [vmem:[#allocation13 + $0x418] sm:$0xff] }
 0x900   :  { %6126 = vmatmul.mubr.msk.f32.gmra.mrb[154].mxu1 %vm5094_vm9, %v5080_v51 }
 0x901   :  { %5204 = vmatprep.mubr.f32.mxu1 %v10213_v62  ;;  %7041 = vmatpush3.bf16.msra.mxu1 %v7040_v40  ;;  %v7064_v40 = vpack.c.bf16 %v5496_v5, %v5495_v56  ;;  %v5521_v56 = vld [vmem:[#allocation13 + $0x4e0] sm:$0xff]  ;;  %v5522_v5 = vld [vmem:[#allocation13 + $0x4e8] sm:$0xff] }
 0x902   :  { %7043 = vmatprep.subr.bf16.mxu1 %v7042_v63  ;;  %v7066_v63 = vpack.c.bf16 %v5514_v28, %v5513_v17  ;;  %v5245_v17 = vld [vmem:[#allocation13 + $0xc0] sm:$0xff]  ;;  %v5246_v28 = vld [vmem:[#allocation13 + $0xc8] sm:$0xff] }
 0x904   :  { %6127 = vmatmul.mubr.msk.f32.gmra.mrb[156].mxu1 %vm5094_vm9, %v5081_v58  ;;  %v5497_v58 = vld [vmem:[#allocation13 + $0x420] sm:$0xff] }
 0x905   :  { %7045 = vmatpush3.bf16.msra.mxu1 %v7044_v0  ;;  %v5516_v0 = vld [vmem:[#allocation13 + $0x4b8] sm:$0xff]  ;;  %v7068_v30 = vpack.c.bf16 %v5498_v29, %v5497_v58  ;;  %v5505_v58 = vld [vmem:[#allocation13 + $0x460] sm:$0xff] }
 0x906   :  { %7047 = vmatprep.subr.bf16.mxu1 %v7046_v31  ;;  %v7092_v31 = vpack.c.bf16 %v5222_v4, %v5221_v55  ;;  %v7070_v15 = vpack.c.bf16 %v5516_v0, %v5515_v52  ;;  %v5229_v29 = vld [vmem:[#allocation13 + $0x40] sm:$0xff]  ;;  %v5230_v55 = vld [vmem:[#allocation13 + $0x48] sm:$0xff]  ;;  %v5523_v4 = vld [vmem:[#allocation13 + $0x4f0] sm:$0xff] }
 0x907   :  { %v5247_v52 = vld [vmem:[#allocation13 + $0xd0] sm:$0xff]  ;;  %v5248_v0 = vld [vmem:[#allocation13 + $0xd8] sm:$0xff] }
 0x909   :  { %7049 = vmatpush3.bf16.msra.mxu1 %v7048_v9  ;;  %v5500_v9 = vld [vmem:[#allocation13 + $0x438] sm:$0xff] }
 0x90a   :  { %7051 = vmatprep.subr.bf16.mxu1 %v7050_v11  ;;  %v5224_v11 = vld [vmem:[#allocation13 + $0x18] sm:$0xff]  ;;  %v7072_v44 = vpack.c.bf16 %v5500_v9, %v5499_v19  ;;  %v5249_v9 = vld [vmem:[#allocation13 + $0xe0] sm:$0xff] }
 0x90b   :  { %v7096_v57 = vpack.c.bf16 %v5224_v11, %v5223_v47  ;;  %v5232_v19 = vld [vmem:[#allocation13 + $0x58] sm:$0xff]  ;;  %v5373_v47 = vld [vmem:[#allocation13 + $0x280] sm:$0xff]  ;;  %v5374_v11 = vld [vmem:[#allocation13 + $0x288] sm:$0xff] }
 0x90d   :  { %7053 = vmatpush3.bf16.msra.mxu1 %v7052_v20  ;;  %v5241_v20 = vld [vmem:[#allocation13 + $0xa0] sm:$0xff] }
 0x90e   :  { %7055 = vmatprep.subr.bf16.mxu1 %v7054_v36  ;;  %v7098_v16 = vpack.c.bf16 %v5242_v10, %v5241_v20  ;;  %v7122_v10 = vpack.c.bf16 %v5374_v11, %v5373_v47  ;;  %v5371_v11 = vld [vmem:[#allocation13 + $0x270] sm:$0xff] }
 0x911   :  { %7057 = vmatpush3.bf16.msra.mxu1 %v7056_v39  ;;  %v5501_v39 = vld [vmem:[#allocation13 + $0x440] sm:$0xff] }
 0x912   :  { %7091 = vmatprep.subr.bf16.mxu1 %v7090_v12  ;;  %v7074_v12 = vpack.c.bf16 %v5518_v41, %v5517_v53  ;;  %v5233_v41 = vld [vmem:[#allocation13 + $0x60] sm:$0xff] }
 0x9c7   :  { %v9987_v3 = vpop.f32.mrb[148].mxu1 }
 0x9c8   :  { %v5184_v25 = vpop.f32.mrb[149].mxu1 }
 0x9c9   :  { %v5185_v38 = vadd.f32 %v5184_v25, %v9995_v60  ;;  %v5225_v25 = vld [vmem:[#allocation13 + $0x20] sm:$0xff] }
 0x9cb   :  { %v5188_v50 = vpop.f32.mrb[150].mxu1  ;;  %v5212_v36 = vmax.f32 %v5185_v38, 0.0 }
 0x9cc   :  { %v5189_v1 = vadd.f32 %v5188_v50, %v9991_v2  ;;  %v5190_v48 = vpop.f32.mrb[151].mxu1  ;;  %v5226_v50 = vld [vmem:[#allocation13 + $0x28] sm:$0xff] }
 0x9cd   :  { %v5191_v35 = vadd.f32 %v5190_v48, %v9995_v60  ;;  %v5520_v48 = vld [vmem:[#allocation13 + $0x4d8] sm:$0xff]  ;;  %v7100_v6 = vpack.c.bf16 %v5226_v50, %v5225_v25  ;;  %v5235_v50 = vld [vmem:[#allocation13 + $0x70] sm:$0xff] }
 0x9ce   :  { %v5213_v37 = vmax.f32 %v5189_v1, 0.0  ;;  %v5519_v1 = vld [vmem:[#allocation13 + $0x4d0] sm:$0xff] }
 0x9cf   :  { %v5214_v32 = vmax.f32 %v5191_v35, 0.0  ;;  %v5194_v14 = vpop.f32.mrb[152].mxu1  ;;  %v7076_v35 = vpack.c.bf16 %v5502_v18, %v5501_v39  ;;  %v5252_v39 = vld [vmem:[#allocation13 + $0xf8] sm:$0xff] }
 0x9d0   :  { %v10000_v22 = vadd.f32 %v5194_v14, %v9991_v2  ;;  %v10002_v23 = vpop.f32.mrb[153].mxu1  ;;  %v7078_v14 = vpack.c.bf16 %v5520_v48, %v5519_v1  ;;  %v5236_v48 = vld [vmem:[#allocation13 + $0x78] sm:$0xff] }
 0x9d1   :  { %5350 = vmatprep.mubr.f32.mxu0 %v5214_v32  ;;  %v5504_v32 = vld [vmem:[#allocation13 + $0x458] sm:$0xff]  ;;  %v5197_v18 = vadd.f32 %v10002_v23, %v9995_v60 }
 0x9d2   :  { %5351 = vmatmul.mubr.f32.vlgmr.msra.gmra.mrb[64].mxu0 %v5213_v37  ;;  %v5227_v37 = vld [vmem:[#allocation13 + $0x30] sm:$0xff] }
 0x9d3   :  { %7061 = vmatpush3.bf16.msra.mxu0 %v7060_v7  ;;  %v5200_v51 = vpop.f32.mrb[154].mxu1  ;;  %v7102_v7 = vpack.c.bf16 %v5244_v45, %v5243_v49  ;;  %v5359_v49 = vld [vmem:[#allocation13 + $0x210] sm:$0xff]  ;;  %v5360_v45 = vld [vmem:[#allocation13 + $0x218] sm:$0xff] }
 0x9d4   :  { %v5201_v59 = vadd.f32 %v5200_v51, %v9991_v2  ;;  %v5202_v27 = vpop.f32.mrb[155].mxu1  ;;  %7063 = vmatprep.subr.bf16.mxu0 %v7062_v54  ;;  %v5228_v54 = vld [vmem:[#allocation13 + $0x38] sm:$0xff]  ;;  %v7080_v51 = vpack.c.bf16 %v5504_v32, %v5503_v21  ;;  %v5378_v21 = vld [vmem:[#allocation13 + $0x2a8] sm:$0xff]  ;;  %v5216_v32 = vmax.f32 %v5197_v18, 0.0  ;;  %v7128_v23 = vpack.c.bf16 %v5360_v45, %v5359_v49 }
 0x9d5   :  { %v5203_v46 = vadd.f32 %v5202_v27, %v9995_v60  ;;  %v7082_v27 = vpack.c.bf16 %v5522_v5, %v5521_v56  ;;  %v5379_v56 = vld [vmem:[#allocation13 + $0x2b0] sm:$0xff]  ;;  %v5380_v5 = vld [vmem:[#allocation13 + $0x2b8] sm:$0xff]  ;;  %v5758_v49 = vld [vmem:[#allocation16 + $0x60] sm:$0xff] }
 0x9d6   :  { %v5217_v42 = vmax.f32 %v5201_v59, 0.0  ;;  %v5506_v59 = vld [vmem:[#allocation13 + $0x468] sm:$0xff] }
 0x9d7   :  { %v5218_v24 = vmax.f32 %v5203_v46, 0.0  ;;  %7065 = vmatpush3.bf16.msra.mxu0 %v7064_v40  ;;  %v10007_v13 = vpop.f32.mrb[156].mxu1  ;;  %v7104_v40 = vpack.c.bf16 %v5228_v54, %v5227_v37  ;;  %v5524_v46 = vld [vmem:[#allocation13 + $0x4f8] sm:$0xff]  ;;  %v7084_v38 = vpack.c.bf16 %v5506_v59, %v5505_v58  ;;  %v5361_v37 = vld [vmem:[#allocation13 + $0x220] sm:$0xff]  ;;  %v5362_v54 = vld [vmem:[#allocation13 + $0x228] sm:$0xff] }
 0x9d8   :  { %7067 = vmatprep.subr.bf16.mxu0 %v7066_v63  ;;  %v5208_v43 = vpop.f32.mrb[157].mxu1  ;;  %v7106_v63 = vpack.c.bf16 %v5246_v28, %v5245_v17  ;;  %v5207_v53 = vadd.f32 %v10007_v13, %v9991_v2  ;;  %v5376_v13 = vld [vmem:[#allocation13 + $0x298] sm:$0xff]  ;;  %v7132_v17 = vpack.c.bf16 %v5362_v54, %v5361_v37  ;;  %v5381_v59 = vld [vmem:[#allocation13 + $0x2c0] sm:$0xff]  ;;  %v5751_v18 = vld [vmem:[#allocation16 + $0x28] sm:$0xff] }
 0x9d9   :  { %5486 = vmatprep.mubr.f32.mxu1 %v5218_v24  ;;  %v5209_v34 = vadd.f32 %v5208_v43, %v9995_v60  ;;  %v7086_v24 = vpack.c.bf16 %v5524_v46, %v5523_v4  ;;  %v7088_v43 = vpack.c.bf16 %v5508_v8, %v5507_v33  ;;  %v7120_v60 = vpack.c.bf16 %v5236_v48, %v5235_v50  ;;  %v5364_v58 = vld [vmem:[#allocation13 + $0x238] sm:$0xff]  ;;  %v5386_v33 = vld [vmem:[#allocation13 + $0x2e8] sm:$0xff] }
 0x9da   :  { %5487 = vmatmul.mubr.f32.vlgmr.msra.gmra.mrb[158].mxu1 %v5217_v42  ;;  %v7108_v42 = vpack.c.bf16 %v5230_v55, %v5229_v29  ;;  %v5366_v29 = vld [vmem:[#allocation13 + $0x248] sm:$0xff]  ;;  %v5383_v55 = vld [vmem:[#allocation13 + $0x2d0] sm:$0xff]  ;;  %v5384_v4 = vld [vmem:[#allocation13 + $0x2d8] sm:$0xff] }
 0x9db   :  { %7069 = vmatpush3.bf16.msra.mxu0 %v7068_v30  ;;  %7093 = vmatpush3.bf16.msra.mxu1 %v7092_v31  ;;  %v5220_v61 = vmax.f32 %v5209_v34, 0.0  ;;  %v7110_v30 = vpack.c.bf16 %v5248_v0, %v5247_v52  ;;  %v5231_v31 = vld [vmem:[#allocation13 + $0x50] sm:$0xff]  ;;  %v5234_v34 = vld [vmem:[#allocation13 + $0x68] sm:$0xff]  ;;  %v7142_v52 = vpack.c.bf16 %v5384_v4, %v5383_v55  ;;  %v5757_v48 = vld [vmem:[#allocation16 + $0x58] sm:$0xff] }
 0x9dc   :  { %5659 = vmatprep.mubr.f32.mxu1 %v5212_v36  ;;  %7071 = vmatprep.subr.bf16.mxu0 %v7070_v15  ;;  %v5250_v15 = vld [vmem:[#allocation13 + $0xe8] sm:$0xff]  ;;  %v5357_v36 = vld [vmem:[#allocation13 + $0x200] sm:$0xff]  ;;  %v5367_v0 = vld [vmem:[#allocation13 + $0x250] sm:$0xff] }
 0x9dd   :  { %7095 = vmatprep.subr.bf16.mxu1 %v7094_v26  ;;  %5589 = vmatprep.mubr.f32.mxu0 %v5220_v61  ;;  %v7112_v26 = vpack.c.bf16 %v5232_v19, %v5231_v31  ;;  %v7114_v20 = vpack.c.bf16 %v5250_v15, %v5249_v9  ;;  %v5219_v61 = vmax.f32 %v5207_v53, 0.0  ;;  %v5370_v31 = vld [vmem:[#allocation13 + $0x268] sm:$0xff]  ;;  %v5387_v19 = vld [vmem:[#allocation13 + $0x2f0] sm:$0xff]  ;;  %v5388_v9 = vld [vmem:[#allocation13 + $0x2f8] sm:$0xff] }
 0x9de   :  { %v7150_v47 = vpack.c.bf16 %v5388_v9, %v5387_v19  ;;  %v5372_v53 = vld [vmem:[#allocation13 + $0x278] sm:$0xff]  ;;  %v5853_v55 = vld [vmem:[#allocation19 + $0x68] sm:$0xff] }
 0x9df   :  { %7073 = vmatpush3.bf16.msra.mxu0 %v7072_v44  ;;  %7097 = vmatpush3.bf16.msra.mxu1 %v7096_v57  ;;  %v5358_v44 = vld [vmem:[#allocation13 + $0x208] sm:$0xff]  ;;  %v5251_v57 = vld [vmem:[#allocation13 + $0xf0] sm:$0xff]  ;;  %v5843_v54 = vld [vmem:[#allocation19 + $0x18] sm:$0xff] }
 0x9e0   :  { %7075 = vmatprep.subr.bf16.mxu0 %v7074_v12  ;;  %7099 = vmatprep.subr.bf16.mxu1 %v7098_v16  ;;  %v5375_v12 = vld [vmem:[#allocation13 + $0x290] sm:$0xff]  ;;  %v7116_v16 = vpack.c.bf16 %v5234_v34, %v5233_v41  ;;  %v7124_v25 = vpack.c.bf16 %v5358_v44, %v5357_v36  ;;  %v7118_v1 = vpack.c.bf16 %v5252_v39, %v5251_v57  ;;  %v5746_v41 = vld [vmem:[#allocation16] sm:$0xff]  ;;  %v7942_v34 = vmov 0.0|0.0   ;;  %v5749_v44 = vld [vmem:[#allocation16 + $0x18] sm:$0xff] }
 0x9e1   :  { %v5750_v39 = vld [vmem:[#allocation16 + $0x20] sm:$0xff] }
 0x9e3   :  { %7077 = vmatpush3.bf16.msra.mxu0 %v7076_v35  ;;  %7101 = vmatpush3.bf16.msra.mxu1 %v7100_v6  ;;  %v7126_v35 = vpack.c.bf16 %v5376_v13, %v5375_v12  ;;  %v5377_v6 = vld [vmem:[#allocation13 + $0x2a0] sm:$0xff] }
 0x9e4   :  { %7079 = vmatprep.subr.bf16.mxu0 %v7078_v14  ;;  %7103 = vmatprep.subr.bf16.mxu1 %v7102_v7  ;;  %v5183_v14 = vadd.f32 %v9987_v3, %v9991_v2  ;;  %v7130_v7 = vpack.c.bf16 %v5378_v21, %v5377_v6  ;;  %v5753_v12 = vld [vmem:[#allocation16 + $0x38] sm:$0xff]  ;;  %v5760_v21 = vld [vmem:[#allocation16 + $0x70] sm:$0xff] }
 0x9e6   :  { %v5211_v28 = vmax.f32 %v5183_v14, 0.0  ;;  %v5842_v14 = vld [vmem:[#allocation19 + $0x10] sm:$0xff] }
 0x9e7   :  { %7081 = vmatpush3.bf16.msra.mxu0 %v7080_v51  ;;  %7105 = vmatpush3.bf16.msra.mxu1 %v7104_v40  ;;  %v7134_v51 = vpack.c.bf16 %v5380_v5, %v5379_v56  ;;  %v5363_v40 = vld [vmem:[#allocation13 + $0x230] sm:$0xff]  ;;  %v7182_v56 = vpack.c.bf16 %v5843_v54, %v5842_v14 }
 0x9e8   :  { %7083 = vmatprep.subr.bf16.mxu0 %v7082_v27  ;;  %7107 = vmatprep.subr.bf16.mxu1 %v7106_v63  ;;  %v5382_v27 = vld [vmem:[#allocation13 + $0x2c8] sm:$0xff]  ;;  %v7136_v3 = vpack.c.bf16 %v5364_v58, %v5363_v40  ;;  %v5365_v63 = vld [vmem:[#allocation13 + $0x240] sm:$0xff] }
 0x9e9   :  { %v7138_v2 = vpack.c.bf16 %v5382_v27, %v5381_v59  ;;  %v7140_v46 = vpack.c.bf16 %v5366_v29, %v5365_v63  ;;  %v5845_v5 = vld [vmem:[#allocation19 + $0x28] sm:$0xff]  ;;  %v5848_v58 = vld [vmem:[#allocation19 + $0x40] sm:$0xff] }
 0x9ea   :  { %v5849_v59 = vld [vmem:[#allocation19 + $0x48] sm:$0xff]  ;;  %v5852_v29 = vld [vmem:[#allocation19 + $0x60] sm:$0xff] }
 0x9eb   :  { %7085 = vmatpush3.bf16.msra.mxu0 %v7084_v38  ;;  %7109 = vmatpush3.bf16.msra.mxu1 %v7108_v42  ;;  %v5368_v38 = vld [vmem:[#allocation13 + $0x258] sm:$0xff]  ;;  %v5385_v42 = vld [vmem:[#allocation13 + $0x2e0] sm:$0xff]  ;;  %v7191_v27 = vpack.c.bf16 %v5849_v59, %v5848_v58  ;;  %v7197_v4 = vpack.c.bf16 %v5853_v55, %v5852_v29 }
 0x9ec   :  { %7087 = vmatprep.subr.bf16.mxu0 %v7086_v24  ;;  %7111 = vmatprep.subr.bf16.mxu1 %v7110_v30  ;;  %v7144_v8 = vpack.c.bf16 %v5368_v38, %v5367_v0  ;;  %v7146_v24 = vpack.c.bf16 %v5386_v33, %v5385_v42  ;;  %v5369_v30 = vld [vmem:[#allocation13 + $0x260] sm:$0xff] }
 0x9ed   :  { %v7148_v15 = vpack.c.bf16 %v5370_v31, %v5369_v30 }
 0x9ef   :  { %7089 = vmatpush3.bf16.msra.mxu0 %v7088_v43  ;;  %7113 = vmatpush3.bf16.msra.mxu1 %v7112_v26  ;;  %v7152_v43 = vpack.c.bf16 %v5372_v53, %v5371_v11  ;;  %v5215_v26 = vmax.f32 %v10000_v22, 0.0  ;;  %v5752_v22 = vld [vmem:[#allocation16 + $0x30] sm:$0xff] }
 0x9f0   :  { %7115 = vmatprep.subr.bf16.mxu1 %v7114_v20  ;;  %7123 = vmatprep.subr.bf16.mxu0 %v7122_v10  ;;  %v5747_v20 = vld [vmem:[#allocation16 + $0x8] sm:$0xff]  ;;  %v5748_v10 = vld [vmem:[#allocation16 + $0x10] sm:$0xff]  ;;  %v7164_v13 = vpack.c.bf16 %v5753_v12, %v5752_v22 }
 0x9f1   :  { %v7155_v36 = vpack.c.bf16 %v5747_v20, %v5746_v41  ;;  %v7158_v57 = vpack.c.bf16 %v5749_v44, %v5748_v10  ;;  %v6128_v41 = vld [vmem:[#allocation15] ss:$0 sm:$0xff] }
 0x9f2   :  { %5590 = vmatmul.mubr.f32.vlgmr.msra.gmra.mrb[66].mxu0 %v5219_v61  ;;  %v7161_v61 = vpack.c.bf16 %v5751_v18, %v5750_v39  ;;  %v5855_v44 = vld [vmem:[#allocation19 + $0x78] sm:$0xff] }
 0x9f3   :  { %7117 = vmatpush3.bf16.msra.mxu1 %v7116_v16  ;;  %7125 = vmatpush3.bf16.msra.mxu0 %v7124_v25  ;;  %v5754_v16 = vld [vmem:[#allocation16 + $0x40] sm:$0xff]  ;;  %v5755_v25 = vld [vmem:[#allocation16 + $0x48] sm:$0xff] }
 0x9f4   :  { %5729 = vmatprep.mubr.f32.mxu0 %v5216_v32  ;;  %7119 = vmatprep.subr.bf16.mxu1 %v7118_v1  ;;  %v7167_v50 = vpack.c.bf16 %v5755_v25, %v5754_v16  ;;  %v5756_v1 = vld [vmem:[#allocation16 + $0x50] sm:$0xff]  ;;  %v5761_v32 = vld [vmem:[#allocation16 + $0x78] sm:$0xff]  ;;  %v6129_v39 = vld [vmem:[#allocation18] ss:$0 sm:$0xff] }
 0x9f5   :  { %7127 = vmatprep.subr.bf16.mxu0 %v7126_v35  ;;  %v7170_v45 = vpack.c.bf16 %v5757_v48, %v5756_v1  ;;  %v5759_v35 = vld [vmem:[#allocation16 + $0x68] sm:$0xff] }
 0x9f6   :  { %v7173_v6 = vpack.c.bf16 %v5759_v35, %v5758_v49 }
 0x9f7   :  { %7121 = vmatpush3.bf16.msra.mxu1 %v7120_v60  ;;  %7129 = vmatpush3.bf16.msra.mxu0 %v7128_v23  ;;  %v5840_v60 = vld [vmem:[#allocation19] sm:$0xff]  ;;  %v5841_v23 = vld [vmem:[#allocation19 + $0x8] sm:$0xff] }
 0x9f8   :  { %7131 = vmatprep.subr.bf16.mxu0 %v7130_v7  ;;  %7154 = vmatprep.subr.bf16.mxu1 %v7942_v34  ;;  %v7176_v7 = vpack.c.bf16 %v5761_v32, %v5760_v21  ;;  %v7179_v37 = vpack.c.bf16 %v5841_v23, %v5840_v60 }
 0x9fa   :  { %5660 = vmatmul.mubr.f32.vlgmr.msra.gmra.mrb[160].mxu1 %v5211_v28  ;;  %v5846_v28 = vld [vmem:[#allocation19 + $0x30] sm:$0xff] }
 0x9fb   :  { %7133 = vmatpush3.bf16.msra.mxu0 %v7132_v17  ;;  %7156 = vmatpush3.bf16.msra.mxu1 %v7155_v36  ;;  %v5854_v36 = vld [vmem:[#allocation19 + $0x70] sm:$0xff] }
 0x9fc   :  { %7135 = vmatprep.subr.bf16.mxu0 %v7134_v51  ;;  %7157 = vmatprep.subr.bf16.mxu1 %v7942_v34  ;;  %v5847_v51 = vld [vmem:[#allocation19 + $0x38] sm:$0xff] }
 0x9fd   :  { %6372 = vmatprep.mubr.msk.f32.mxu1 %vm7943_vm10, %v10213_v62  ;;  %v7188_v40 = vpack.c.bf16 %v5847_v51, %v5846_v28 }
 0x9ff   :  { %7137 = vmatpush3.bf16.msra.mxu0 %v7136_v3  ;;  %7159 = vmatpush3.bf16.msra.mxu1 %v7158_v57  ;;  %v5850_v3 = vld [vmem:[#allocation19 + $0x50] sm:$0xff]  ;;  %v7200_v57 = vpack.c.bf16 %v5855_v44, %v5854_v36 }
 0xa00   :  { %7139 = vmatprep.subr.bf16.mxu0 %v7138_v2  ;;  %7160 = vmatprep.subr.bf16.mxu1 %v7942_v34  ;;  %v5851_v2 = vld [vmem:[#allocation19 + $0x58] sm:$0xff] }
 0xa01   :  { %v7194_v63 = vpack.c.bf16 %v5851_v2, %v5850_v3 }
 0xa03   :  { %7141 = vmatpush3.bf16.msra.mxu0 %v7140_v46  ;;  %7162 = vmatpush3.bf16.msra.mxu1 %v7161_v61 }
 0xa04   :  { %7143 = vmatprep.subr.bf16.mxu0 %v7142_v52  ;;  %7163 = vmatprep.subr.bf16.mxu1 %v7942_v34 }
 0xa07   :  { %7145 = vmatpush3.bf16.msra.mxu0 %v7144_v8  ;;  %7165 = vmatpush3.bf16.msra.mxu1 %v7164_v13  ;;  %v6130_v13 = vld [vmem:[#allocation21] ss:$0 sm:$0xff] }
 0xa08   :  { %7147 = vmatprep.subr.bf16.mxu0 %v7146_v24  ;;  %7166 = vmatprep.subr.bf16.mxu1 %v7942_v34 }
 0xa0b   :  { %7149 = vmatpush3.bf16.msra.mxu0 %v7148_v15  ;;  %7168 = vmatpush3.bf16.msra.mxu1 %v7167_v50 }
 0xa0c   :  { %7151 = vmatprep.subr.bf16.mxu0 %v7150_v47  ;;  %7169 = vmatprep.subr.bf16.mxu1 %v7942_v34 }
 0xa0f   :  { %7153 = vmatpush3.bf16.msra.mxu0 %v7152_v43  ;;  %7171 = vmatpush3.bf16.msra.mxu1 %v7170_v45 }
 0xa10   :  { %7178 = vmatprep.subr.bf16.mxu0 %v7942_v34  ;;  %7172 = vmatprep.subr.bf16.mxu1 %v7942_v34 }
 0xa12   :  { %5730 = vmatmul.mubr.f32.vlgmr.msra.gmra.mrb[68].mxu0 %v5215_v26 }
 0xa13   :  { %6407 = vmatprep.mubr.msk.f32.mxu0 %vm7943_vm10, %v10213_v62  ;;  %7174 = vmatpush3.bf16.msra.mxu1 %v7173_v6  ;;  %v5844_v62 = vld [vmem:[#allocation19 + $0x20] sm:$0xff] }
 0xa14   :  { %7175 = vmatprep.subr.bf16.mxu1 %v7942_v34  ;;  %7180 = vmatpush3.bf16.msra.mxu0 %v7179_v37  ;;  %v7185_v17 = vpack.c.bf16 %v5845_v5, %v5844_v62 }
 0xa15   :  { %7181 = vmatprep.subr.bf16.mxu0 %v7942_v34 }
 0xa17   :  { %7177 = vmatpush3.bf16.msra.mxu1 %v7176_v7 }
 0xa18   :  { %7183 = vmatpush3.bf16.msra.mxu0 %v7182_v56 }
 0xa19   :  { %7184 = vmatprep.subr.bf16.mxu0 %v7942_v34 }
 0xa1c   :  { %7186 = vmatpush3.bf16.msra.mxu0 %v7185_v17 }
 0xa1d   :  { %7187 = vmatprep.subr.bf16.mxu0 %v7942_v34 }
 0xa20   :  { %7189 = vmatpush3.bf16.msra.mxu0 %v7188_v40 }
 0xa21   :  { %7190 = vmatprep.subr.bf16.mxu0 %v7942_v34 }
 0xa24   :  { %7192 = vmatpush3.bf16.msra.mxu0 %v7191_v27 }
 0xa25   :  { %7193 = vmatprep.subr.bf16.mxu0 %v7942_v34 }
 0xa28   :  { %7195 = vmatpush3.bf16.msra.mxu0 %v7194_v63 }
 0xa29   :  { %7196 = vmatprep.subr.bf16.mxu0 %v7942_v34 }
 0xa2c   :  { %7198 = vmatpush3.bf16.msra.mxu0 %v7197_v4 }
 0xa2d   :  { %7199 = vmatprep.subr.bf16.mxu0 %v7942_v34 }
 0xa30   :  { %7201 = vmatpush3.bf16.msra.mxu0 %v7200_v57 }
 0xaa5   :  { %v6163_v46 = vpop.f32.mrb[64].mxu0 }
 0xaa6   :  { %v6164_v52 = vpop.f32.mrb[65].mxu0 }
 0xaa7   :  { %v6165_v0 = vadd.f32 %v6164_v52, %v6163_v46 }
 0xaad   :  { %v6198_v38 = vpop.f32.mrb[158].mxu1 }
 0xaae   :  { %v6199_v42 = vpop.f32.mrb[159].mxu1 }
 0xaaf   :  { %v6200_v33 = vadd.f32 %v6199_v42, %v6198_v38 }
 0xac5   :  { %v6233_v8 = vpop.f32.mrb[66].mxu0 }
 0xac6   :  { %v6234_v24 = vpop.f32.mrb[67].mxu0 }
 0xac7   :  { %v6235_v30 = vadd.f32 %v6234_v24, %v6233_v8 }
 0xacd   :  { %v6268_v31 = vpop.f32.mrb[160].mxu1 }
 0xace   :  { %v6269_v19 = vpop.f32.mrb[161].mxu1 }
 0xacf   :  { %v6270_v9 = vadd.f32 %v6269_v19, %v6268_v31 }
 0xad1   :  { %v5662_v15 = vadd.f32 %v6270_v9, %v6165_v0 }
 0xae5   :  { %v6303_v47 = vpop.f32.mrb[68].mxu0 }
 0xae6   :  { %v6304_v11 = vpop.f32.mrb[69].mxu0 }
 0xae7   :  { %v6305_v53 = vadd.f32 %v6304_v11, %v6303_v47 }
 0xae9   :  { %v5732_v43 = vadd.f32 %v6305_v53, %v6200_v33 }
 0xaeb   :  { %v5735_v26 = vadd.f32 %v5732_v43, %v5662_v15 }
 0xaed   :  { %v5736_v20 = vadd.f32 %v6235_v30, %v5735_v26 }
 0xaef   :  { %v5744_v10 = vadd.f32 %v6128_v41, %v5736_v20 }
 0xaf1   :  { %v5745_v34 = vmax.f32 %v5744_v10, 0.0 }
 0xaf3   :  { %6373 = vmatmul.mubr.f32.vlgmr.msra.gmra.mrb[162].mxu1 %v5745_v34 }
 0xbc6   :  { %v5835_v18 = vpop.f32.mrb[162].mxu1 }
 0xbc7   :  { %v5836_v61 = vadd.f32 %v6129_v39, %v5835_v18  ;;  %v6374_v22 = vpop.f32.mrb[163].mxu1 }
 0xbc9   :  { %v5839_v12 = vmax.f32 %v5836_v61, 0.0 }
 0xbcb   :  { %6408 = vmatmul.mubr.f32.vlgmr.msra.gmra.mrb[70].mxu0 %v5839_v12 }
 0xc9e   :  { %v5929_v16 = vpop.f32.mrb[70].mxu0 }
 0xc9f   :  { %v5930_v25 = vadd.f32 %v6130_v13, %v5929_v16  ;;  %v6409_v50 = vpop.f32.mrb[71].mxu0 }
 0xca1   :  { %5933 = vst [vmem:[%s10052_s14] sm:$0xff] %v5930_v25 }
 0xca2   :  { %5938 = vsyncpa [#allocation3], 1 }
 0xca3   :  { %5939 = vsyncpa [#allocation5], 1 }
 0xca4   :  { %5940 = vsyncpa [#allocation8], 1 }
 0xca5   :  { %5941 = vsyncpa [#allocation11], 1 }
 0xca6   :  { %5942 = vsyncpa [#allocation14], 1 }
 0xca7   :  { %5943 = vsyncpa [#allocation17], 1 }
 0xca8   :  { %5944 = vsyncpa [#allocation20], 1 }

</bundles_post_ra>
